<compile_context>
chip_gen: v7x
topology: tpu7x:2x2x1
jax: 0.10.0
libtpu: 0.0.40
codegen_flags: <defaults>
</compile_context>

<pallas_src>
import jax
import jax.numpy as jnp
from jax.experimental import pallas as pl
from jax.experimental.pallas import tpu as pltpu


# ----------------------------------------------------------------------------
# Host-side parameter fusion: pack the two directions of one LSTM layer into
#   wih  : (D_in, 8H)  column order = gate-major (i,f,g,o), direction-minor
#   whh  : (2H, 8H)    block-diagonal (fwd rows -> fwd cols, bwd rows -> bwd cols)
#   bias : (1, 8H)     (b_ih + b_hh), same column order
# ----------------------------------------------------------------------------
def _fuse_direction_params(w_ih_f, w_hh_f, b_f, w_ih_b, w_hh_b, b_b):
    H = w_hh_f.shape[1]

    def interleave(cf, cb):
        # cf/cb: (R, 4H) -> (R, 8H) with column index k*2H + d*H + j
        R = cf.shape[0]
        return jnp.stack(
            [cf.reshape(R, 4, H), cb.reshape(R, 4, H)], axis=2).reshape(R, 8 * H)

    wih = interleave(w_ih_f.T, w_ih_b.T)                       # (D_in, 8H)
    bias = interleave(b_f[None, :], b_b[None, :])              # (1, 8H)

    zero = jnp.zeros((H, 4, H), jnp.float32)
    top = jnp.stack([w_hh_f.T.reshape(H, 4, H), zero], axis=2).reshape(H, 8 * H)
    bot = jnp.stack([zero, w_hh_b.T.reshape(H, 4, H)], axis=2).reshape(H, 8 * H)
    whh = jnp.concatenate([top, bot], axis=0)                  # (2H, 8H)
    return wih, whh, bias


# ----------------------------------------------------------------------------
# Fused Pallas kernel: full 2-layer BiLSTM + linear head, single invocation.
# ----------------------------------------------------------------------------
def _make_bilstm_kernel(num_layers):
    def kernel(*refs):
        x_ref = refs[0]
        layer_refs = refs[1:1 + 3 * num_layers]
        wout_ref = refs[1 + 3 * num_layers]
        bout_ref = refs[2 + 3 * num_layers]
        o_ref = refs[3 + 3 * num_layers]
        gx_buf = refs[4 + 3 * num_layers]      # (B, T, 8H) input-projection scratch
        fwd_buf = refs[5 + 3 * num_layers]     # (B, T, H) per-layer fwd outputs
        bwd_buf = refs[6 + 3 * num_layers]     # (B, T, H) per-layer bwd outputs

        B, T, D = x_ref.shape
        H2 = layer_refs[1].shape[0]            # layer-0 W_hh: (2H, 8H)
        H = H2 // 2
        H8 = 8 * H

        # Column c of the fused 8H gate axis belongs to the forward direction
        # iff (c mod 2H) < H  (gate-major, direction-minor layout).
        fwd_mask = (jax.lax.broadcasted_iota(jnp.int32, (B, H8), 1) % H2) < H

        def run_layer(whh):
            """Recurrence over time with both directions fused in one matmul.
            Reads gx_buf (precomputed x-projection + bias for all timesteps);
            writes the layer's outputs into fwd_buf / bwd_buf."""
            h = jnp.zeros((B, H2), jnp.float32)
            c = jnp.zeros((B, H2), jnp.float32)
            for s in range(T):                 # fully unrolled static time loop
                g_in = jnp.where(fwd_mask,
                                 gx_buf[:, s, :],          # fwd reads time s
                                 gx_buf[:, T - 1 - s, :])  # bwd reads time T-1-s
                gates = g_in + jnp.dot(h, whh,
                                       preferred_element_type=jnp.float32)
                sg = jax.nn.sigmoid(gates)     # whole 8H-wide register
                tg = jnp.tanh(gates)
                i_g = sg[:, 0 * H2:1 * H2]
                f_g = sg[:, 1 * H2:2 * H2]
                g_g = tg[:, 2 * H2:3 * H2]
                o_g = sg[:, 3 * H2:4 * H2]
                c = f_g * c + i_g * g_g
                h = o_g * jnp.tanh(c)
                fwd_buf[:, s, :] = h[:, 0:H]             # fwd h at time s
                bwd_buf[:, T - 1 - s, :] = h[:, H:H2]    # bwd h at time T-1-s

        # ---- layer 0: input projection hoisted out of the recurrence ----
        wih0_ref, whh0_ref, b0_ref = layer_refs[0:3]
        x2d = x_ref[...].reshape(B * T, D)
        gx_buf[...] = (
            jnp.dot(x2d, wih0_ref[...], preferred_element_type=jnp.float32)
            + b0_ref[...]).reshape(B, T, H8)
        run_layer(whh0_ref[...])

        # ---- layers 1..L-1 (input = previous layer's fwd|bwd outputs) ----
        # TODO(synk): nn.LSTM inter-layer dropout (p=0.3) skipped (eval semantics).
        for l in range(1, num_layers):
            wih_ref, whh_ref, bl_ref = layer_refs[3 * l:3 * l + 3]
            f_prev = fwd_buf[...].reshape(B * T, H)
            b_prev = bwd_buf[...].reshape(B * T, H)
            # Row-split matmuls avoid materializing the (B, T, 2H) concat.
            gx_buf[...] = (
                jnp.dot(f_prev, wih_ref[0:H, :],
                        preferred_element_type=jnp.float32)
                + jnp.dot(b_prev, wih_ref[H:H2, :],
                          preferred_element_type=jnp.float32)
                + bl_ref[...]).reshape(B, T, H8)
            run_layer(whh_ref[...])

        # ---- linear head fused into the epilogue ----
        f_last = fwd_buf[...].reshape(B * T, H)
        b_last = bwd_buf[...].reshape(B * T, H)
        outs = (jnp.dot(f_last, wout_ref[0:H, :],
                        preferred_element_type=jnp.float32)
                + jnp.dot(b_last, wout_ref[H:H2, :],
                          preferred_element_type=jnp.float32)
                + bout_ref[...])
        o_ref[...] = outs.reshape(B, T, -1)

    return kernel


@jax.jit
def bilstm_forward(x, layer_params, out_w_t, out_b2d):
    """x: (batch, time, input_size); layer_params: tuple of fused (wih, whh, bias)
    per layer; out_w_t: (2H, pre_len); out_b2d: (1, pre_len)."""
    B, T, _ = x.shape
    H = out_w_t.shape[0] // 2
    P = out_w_t.shape[1]
    num_layers = len(layer_params)
    flat_params = [p for layer in layer_params for p in layer]
    return pl.pallas_call(
        _make_bilstm_kernel(num_layers),
        out_shape=jax.ShapeDtypeStruct((B, T, P), jnp.float32),
        scratch_shapes=[
            pltpu.VMEM((B, T, 8 * H), jnp.float32),   # gx (input projection)
            pltpu.VMEM((B, T, H), jnp.float32),       # fwd layer outputs
            pltpu.VMEM((B, T, H), jnp.float32),       # bwd layer outputs
        ],
    )(x, *flat_params, out_w_t, out_b2d)


# ----------------------------------------------------------------------------
# Deterministic parameter construction (PyTorch-style uniform init).
# ----------------------------------------------------------------------------
def make_raw_params(key, input_size, hidden_size, num_layers, pre_len):
    stdv = 1.0 / (hidden_size ** 0.5)
    H = hidden_size
    raw_layers = []
    for layer in range(num_layers):
        d_in = input_size if layer == 0 else 2 * H
        dirs = []
        for _direction in range(2):
            key, k1, k2, k3, k4 = jax.random.split(key, 5)
            w_ih = jax.random.uniform(k1, (4 * H, d_in), jnp.float32, -stdv, stdv)
            w_hh = jax.random.uniform(k2, (4 * H, H), jnp.float32, -stdv, stdv)
            b_ih = jax.random.uniform(k3, (4 * H,), jnp.float32, -stdv, stdv)
            b_hh = jax.random.uniform(k4, (4 * H,), jnp.float32, -stdv, stdv)
            dirs.append((w_ih, w_hh, b_ih + b_hh))
        raw_layers.append(tuple(dirs))
    key, k1, k2 = jax.random.split(key, 3)
    stdv_o = 1.0 / ((2 * H) ** 0.5)
    out_w = jax.random.uniform(k1, (pre_len, 2 * H), jnp.float32, -stdv_o, stdv_o)
    out_b = jax.random.uniform(k2, (pre_len,), jnp.float32, -stdv_o, stdv_o)
    return tuple(raw_layers), out_w, out_b


def fuse_params(raw_layers, out_w, out_b):
    layer_params = tuple(
        _fuse_direction_params(*fwd, *bwd) for (fwd, bwd) in raw_layers)
    return layer_params, out_w.T, out_b[None, :]


# ----------------------------------------------------------------------------
# Pure-JAX reference (matches PyTorch bidirectional nn.LSTM + Linear, eval).
# ----------------------------------------------------------------------------
def reference_forward(x, raw_layers, out_w, out_b):
    def run_dir(seq, w_ih, w_hh, b, reverse):
        B, T, _ = seq.shape
        H = w_hh.shape[1]
        h = jnp.zeros((B, H), jnp.float32)
        c = jnp.zeros((B, H), jnp.float32)
        outs = [None] * T
        order = range(T - 1, -1, -1) if reverse else range(T)
        for t in order:
            g = seq[:, t, :] @ w_ih.T + h @ w_hh.T + b
            i = jax.nn.sigmoid(g[:, 0:H])
            f = jax.nn.sigmoid(g[:, H:2 * H])
            gg = jnp.tanh(g[:, 2 * H:3 * H])
            o = jax.nn.sigmoid(g[:, 3 * H:4 * H])
            c = f * c + i * gg
            h = o * jnp.tanh(c)
            outs[t] = h
        return jnp.stack(outs, axis=1)

    layer_in = x
    for (fwd, bwd) in raw_layers:
        of = run_dir(layer_in, *fwd, reverse=False)
        ob = run_dir(layer_in, *bwd, reverse=True)
        layer_in = jnp.concatenate([of, ob], axis=-1)
    B, T, _ = layer_in.shape
    flat = layer_in.reshape(B * T, -1)
    return (flat @ out_w.T + out_b).reshape(B, T, -1)


if __name__ == "__main__":
    # Small shapes consistent with the module's forward:
    #   input_size (the module's `seq_len` arg) = 16, hidden_size = 32,
    #   num_layers = 2, pre_len = 8, batch = 2, time steps = 8.
    batch, time_steps, input_size = 2, 8, 16
    hidden_size, num_layers, pre_len = 32, 2, 8

    key = jax.random.PRNGKey(0)
    key, kx, kp = jax.random.split(key, 3)
    x = jax.random.normal(kx, (batch, time_steps, input_size), jnp.float32)

    raw_layers, out_w, out_b = make_raw_params(
        kp, input_size, hidden_size, num_layers, pre_len)
    layer_params, out_w_t, out_b2d = fuse_params(raw_layers, out_w, out_b)

    y = bilstm_forward(x, layer_params, out_w_t, out_b2d)
    y = jax.block_until_ready(y)
    assert y.shape == (batch, time_steps, pre_len), y.shape

    y_ref = reference_forward(x, raw_layers, out_w, out_b)
    max_err = float(jnp.max(jnp.abs(y - y_ref)))
    assert max_err < 1e-3, f"mismatch vs reference: {max_err}"

    print("KERNEL_OK")
</pallas_src>

<mosaic_0001>
module attributes {stable_mosaic.version = 11 : i64} {
  func.func @kernel(%arg0: memref<2x8x16xf32, #tpu.memory_space<vmem>>, %arg1: memref<16x256xf32, #tpu.memory_space<vmem>>, %arg2: memref<64x256xf32, #tpu.memory_space<vmem>>, %arg3: memref<1x256xf32, #tpu.memory_space<vmem>>, %arg4: memref<64x256xf32, #tpu.memory_space<vmem>>, %arg5: memref<64x256xf32, #tpu.memory_space<vmem>>, %arg6: memref<1x256xf32, #tpu.memory_space<vmem>>, %arg7: memref<64x8xf32, #tpu.memory_space<vmem>>, %arg8: memref<1x8xf32, #tpu.memory_space<vmem>>, %arg9: memref<2x8x8xf32, #tpu.memory_space<vmem>>, %arg10: memref<2x8x256xf32, #tpu.memory_space<vmem>>, %arg11: memref<2x8x32xf32, #tpu.memory_space<vmem>>, %arg12: memref<2x8x32xf32, #tpu.memory_space<vmem>>) attributes {dimension_semantics = [], scalar_prefetch = 0 : i64, scratch_operands = 3 : i64, tpu.core_type = #tpu.core_type<tc>} {
    %0 = tpu.iota {dimensions = array<i32: 1>} : vector<2x256xi32>
    %c64_i32 = arith.constant 64 : i32
    %c0_i32 = arith.constant 0 : i32
    %1 = arith.cmpi eq, %c64_i32, %c0_i32 : i32
    %c1_i32 = arith.constant 1 : i32
    %2 = arith.select %1, %c1_i32, %c64_i32 : i32
    %3 = vector.broadcast %2 : i32 to vector<2x256xi32>
    %4 = arith.remsi %0, %3 : vector<2x256xi32>
    %c0_i32_0 = arith.constant 0 : i32
    %5 = vector.broadcast %c0_i32_0 : i32 to vector<2x256xi32>
    %6 = arith.cmpi ne, %4, %5 : vector<2x256xi32>
    %c0_i32_1 = arith.constant 0 : i32
    %7 = vector.broadcast %c0_i32_1 : i32 to vector<2x256xi32>
    %8 = arith.cmpi slt, %4, %7 : vector<2x256xi32>
    %c0_i32_2 = arith.constant 0 : i32
    %9 = arith.cmpi slt, %2, %c0_i32_2 : i32
    %10 = vector.broadcast %9 : i1 to vector<2x256xi1>
    %11 = vector.broadcast %10 : vector<2x256xi1> to vector<2x256xi1>
    %12 = arith.xori %8, %11 : vector<2x256xi1>
    %13 = arith.andi %12, %6 : vector<2x256xi1>
    %14 = vector.broadcast %2 : i32 to vector<2x256xi32>
    %15 = arith.addi %4, %14 : vector<2x256xi32>
    %16 = arith.select %13, %15, %4 : vector<2x256xi1>, vector<2x256xi32>
    %c32_i32 = arith.constant 32 : i32
    %17 = vector.broadcast %c32_i32 : i32 to vector<2x256xi32>
    %18 = arith.cmpi slt, %16, %17 : vector<2x256xi32>
    %c0 = arith.constant 0 : index
    %c0_3 = arith.constant 0 : index
    %c0_4 = arith.constant 0 : index
    %19 = vector.load %arg0[%c0, %c0_3, %c0_4] : memref<2x8x16xf32, #tpu.memory_space<vmem>>, vector<2x8x16xf32>
    %20 = vector.shape_cast %19 : vector<2x8x16xf32> to vector<16x16xf32>
    %c0_5 = arith.constant 0 : index
    %c0_6 = arith.constant 0 : index
    %21 = vector.load %arg1[%c0_5, %c0_6] : memref<16x256xf32, #tpu.memory_space<vmem>>, vector<16x256xf32>
    %cst = arith.constant dense<0.000000e+00> : vector<16x256xf32>
    %22 = tpu.matmul %20, %21, %cst {dimension_numbers = #tpu.dot_dimension_numbers<[1], [0], [0], [1], [0, 0, 1, 1], [], []>} : vector<16x16xf32>, vector<16x256xf32>, vector<16x256xf32> -> vector<16x256xf32>
    %c0_7 = arith.constant 0 : index
    %c0_8 = arith.constant 0 : index
    %23 = vector.load %arg3[%c0_7, %c0_8] : memref<1x256xf32, #tpu.memory_space<vmem>>, vector<1x256xf32>
    %24 = vector.broadcast %23 : vector<1x256xf32> to vector<16x256xf32>
    %25 = arith.addf %22, %24 : vector<16x256xf32>
    %26 = vector.shape_cast %25 : vector<16x256xf32> to vector<2x8x256xf32>
    %c0_9 = arith.constant 0 : index
    %c0_10 = arith.constant 0 : index
    %c0_11 = arith.constant 0 : index
    %27 = vector.load %arg10[%c0_9, %c0_10, %c0_11] : memref<2x8x256xf32, #tpu.memory_space<vmem>>, vector<2x8x256xf32>
    tpu.vector_store %arg10[%c0_9, %c0_10, %c0_11], %26 {strides = array<i32>} : memref<2x8x256xf32, #tpu.memory_space<vmem>>, vector<2x8x256xf32>,
    %c0_12 = arith.constant 0 : index
    %c0_13 = arith.constant 0 : index
    %28 = vector.load %arg2[%c0_12, %c0_13] : memref<64x256xf32, #tpu.memory_space<vmem>>, vector<64x256xf32>
    %cst_14 = arith.constant 0.000000e+00 : f32
    %29 = vector.broadcast %cst_14 : f32 to vector<2x64xf32>
    %cst_15 = arith.constant 0.000000e+00 : f32
    %30 = vector.broadcast %cst_15 : f32 to vector<2x64xf32>
    %c0_16 = arith.constant 0 : index
    %c0_17 = arith.constant 0 : index
    %c0_18 = arith.constant 0 : index
    %31 = vector.load %arg10[%c0_16, %c0_17, %c0_18] : memref<2x8x256xf32, #tpu.memory_space<vmem>>, vector<2x1x256xf32>
    %32 = vector.shape_cast %31 : vector<2x1x256xf32> to vector<2x256xf32>
    %c0_19 = arith.constant 0 : index
    %c7 = arith.constant 7 : index
    %c0_20 = arith.constant 0 : index
    %33 = vector.load %arg10[%c0_19, %c7, %c0_20] : memref<2x8x256xf32, #tpu.memory_space<vmem>>, vector<2x1x256xf32>
    %34 = vector.shape_cast %33 : vector<2x1x256xf32> to vector<2x256xf32>
    %35 = arith.select %18, %32, %34 : vector<2x256xi1>, vector<2x256xf32>
    %cst_21 = arith.constant dense<0.000000e+00> : vector<2x256xf32>
    %36 = tpu.matmul %29, %28, %cst_21 {dimension_numbers = #tpu.dot_dimension_numbers<[1], [0], [0], [1], [0, 0, 1, 1], [], []>} : vector<2x64xf32>, vector<64x256xf32>, vector<2x256xf32> -> vector<2x256xf32>
    %37 = arith.addf %35, %36 : vector<2x256xf32>
    %38 = arith.negf %37 : vector<2x256xf32>
    %39 = math.exp %38 : vector<2x256xf32>
    %cst_22 = arith.constant 1.000000e+00 : f32
    %40 = vector.broadcast %cst_22 : f32 to vector<2x256xf32>
    %41 = arith.addf %40, %39 : vector<2x256xf32>
    %42 = arith.divf %40, %41 : vector<2x256xf32>
    %43 = math.tanh %37 : vector<2x256xf32>
    %44 = vector.extract_strided_slice %42 {offsets = [0, 0], sizes = [2, 64], strides = [1, 1]} : vector<2x256xf32> to vector<2x64xf32>
    %45 = vector.extract_strided_slice %42 {offsets = [0, 64], sizes = [2, 64], strides = [1, 1]} : vector<2x256xf32> to vector<2x64xf32>
    %46 = vector.extract_strided_slice %43 {offsets = [0, 128], sizes = [2, 64], strides = [1, 1]} : vector<2x256xf32> to vector<2x64xf32>
    %47 = vector.extract_strided_slice %42 {offsets = [0, 192], sizes = [2, 64], strides = [1, 1]} : vector<2x256xf32> to vector<2x64xf32>
    %48 = arith.mulf %45, %30 : vector<2x64xf32>
    %49 = arith.mulf %44, %46 : vector<2x64xf32>
    %50 = arith.addf %48, %49 : vector<2x64xf32>
    %51 = math.tanh %50 : vector<2x64xf32>
    %52 = arith.mulf %47, %51 : vector<2x64xf32>
    %53 = vector.extract_strided_slice %52 {offsets = [0, 0], sizes = [2, 32], strides = [1, 1]} : vector<2x64xf32> to vector<2x32xf32>
    %c0_23 = arith.constant 0 : index
    %c0_24 = arith.constant 0 : index
    %c0_25 = arith.constant 0 : index
    %54 = vector.load %arg11[%c0_23, %c0_24, %c0_25] : memref<2x8x32xf32, #tpu.memory_space<vmem>>, vector<2x1x32xf32>
    %55 = vector.shape_cast %54 : vector<2x1x32xf32> to vector<2x32xf32>
    %56 = vector.shape_cast %53 : vector<2x32xf32> to vector<2x1x32xf32>
    tpu.vector_store %arg11[%c0_23, %c0_24, %c0_25], %56 {strides = array<i32>} : memref<2x8x32xf32, #tpu.memory_space<vmem>>, vector<2x1x32xf32>,
    %57 = vector.extract_strided_slice %52 {offsets = [0, 32], sizes = [2, 32], strides = [1, 1]} : vector<2x64xf32> to vector<2x32xf32>
    %c0_26 = arith.constant 0 : index
    %c7_27 = arith.constant 7 : index
    %c0_28 = arith.constant 0 : index
    %58 = vector.load %arg12[%c0_26, %c7_27, %c0_28] : memref<2x8x32xf32, #tpu.memory_space<vmem>>, vector<2x1x32xf32>
    %59 = vector.shape_cast %58 : vector<2x1x32xf32> to vector<2x32xf32>
    %60 = vector.shape_cast %57 : vector<2x32xf32> to vector<2x1x32xf32>
    tpu.vector_store %arg12[%c0_26, %c7_27, %c0_28], %60 {strides = array<i32>} : memref<2x8x32xf32, #tpu.memory_space<vmem>>, vector<2x1x32xf32>,
    %c0_29 = arith.constant 0 : index
    %c1 = arith.constant 1 : index
    %c0_30 = arith.constant 0 : index
    %61 = vector.load %arg10[%c0_29, %c1, %c0_30] : memref<2x8x256xf32, #tpu.memory_space<vmem>>, vector<2x1x256xf32>
    %62 = vector.shape_cast %61 : vector<2x1x256xf32> to vector<2x256xf32>
    %c0_31 = arith.constant 0 : index
    %c6 = arith.constant 6 : index
    %c0_32 = arith.constant 0 : index
    %63 = vector.load %arg10[%c0_31, %c6, %c0_32] : memref<2x8x256xf32, #tpu.memory_space<vmem>>, vector<2x1x256xf32>
    %64 = vector.shape_cast %63 : vector<2x1x256xf32> to vector<2x256xf32>
    %65 = arith.select %18, %62, %64 : vector<2x256xi1>, vector<2x256xf32>
    %cst_33 = arith.constant dense<0.000000e+00> : vector<2x256xf32>
    %66 = tpu.matmul %52, %28, %cst_33 {dimension_numbers = #tpu.dot_dimension_numbers<[1], [0], [0], [1], [0, 0, 1, 1], [], []>} : vector<2x64xf32>, vector<64x256xf32>, vector<2x256xf32> -> vector<2x256xf32>
    %67 = arith.addf %65, %66 : vector<2x256xf32>
    %68 = arith.negf %67 : vector<2x256xf32>
    %69 = math.exp %68 : vector<2x256xf32>
    %cst_34 = arith.constant 1.000000e+00 : f32
    %70 = vector.broadcast %cst_34 : f32 to vector<2x256xf32>
    %71 = arith.addf %70, %69 : vector<2x256xf32>
    %72 = arith.divf %70, %71 : vector<2x256xf32>
    %73 = math.tanh %67 : vector<2x256xf32>
    %74 = vector.extract_strided_slice %72 {offsets = [0, 0], sizes = [2, 64], strides = [1, 1]} : vector<2x256xf32> to vector<2x64xf32>
    %75 = vector.extract_strided_slice %72 {offsets = [0, 64], sizes = [2, 64], strides = [1, 1]} : vector<2x256xf32> to vector<2x64xf32>
    %76 = vector.extract_strided_slice %73 {offsets = [0, 128], sizes = [2, 64], strides = [1, 1]} : vector<2x256xf32> to vector<2x64xf32>
    %77 = vector.extract_strided_slice %72 {offsets = [0, 192], sizes = [2, 64], strides = [1, 1]} : vector<2x256xf32> to vector<2x64xf32>
    %78 = arith.mulf %75, %50 : vector<2x64xf32>
    %79 = arith.mulf %74, %76 : vector<2x64xf32>
    %80 = arith.addf %78, %79 : vector<2x64xf32>
    %81 = math.tanh %80 : vector<2x64xf32>
    %82 = arith.mulf %77, %81 : vector<2x64xf32>
    %83 = vector.extract_strided_slice %82 {offsets = [0, 0], sizes = [2, 32], strides = [1, 1]} : vector<2x64xf32> to vector<2x32xf32>
    %c0_35 = arith.constant 0 : index
    %c1_36 = arith.constant 1 : index
    %c0_37 = arith.constant 0 : index
    %84 = vector.load %arg11[%c0_35, %c1_36, %c0_37] : memref<2x8x32xf32, #tpu.memory_space<vmem>>, vector<2x1x32xf32>
    %85 = vector.shape_cast %84 : vector<2x1x32xf32> to vector<2x32xf32>
    %86 = vector.shape_cast %83 : vector<2x32xf32> to vector<2x1x32xf32>
    tpu.vector_store %arg11[%c0_35, %c1_36, %c0_37], %86 {strides = array<i32>} : memref<2x8x32xf32, #tpu.memory_space<vmem>>, vector<2x1x32xf32>,
    %87 = vector.extract_strided_slice %82 {offsets = [0, 32], sizes = [2, 32], strides = [1, 1]} : vector<2x64xf32> to vector<2x32xf32>
    %c0_38 = arith.constant 0 : index
    %c6_39 = arith.constant 6 : index
    %c0_40 = arith.constant 0 : index
    %88 = vector.load %arg12[%c0_38, %c6_39, %c0_40] : memref<2x8x32xf32, #tpu.memory_space<vmem>>, vector<2x1x32xf32>
    %89 = vector.shape_cast %88 : vector<2x1x32xf32> to vector<2x32xf32>
    %90 = vector.shape_cast %87 : vector<2x32xf32> to vector<2x1x32xf32>
    tpu.vector_store %arg12[%c0_38, %c6_39, %c0_40], %90 {strides = array<i32>} : memref<2x8x32xf32, #tpu.memory_space<vmem>>, vector<2x1x32xf32>,
    %c0_41 = arith.constant 0 : index
    %c2 = arith.constant 2 : index
    %c0_42 = arith.constant 0 : index
    %91 = vector.load %arg10[%c0_41, %c2, %c0_42] : memref<2x8x256xf32, #tpu.memory_space<vmem>>, vector<2x1x256xf32>
    %92 = vector.shape_cast %91 : vector<2x1x256xf32> to vector<2x256xf32>
    %c0_43 = arith.constant 0 : index
    %c5 = arith.constant 5 : index
    %c0_44 = arith.constant 0 : index
    %93 = vector.load %arg10[%c0_43, %c5, %c0_44] : memref<2x8x256xf32, #tpu.memory_space<vmem>>, vector<2x1x256xf32>
    %94 = vector.shape_cast %93 : vector<2x1x256xf32> to vector<2x256xf32>
    %95 = arith.select %18, %92, %94 : vector<2x256xi1>, vector<2x256xf32>
    %cst_45 = arith.constant dense<0.000000e+00> : vector<2x256xf32>
    %96 = tpu.matmul %82, %28, %cst_45 {dimension_numbers = #tpu.dot_dimension_numbers<[1], [0], [0], [1], [0, 0, 1, 1], [], []>} : vector<2x64xf32>, vector<64x256xf32>, vector<2x256xf32> -> vector<2x256xf32>
    %97 = arith.addf %95, %96 : vector<2x256xf32>
    %98 = arith.negf %97 : vector<2x256xf32>
    %99 = math.exp %98 : vector<2x256xf32>
    %cst_46 = arith.constant 1.000000e+00 : f32
    %100 = vector.broadcast %cst_46 : f32 to vector<2x256xf32>
    %101 = arith.addf %100, %99 : vector<2x256xf32>
    %102 = arith.divf %100, %101 : vector<2x256xf32>
    %103 = math.tanh %97 : vector<2x256xf32>
    %104 = vector.extract_strided_slice %102 {offsets = [0, 0], sizes = [2, 64], strides = [1, 1]} : vector<2x256xf32> to vector<2x64xf32>
    %105 = vector.extract_strided_slice %102 {offsets = [0, 64], sizes = [2, 64], strides = [1, 1]} : vector<2x256xf32> to vector<2x64xf32>
    %106 = vector.extract_strided_slice %103 {offsets = [0, 128], sizes = [2, 64], strides = [1, 1]} : vector<2x256xf32> to vector<2x64xf32>
    %107 = vector.extract_strided_slice %102 {offsets = [0, 192], sizes = [2, 64], strides = [1, 1]} : vector<2x256xf32> to vector<2x64xf32>
    %108 = arith.mulf %105, %80 : vector<2x64xf32>
    %109 = arith.mulf %104, %106 : vector<2x64xf32>
    %110 = arith.addf %108, %109 : vector<2x64xf32>
    %111 = math.tanh %110 : vector<2x64xf32>
    %112 = arith.mulf %107, %111 : vector<2x64xf32>
    %113 = vector.extract_strided_slice %112 {offsets = [0, 0], sizes = [2, 32], strides = [1, 1]} : vector<2x64xf32> to vector<2x32xf32>
    %c0_47 = arith.constant 0 : index
    %c2_48 = arith.constant 2 : index
    %c0_49 = arith.constant 0 : index
    %114 = vector.load %arg11[%c0_47, %c2_48, %c0_49] : memref<2x8x32xf32, #tpu.memory_space<vmem>>, vector<2x1x32xf32>
    %115 = vector.shape_cast %114 : vector<2x1x32xf32> to vector<2x32xf32>
    %116 = vector.shape_cast %113 : vector<2x32xf32> to vector<2x1x32xf32>
    tpu.vector_store %arg11[%c0_47, %c2_48, %c0_49], %116 {strides = array<i32>} : memref<2x8x32xf32, #tpu.memory_space<vmem>>, vector<2x1x32xf32>,
    %117 = vector.extract_strided_slice %112 {offsets = [0, 32], sizes = [2, 32], strides = [1, 1]} : vector<2x64xf32> to vector<2x32xf32>
    %c0_50 = arith.constant 0 : index
    %c5_51 = arith.constant 5 : index
    %c0_52 = arith.constant 0 : index
    %118 = vector.load %arg12[%c0_50, %c5_51, %c0_52] : memref<2x8x32xf32, #tpu.memory_space<vmem>>, vector<2x1x32xf32>
    %119 = vector.shape_cast %118 : vector<2x1x32xf32> to vector<2x32xf32>
    %120 = vector.shape_cast %117 : vector<2x32xf32> to vector<2x1x32xf32>
    tpu.vector_store %arg12[%c0_50, %c5_51, %c0_52], %120 {strides = array<i32>} : memref<2x8x32xf32, #tpu.memory_space<vmem>>, vector<2x1x32xf32>,
    %c0_53 = arith.constant 0 : index
    %c3 = arith.constant 3 : index
    %c0_54 = arith.constant 0 : index
    %121 = vector.load %arg10[%c0_53, %c3, %c0_54] : memref<2x8x256xf32, #tpu.memory_space<vmem>>, vector<2x1x256xf32>
    %122 = vector.shape_cast %121 : vector<2x1x256xf32> to vector<2x256xf32>
    %c0_55 = arith.constant 0 : index
    %c4 = arith.constant 4 : index
    %c0_56 = arith.constant 0 : index
    %123 = vector.load %arg10[%c0_55, %c4, %c0_56] : memref<2x8x256xf32, #tpu.memory_space<vmem>>, vector<2x1x256xf32>
    %124 = vector.shape_cast %123 : vector<2x1x256xf32> to vector<2x256xf32>
    %125 = arith.select %18, %122, %124 : vector<2x256xi1>, vector<2x256xf32>
    %cst_57 = arith.constant dense<0.000000e+00> : vector<2x256xf32>
    %126 = tpu.matmul %112, %28, %cst_57 {dimension_numbers = #tpu.dot_dimension_numbers<[1], [0], [0], [1], [0, 0, 1, 1], [], []>} : vector<2x64xf32>, vector<64x256xf32>, vector<2x256xf32> -> vector<2x256xf32>
    %127 = arith.addf %125, %126 : vector<2x256xf32>
    %128 = arith.negf %127 : vector<2x256xf32>
    %129 = math.exp %128 : vector<2x256xf32>
    %cst_58 = arith.constant 1.000000e+00 : f32
    %130 = vector.broadcast %cst_58 : f32 to vector<2x256xf32>
    %131 = arith.addf %130, %129 : vector<2x256xf32>
    %132 = arith.divf %130, %131 : vector<2x256xf32>
    %133 = math.tanh %127 : vector<2x256xf32>
    %134 = vector.extract_strided_slice %132 {offsets = [0, 0], sizes = [2, 64], strides = [1, 1]} : vector<2x256xf32> to vector<2x64xf32>
    %135 = vector.extract_strided_slice %132 {offsets = [0, 64], sizes = [2, 64], strides = [1, 1]} : vector<2x256xf32> to vector<2x64xf32>
    %136 = vector.extract_strided_slice %133 {offsets = [0, 128], sizes = [2, 64], strides = [1, 1]} : vector<2x256xf32> to vector<2x64xf32>
    %137 = vector.extract_strided_slice %132 {offsets = [0, 192], sizes = [2, 64], strides = [1, 1]} : vector<2x256xf32> to vector<2x64xf32>
    %138 = arith.mulf %135, %110 : vector<2x64xf32>
    %139 = arith.mulf %134, %136 : vector<2x64xf32>
    %140 = arith.addf %138, %139 : vector<2x64xf32>
    %141 = math.tanh %140 : vector<2x64xf32>
    %142 = arith.mulf %137, %141 : vector<2x64xf32>
    %143 = vector.extract_strided_slice %142 {offsets = [0, 0], sizes = [2, 32], strides = [1, 1]} : vector<2x64xf32> to vector<2x32xf32>
    %c0_59 = arith.constant 0 : index
    %c3_60 = arith.constant 3 : index
    %c0_61 = arith.constant 0 : index
    %144 = vector.load %arg11[%c0_59, %c3_60, %c0_61] : memref<2x8x32xf32, #tpu.memory_space<vmem>>, vector<2x1x32xf32>
    %145 = vector.shape_cast %144 : vector<2x1x32xf32> to vector<2x32xf32>
    %146 = vector.shape_cast %143 : vector<2x32xf32> to vector<2x1x32xf32>
    tpu.vector_store %arg11[%c0_59, %c3_60, %c0_61], %146 {strides = array<i32>} : memref<2x8x32xf32, #tpu.memory_space<vmem>>, vector<2x1x32xf32>,
    %147 = vector.extract_strided_slice %142 {offsets = [0, 32], sizes = [2, 32], strides = [1, 1]} : vector<2x64xf32> to vector<2x32xf32>
    %c0_62 = arith.constant 0 : index
    %c4_63 = arith.constant 4 : index
    %c0_64 = arith.constant 0 : index
    %148 = vector.load %arg12[%c0_62, %c4_63, %c0_64] : memref<2x8x32xf32, #tpu.memory_space<vmem>>, vector<2x1x32xf32>
    %149 = vector.shape_cast %148 : vector<2x1x32xf32> to vector<2x32xf32>
    %150 = vector.shape_cast %147 : vector<2x32xf32> to vector<2x1x32xf32>
    tpu.vector_store %arg12[%c0_62, %c4_63, %c0_64], %150 {strides = array<i32>} : memref<2x8x32xf32, #tpu.memory_space<vmem>>, vector<2x1x32xf32>,
    %c0_65 = arith.constant 0 : index
    %c4_66 = arith.constant 4 : index
    %c0_67 = arith.constant 0 : index
    %151 = vector.load %arg10[%c0_65, %c4_66, %c0_67] : memref<2x8x256xf32, #tpu.memory_space<vmem>>, vector<2x1x256xf32>
    %152 = vector.shape_cast %151 : vector<2x1x256xf32> to vector<2x256xf32>
    %c0_68 = arith.constant 0 : index
    %c3_69 = arith.constant 3 : index
    %c0_70 = arith.constant 0 : index
    %153 = vector.load %arg10[%c0_68, %c3_69, %c0_70] : memref<2x8x256xf32, #tpu.memory_space<vmem>>, vector<2x1x256xf32>
    %154 = vector.shape_cast %153 : vector<2x1x256xf32> to vector<2x256xf32>
    %155 = arith.select %18, %152, %154 : vector<2x256xi1>, vector<2x256xf32>
    %cst_71 = arith.constant dense<0.000000e+00> : vector<2x256xf32>
    %156 = tpu.matmul %142, %28, %cst_71 {dimension_numbers = #tpu.dot_dimension_numbers<[1], [0], [0], [1], [0, 0, 1, 1], [], []>} : vector<2x64xf32>, vector<64x256xf32>, vector<2x256xf32> -> vector<2x256xf32>
    %157 = arith.addf %155, %156 : vector<2x256xf32>
    %158 = arith.negf %157 : vector<2x256xf32>
    %159 = math.exp %158 : vector<2x256xf32>
    %cst_72 = arith.constant 1.000000e+00 : f32
    %160 = vector.broadcast %cst_72 : f32 to vector<2x256xf32>
    %161 = arith.addf %160, %159 : vector<2x256xf32>
    %162 = arith.divf %160, %161 : vector<2x256xf32>
    %163 = math.tanh %157 : vector<2x256xf32>
    %164 = vector.extract_strided_slice %162 {offsets = [0, 0], sizes = [2, 64], strides = [1, 1]} : vector<2x256xf32> to vector<2x64xf32>
    %165 = vector.extract_strided_slice %162 {offsets = [0, 64], sizes = [2, 64], strides = [1, 1]} : vector<2x256xf32> to vector<2x64xf32>
    %166 = vector.extract_strided_slice %163 {offsets = [0, 128], sizes = [2, 64], strides = [1, 1]} : vector<2x256xf32> to vector<2x64xf32>
    %167 = vector.extract_strided_slice %162 {offsets = [0, 192], sizes = [2, 64], strides = [1, 1]} : vector<2x256xf32> to vector<2x64xf32>
    %168 = arith.mulf %165, %140 : vector<2x64xf32>
    %169 = arith.mulf %164, %166 : vector<2x64xf32>
    %170 = arith.addf %168, %169 : vector<2x64xf32>
    %171 = math.tanh %170 : vector<2x64xf32>
    %172 = arith.mulf %167, %171 : vector<2x64xf32>
    %173 = vector.extract_strided_slice %172 {offsets = [0, 0], sizes = [2, 32], strides = [1, 1]} : vector<2x64xf32> to vector<2x32xf32>
    %c0_73 = arith.constant 0 : index
    %c4_74 = arith.constant 4 : index
    %c0_75 = arith.constant 0 : index
    %174 = vector.load %arg11[%c0_73, %c4_74, %c0_75] : memref<2x8x32xf32, #tpu.memory_space<vmem>>, vector<2x1x32xf32>
    %175 = vector.shape_cast %174 : vector<2x1x32xf32> to vector<2x32xf32>
    %176 = vector.shape_cast %173 : vector<2x32xf32> to vector<2x1x32xf32>
    tpu.vector_store %arg11[%c0_73, %c4_74, %c0_75], %176 {strides = array<i32>} : memref<2x8x32xf32, #tpu.memory_space<vmem>>, vector<2x1x32xf32>,
    %177 = vector.extract_strided_slice %172 {offsets = [0, 32], sizes = [2, 32], strides = [1, 1]} : vector<2x64xf32> to vector<2x32xf32>
    %c0_76 = arith.constant 0 : index
    %c3_77 = arith.constant 3 : index
    %c0_78 = arith.constant 0 : index
    %178 = vector.load %arg12[%c0_76, %c3_77, %c0_78] : memref<2x8x32xf32, #tpu.memory_space<vmem>>, vector<2x1x32xf32>
    %179 = vector.shape_cast %178 : vector<2x1x32xf32> to vector<2x32xf32>
    %180 = vector.shape_cast %177 : vector<2x32xf32> to vector<2x1x32xf32>
    tpu.vector_store %arg12[%c0_76, %c3_77, %c0_78], %180 {strides = array<i32>} : memref<2x8x32xf32, #tpu.memory_space<vmem>>, vector<2x1x32xf32>,
    %c0_79 = arith.constant 0 : index
    %c5_80 = arith.constant 5 : index
    %c0_81 = arith.constant 0 : index
    %181 = vector.load %arg10[%c0_79, %c5_80, %c0_81] : memref<2x8x256xf32, #tpu.memory_space<vmem>>, vector<2x1x256xf32>
    %182 = vector.shape_cast %181 : vector<2x1x256xf32> to vector<2x256xf32>
    %c0_82 = arith.constant 0 : index
    %c2_83 = arith.constant 2 : index
    %c0_84 = arith.constant 0 : index
    %183 = vector.load %arg10[%c0_82, %c2_83, %c0_84] : memref<2x8x256xf32, #tpu.memory_space<vmem>>, vector<2x1x256xf32>
    %184 = vector.shape_cast %183 : vector<2x1x256xf32> to vector<2x256xf32>
    %185 = arith.select %18, %182, %184 : vector<2x256xi1>, vector<2x256xf32>
    %cst_85 = arith.constant dense<0.000000e+00> : vector<2x256xf32>
    %186 = tpu.matmul %172, %28, %cst_85 {dimension_numbers = #tpu.dot_dimension_numbers<[1], [0], [0], [1], [0, 0, 1, 1], [], []>} : vector<2x64xf32>, vector<64x256xf32>, vector<2x256xf32> -> vector<2x256xf32>
    %187 = arith.addf %185, %186 : vector<2x256xf32>
    %188 = arith.negf %187 : vector<2x256xf32>
    %189 = math.exp %188 : vector<2x256xf32>
    %cst_86 = arith.constant 1.000000e+00 : f32
    %190 = vector.broadcast %cst_86 : f32 to vector<2x256xf32>
    %191 = arith.addf %190, %189 : vector<2x256xf32>
    %192 = arith.divf %190, %191 : vector<2x256xf32>
    %193 = math.tanh %187 : vector<2x256xf32>
    %194 = vector.extract_strided_slice %192 {offsets = [0, 0], sizes = [2, 64], strides = [1, 1]} : vector<2x256xf32> to vector<2x64xf32>
    %195 = vector.extract_strided_slice %192 {offsets = [0, 64], sizes = [2, 64], strides = [1, 1]} : vector<2x256xf32> to vector<2x64xf32>
    %196 = vector.extract_strided_slice %193 {offsets = [0, 128], sizes = [2, 64], strides = [1, 1]} : vector<2x256xf32> to vector<2x64xf32>
    %197 = vector.extract_strided_slice %192 {offsets = [0, 192], sizes = [2, 64], strides = [1, 1]} : vector<2x256xf32> to vector<2x64xf32>
    %198 = arith.mulf %195, %170 : vector<2x64xf32>
    %199 = arith.mulf %194, %196 : vector<2x64xf32>
    %200 = arith.addf %198, %199 : vector<2x64xf32>
    %201 = math.tanh %200 : vector<2x64xf32>
    %202 = arith.mulf %197, %201 : vector<2x64xf32>
    %203 = vector.extract_strided_slice %202 {offsets = [0, 0], sizes = [2, 32], strides = [1, 1]} : vector<2x64xf32> to vector<2x32xf32>
    %c0_87 = arith.constant 0 : index
    %c5_88 = arith.constant 5 : index
    %c0_89 = arith.constant 0 : index
    %204 = vector.load %arg11[%c0_87, %c5_88, %c0_89] : memref<2x8x32xf32, #tpu.memory_space<vmem>>, vector<2x1x32xf32>
    %205 = vector.shape_cast %204 : vector<2x1x32xf32> to vector<2x32xf32>
    %206 = vector.shape_cast %203 : vector<2x32xf32> to vector<2x1x32xf32>
    tpu.vector_store %arg11[%c0_87, %c5_88, %c0_89], %206 {strides = array<i32>} : memref<2x8x32xf32, #tpu.memory_space<vmem>>, vector<2x1x32xf32>,
    %207 = vector.extract_strided_slice %202 {offsets = [0, 32], sizes = [2, 32], strides = [1, 1]} : vector<2x64xf32> to vector<2x32xf32>
    %c0_90 = arith.constant 0 : index
    %c2_91 = arith.constant 2 : index
    %c0_92 = arith.constant 0 : index
    %208 = vector.load %arg12[%c0_90, %c2_91, %c0_92] : memref<2x8x32xf32, #tpu.memory_space<vmem>>, vector<2x1x32xf32>
    %209 = vector.shape_cast %208 : vector<2x1x32xf32> to vector<2x32xf32>
    %210 = vector.shape_cast %207 : vector<2x32xf32> to vector<2x1x32xf32>
    tpu.vector_store %arg12[%c0_90, %c2_91, %c0_92], %210 {strides = array<i32>} : memref<2x8x32xf32, #tpu.memory_space<vmem>>, vector<2x1x32xf32>,
    %c0_93 = arith.constant 0 : index
    %c6_94 = arith.constant 6 : index
    %c0_95 = arith.constant 0 : index
    %211 = vector.load %arg10[%c0_93, %c6_94, %c0_95] : memref<2x8x256xf32, #tpu.memory_space<vmem>>, vector<2x1x256xf32>
    %212 = vector.shape_cast %211 : vector<2x1x256xf32> to vector<2x256xf32>
    %c0_96 = arith.constant 0 : index
    %c1_97 = arith.constant 1 : index
    %c0_98 = arith.constant 0 : index
    %213 = vector.load %arg10[%c0_96, %c1_97, %c0_98] : memref<2x8x256xf32, #tpu.memory_space<vmem>>, vector<2x1x256xf32>
    %214 = vector.shape_cast %213 : vector<2x1x256xf32> to vector<2x256xf32>
    %215 = arith.select %18, %212, %214 : vector<2x256xi1>, vector<2x256xf32>
    %cst_99 = arith.constant dense<0.000000e+00> : vector<2x256xf32>
    %216 = tpu.matmul %202, %28, %cst_99 {dimension_numbers = #tpu.dot_dimension_numbers<[1], [0], [0], [1], [0, 0, 1, 1], [], []>} : vector<2x64xf32>, vector<64x256xf32>, vector<2x256xf32> -> vector<2x256xf32>
    %217 = arith.addf %215, %216 : vector<2x256xf32>
    %218 = arith.negf %217 : vector<2x256xf32>
    %219 = math.exp %218 : vector<2x256xf32>
    %cst_100 = arith.constant 1.000000e+00 : f32
    %220 = vector.broadcast %cst_100 : f32 to vector<2x256xf32>
    %221 = arith.addf %220, %219 : vector<2x256xf32>
    %222 = arith.divf %220, %221 : vector<2x256xf32>
    %223 = math.tanh %217 : vector<2x256xf32>
    %224 = vector.extract_strided_slice %222 {offsets = [0, 0], sizes = [2, 64], strides = [1, 1]} : vector<2x256xf32> to vector<2x64xf32>
    %225 = vector.extract_strided_slice %222 {offsets = [0, 64], sizes = [2, 64], strides = [1, 1]} : vector<2x256xf32> to vector<2x64xf32>
    %226 = vector.extract_strided_slice %223 {offsets = [0, 128], sizes = [2, 64], strides = [1, 1]} : vector<2x256xf32> to vector<2x64xf32>
    %227 = vector.extract_strided_slice %222 {offsets = [0, 192], sizes = [2, 64], strides = [1, 1]} : vector<2x256xf32> to vector<2x64xf32>
    %228 = arith.mulf %225, %200 : vector<2x64xf32>
    %229 = arith.mulf %224, %226 : vector<2x64xf32>
    %230 = arith.addf %228, %229 : vector<2x64xf32>
    %231 = math.tanh %230 : vector<2x64xf32>
    %232 = arith.mulf %227, %231 : vector<2x64xf32>
    %233 = vector.extract_strided_slice %232 {offsets = [0, 0], sizes = [2, 32], strides = [1, 1]} : vector<2x64xf32> to vector<2x32xf32>
    %c0_101 = arith.constant 0 : index
    %c6_102 = arith.constant 6 : index
    %c0_103 = arith.constant 0 : index
    %234 = vector.load %arg11[%c0_101, %c6_102, %c0_103] : memref<2x8x32xf32, #tpu.memory_space<vmem>>, vector<2x1x32xf32>
    %235 = vector.shape_cast %234 : vector<2x1x32xf32> to vector<2x32xf32>
    %236 = vector.shape_cast %233 : vector<2x32xf32> to vector<2x1x32xf32>
    tpu.vector_store %arg11[%c0_101, %c6_102, %c0_103], %236 {strides = array<i32>} : memref<2x8x32xf32, #tpu.memory_space<vmem>>, vector<2x1x32xf32>,
    %237 = vector.extract_strided_slice %232 {offsets = [0, 32], sizes = [2, 32], strides = [1, 1]} : vector<2x64xf32> to vector<2x32xf32>
    %c0_104 = arith.constant 0 : index
    %c1_105 = arith.constant 1 : index
    %c0_106 = arith.constant 0 : index
    %238 = vector.load %arg12[%c0_104, %c1_105, %c0_106] : memref<2x8x32xf32, #tpu.memory_space<vmem>>, vector<2x1x32xf32>
    %239 = vector.shape_cast %238 : vector<2x1x32xf32> to vector<2x32xf32>
    %240 = vector.shape_cast %237 : vector<2x32xf32> to vector<2x1x32xf32>
    tpu.vector_store %arg12[%c0_104, %c1_105, %c0_106], %240 {strides = array<i32>} : memref<2x8x32xf32, #tpu.memory_space<vmem>>, vector<2x1x32xf32>,
    %c0_107 = arith.constant 0 : index
    %c7_108 = arith.constant 7 : index
    %c0_109 = arith.constant 0 : index
    %241 = vector.load %arg10[%c0_107, %c7_108, %c0_109] : memref<2x8x256xf32, #tpu.memory_space<vmem>>, vector<2x1x256xf32>
    %242 = vector.shape_cast %241 : vector<2x1x256xf32> to vector<2x256xf32>
    %c0_110 = arith.constant 0 : index
    %c0_111 = arith.constant 0 : index
    %c0_112 = arith.constant 0 : index
    %243 = vector.load %arg10[%c0_110, %c0_111, %c0_112] : memref<2x8x256xf32, #tpu.memory_space<vmem>>, vector<2x1x256xf32>
    %244 = vector.shape_cast %243 : vector<2x1x256xf32> to vector<2x256xf32>
    %245 = arith.select %18, %242, %244 : vector<2x256xi1>, vector<2x256xf32>
    %cst_113 = arith.constant dense<0.000000e+00> : vector<2x256xf32>
    %246 = tpu.matmul %232, %28, %cst_113 {dimension_numbers = #tpu.dot_dimension_numbers<[1], [0], [0], [1], [0, 0, 1, 1], [], []>} : vector<2x64xf32>, vector<64x256xf32>, vector<2x256xf32> -> vector<2x256xf32>
    %247 = arith.addf %245, %246 : vector<2x256xf32>
    %248 = arith.negf %247 : vector<2x256xf32>
    %249 = math.exp %248 : vector<2x256xf32>
    %cst_114 = arith.constant 1.000000e+00 : f32
    %250 = vector.broadcast %cst_114 : f32 to vector<2x256xf32>
    %251 = arith.addf %250, %249 : vector<2x256xf32>
    %252 = arith.divf %250, %251 : vector<2x256xf32>
    %253 = math.tanh %247 : vector<2x256xf32>
    %254 = vector.extract_strided_slice %252 {offsets = [0, 0], sizes = [2, 64], strides = [1, 1]} : vector<2x256xf32> to vector<2x64xf32>
    %255 = vector.extract_strided_slice %252 {offsets = [0, 64], sizes = [2, 64], strides = [1, 1]} : vector<2x256xf32> to vector<2x64xf32>
    %256 = vector.extract_strided_slice %253 {offsets = [0, 128], sizes = [2, 64], strides = [1, 1]} : vector<2x256xf32> to vector<2x64xf32>
    %257 = vector.extract_strided_slice %252 {offsets = [0, 192], sizes = [2, 64], strides = [1, 1]} : vector<2x256xf32> to vector<2x64xf32>
    %258 = arith.mulf %255, %230 : vector<2x64xf32>
    %259 = arith.mulf %254, %256 : vector<2x64xf32>
    %260 = arith.addf %258, %259 : vector<2x64xf32>
    %261 = math.tanh %260 : vector<2x64xf32>
    %262 = arith.mulf %257, %261 : vector<2x64xf32>
    %263 = vector.extract_strided_slice %262 {offsets = [0, 0], sizes = [2, 32], strides = [1, 1]} : vector<2x64xf32> to vector<2x32xf32>
    %c0_115 = arith.constant 0 : index
    %c7_116 = arith.constant 7 : index
    %c0_117 = arith.constant 0 : index
    %264 = vector.load %arg11[%c0_115, %c7_116, %c0_117] : memref<2x8x32xf32, #tpu.memory_space<vmem>>, vector<2x1x32xf32>
    %265 = vector.shape_cast %264 : vector<2x1x32xf32> to vector<2x32xf32>
    %266 = vector.shape_cast %263 : vector<2x32xf32> to vector<2x1x32xf32>
    tpu.vector_store %arg11[%c0_115, %c7_116, %c0_117], %266 {strides = array<i32>} : memref<2x8x32xf32, #tpu.memory_space<vmem>>, vector<2x1x32xf32>,
    %267 = vector.extract_strided_slice %262 {offsets = [0, 32], sizes = [2, 32], strides = [1, 1]} : vector<2x64xf32> to vector<2x32xf32>
    %c0_118 = arith.constant 0 : index
    %c0_119 = arith.constant 0 : index
    %c0_120 = arith.constant 0 : index
    %268 = vector.load %arg12[%c0_118, %c0_119, %c0_120] : memref<2x8x32xf32, #tpu.memory_space<vmem>>, vector<2x1x32xf32>
    %269 = vector.shape_cast %268 : vector<2x1x32xf32> to vector<2x32xf32>
    %270 = vector.shape_cast %267 : vector<2x32xf32> to vector<2x1x32xf32>
    tpu.vector_store %arg12[%c0_118, %c0_119, %c0_120], %270 {strides = array<i32>} : memref<2x8x32xf32, #tpu.memory_space<vmem>>, vector<2x1x32xf32>,
    %c0_121 = arith.constant 0 : index
    %c0_122 = arith.constant 0 : index
    %c0_123 = arith.constant 0 : index
    %271 = vector.load %arg11[%c0_121, %c0_122, %c0_123] : memref<2x8x32xf32, #tpu.memory_space<vmem>>, vector<2x8x32xf32>
    %272 = vector.shape_cast %271 : vector<2x8x32xf32> to vector<16x32xf32>
    %c0_124 = arith.constant 0 : index
    %c0_125 = arith.constant 0 : index
    %c0_126 = arith.constant 0 : index
    %273 = vector.load %arg12[%c0_124, %c0_125, %c0_126] : memref<2x8x32xf32, #tpu.memory_space<vmem>>, vector<2x8x32xf32>
    %274 = vector.shape_cast %273 : vector<2x8x32xf32> to vector<16x32xf32>
    %c0_127 = arith.constant 0 : index
    %c0_128 = arith.constant 0 : index
    %275 = vector.load %arg4[%c0_127, %c0_128] : memref<64x256xf32, #tpu.memory_space<vmem>>, vector<32x256xf32>
    %cst_129 = arith.constant dense<0.000000e+00> : vector<16x256xf32>
    %276 = tpu.matmul %272, %275, %cst_129 {dimension_numbers = #tpu.dot_dimension_numbers<[1], [0], [0], [1], [0, 0, 1, 1], [], []>} : vector<16x32xf32>, vector<32x256xf32>, vector<16x256xf32> -> vector<16x256xf32>
    %c32 = arith.constant 32 : index
    %c0_130 = arith.constant 0 : index
    %277 = vector.load %arg4[%c32, %c0_130] : memref<64x256xf32, #tpu.memory_space<vmem>>, vector<32x256xf32>
    %cst_131 = arith.constant dense<0.000000e+00> : vector<16x256xf32>
    %278 = tpu.matmul %274, %277, %cst_131 {dimension_numbers = #tpu.dot_dimension_numbers<[1], [0], [0], [1], [0, 0, 1, 1], [], []>} : vector<16x32xf32>, vector<32x256xf32>, vector<16x256xf32> -> vector<16x256xf32>
    %279 = arith.addf %276, %278 : vector<16x256xf32>
    %c0_132 = arith.constant 0 : index
    %c0_133 = arith.constant 0 : index
    %280 = vector.load %arg6[%c0_132, %c0_133] : memref<1x256xf32, #tpu.memory_space<vmem>>, vector<1x256xf32>
    %281 = vector.broadcast %280 : vector<1x256xf32> to vector<16x256xf32>
    %282 = arith.addf %279, %281 : vector<16x256xf32>
    %283 = vector.shape_cast %282 : vector<16x256xf32> to vector<2x8x256xf32>
    %c0_134 = arith.constant 0 : index
    %c0_135 = arith.constant 0 : index
    %c0_136 = arith.constant 0 : index
    %284 = vector.load %arg10[%c0_134, %c0_135, %c0_136] : memref<2x8x256xf32, #tpu.memory_space<vmem>>, vector<2x8x256xf32>
    tpu.vector_store %arg10[%c0_134, %c0_135, %c0_136], %283 {strides = array<i32>} : memref<2x8x256xf32, #tpu.memory_space<vmem>>, vector<2x8x256xf32>,
    %c0_137 = arith.constant 0 : index
    %c0_138 = arith.constant 0 : index
    %285 = vector.load %arg5[%c0_137, %c0_138] : memref<64x256xf32, #tpu.memory_space<vmem>>, vector<64x256xf32>
    %cst_139 = arith.constant 0.000000e+00 : f32
    %286 = vector.broadcast %cst_139 : f32 to vector<2x64xf32>
    %cst_140 = arith.constant 0.000000e+00 : f32
    %287 = vector.broadcast %cst_140 : f32 to vector<2x64xf32>
    %c0_141 = arith.constant 0 : index
    %c0_142 = arith.constant 0 : index
    %c0_143 = arith.constant 0 : index
    %288 = vector.load %arg10[%c0_141, %c0_142, %c0_143] : memref<2x8x256xf32, #tpu.memory_space<vmem>>, vector<2x1x256xf32>
    %289 = vector.shape_cast %288 : vector<2x1x256xf32> to vector<2x256xf32>
    %c0_144 = arith.constant 0 : index
    %c7_145 = arith.constant 7 : index
    %c0_146 = arith.constant 0 : index
    %290 = vector.load %arg10[%c0_144, %c7_145, %c0_146] : memref<2x8x256xf32, #tpu.memory_space<vmem>>, vector<2x1x256xf32>
    %291 = vector.shape_cast %290 : vector<2x1x256xf32> to vector<2x256xf32>
    %292 = arith.select %18, %289, %291 : vector<2x256xi1>, vector<2x256xf32>
    %cst_147 = arith.constant dense<0.000000e+00> : vector<2x256xf32>
    %293 = tpu.matmul %286, %285, %cst_147 {dimension_numbers = #tpu.dot_dimension_numbers<[1], [0], [0], [1], [0, 0, 1, 1], [], []>} : vector<2x64xf32>, vector<64x256xf32>, vector<2x256xf32> -> vector<2x256xf32>
    %294 = arith.addf %292, %293 : vector<2x256xf32>
    %295 = arith.negf %294 : vector<2x256xf32>
    %296 = math.exp %295 : vector<2x256xf32>
    %cst_148 = arith.constant 1.000000e+00 : f32
    %297 = vector.broadcast %cst_148 : f32 to vector<2x256xf32>
    %298 = arith.addf %297, %296 : vector<2x256xf32>
    %299 = arith.divf %297, %298 : vector<2x256xf32>
    %300 = math.tanh %294 : vector<2x256xf32>
    %301 = vector.extract_strided_slice %299 {offsets = [0, 0], sizes = [2, 64], strides = [1, 1]} : vector<2x256xf32> to vector<2x64xf32>
    %302 = vector.extract_strided_slice %299 {offsets = [0, 64], sizes = [2, 64], strides = [1, 1]} : vector<2x256xf32> to vector<2x64xf32>
    %303 = vector.extract_strided_slice %300 {offsets = [0, 128], sizes = [2, 64], strides = [1, 1]} : vector<2x256xf32> to vector<2x64xf32>
    %304 = vector.extract_strided_slice %299 {offsets = [0, 192], sizes = [2, 64], strides = [1, 1]} : vector<2x256xf32> to vector<2x64xf32>
    %305 = arith.mulf %302, %287 : vector<2x64xf32>
    %306 = arith.mulf %301, %303 : vector<2x64xf32>
    %307 = arith.addf %305, %306 : vector<2x64xf32>
    %308 = math.tanh %307 : vector<2x64xf32>
    %309 = arith.mulf %304, %308 : vector<2x64xf32>
    %310 = vector.extract_strided_slice %309 {offsets = [0, 0], sizes = [2, 32], strides = [1, 1]} : vector<2x64xf32> to vector<2x32xf32>
    %c0_149 = arith.constant 0 : index
    %c0_150 = arith.constant 0 : index
    %c0_151 = arith.constant 0 : index
    %311 = vector.load %arg11[%c0_149, %c0_150, %c0_151] : memref<2x8x32xf32, #tpu.memory_space<vmem>>, vector<2x1x32xf32>
    %312 = vector.shape_cast %311 : vector<2x1x32xf32> to vector<2x32xf32>
    %313 = vector.shape_cast %310 : vector<2x32xf32> to vector<2x1x32xf32>
    tpu.vector_store %arg11[%c0_149, %c0_150, %c0_151], %313 {strides = array<i32>} : memref<2x8x32xf32, #tpu.memory_space<vmem>>, vector<2x1x32xf32>,
    %314 = vector.extract_strided_slice %309 {offsets = [0, 32], sizes = [2, 32], strides = [1, 1]} : vector<2x64xf32> to vector<2x32xf32>
    %c0_152 = arith.constant 0 : index
    %c7_153 = arith.constant 7 : index
    %c0_154 = arith.constant 0 : index
    %315 = vector.load %arg12[%c0_152, %c7_153, %c0_154] : memref<2x8x32xf32, #tpu.memory_space<vmem>>, vector<2x1x32xf32>
    %316 = vector.shape_cast %315 : vector<2x1x32xf32> to vector<2x32xf32>
    %317 = vector.shape_cast %314 : vector<2x32xf32> to vector<2x1x32xf32>
    tpu.vector_store %arg12[%c0_152, %c7_153, %c0_154], %317 {strides = array<i32>} : memref<2x8x32xf32, #tpu.memory_space<vmem>>, vector<2x1x32xf32>,
    %c0_155 = arith.constant 0 : index
    %c1_156 = arith.constant 1 : index
    %c0_157 = arith.constant 0 : index
    %318 = vector.load %arg10[%c0_155, %c1_156, %c0_157] : memref<2x8x256xf32, #tpu.memory_space<vmem>>, vector<2x1x256xf32>
    %319 = vector.shape_cast %318 : vector<2x1x256xf32> to vector<2x256xf32>
    %c0_158 = arith.constant 0 : index
    %c6_159 = arith.constant 6 : index
    %c0_160 = arith.constant 0 : index
    %320 = vector.load %arg10[%c0_158, %c6_159, %c0_160] : memref<2x8x256xf32, #tpu.memory_space<vmem>>, vector<2x1x256xf32>
    %321 = vector.shape_cast %320 : vector<2x1x256xf32> to vector<2x256xf32>
    %322 = arith.select %18, %319, %321 : vector<2x256xi1>, vector<2x256xf32>
    %cst_161 = arith.constant dense<0.000000e+00> : vector<2x256xf32>
    %323 = tpu.matmul %309, %285, %cst_161 {dimension_numbers = #tpu.dot_dimension_numbers<[1], [0], [0], [1], [0, 0, 1, 1], [], []>} : vector<2x64xf32>, vector<64x256xf32>, vector<2x256xf32> -> vector<2x256xf32>
    %324 = arith.addf %322, %323 : vector<2x256xf32>
    %325 = arith.negf %324 : vector<2x256xf32>
    %326 = math.exp %325 : vector<2x256xf32>
    %cst_162 = arith.constant 1.000000e+00 : f32
    %327 = vector.broadcast %cst_162 : f32 to vector<2x256xf32>
    %328 = arith.addf %327, %326 : vector<2x256xf32>
    %329 = arith.divf %327, %328 : vector<2x256xf32>
    %330 = math.tanh %324 : vector<2x256xf32>
    %331 = vector.extract_strided_slice %329 {offsets = [0, 0], sizes = [2, 64], strides = [1, 1]} : vector<2x256xf32> to vector<2x64xf32>
    %332 = vector.extract_strided_slice %329 {offsets = [0, 64], sizes = [2, 64], strides = [1, 1]} : vector<2x256xf32> to vector<2x64xf32>
    %333 = vector.extract_strided_slice %330 {offsets = [0, 128], sizes = [2, 64], strides = [1, 1]} : vector<2x256xf32> to vector<2x64xf32>
    %334 = vector.extract_strided_slice %329 {offsets = [0, 192], sizes = [2, 64], strides = [1, 1]} : vector<2x256xf32> to vector<2x64xf32>
    %335 = arith.mulf %332, %307 : vector<2x64xf32>
    %336 = arith.mulf %331, %333 : vector<2x64xf32>
    %337 = arith.addf %335, %336 : vector<2x64xf32>
    %338 = math.tanh %337 : vector<2x64xf32>
    %339 = arith.mulf %334, %338 : vector<2x64xf32>
    %340 = vector.extract_strided_slice %339 {offsets = [0, 0], sizes = [2, 32], strides = [1, 1]} : vector<2x64xf32> to vector<2x32xf32>
    %c0_163 = arith.constant 0 : index
    %c1_164 = arith.constant 1 : index
    %c0_165 = arith.constant 0 : index
    %341 = vector.load %arg11[%c0_163, %c1_164, %c0_165] : memref<2x8x32xf32, #tpu.memory_space<vmem>>, vector<2x1x32xf32>
    %342 = vector.shape_cast %341 : vector<2x1x32xf32> to vector<2x32xf32>
    %343 = vector.shape_cast %340 : vector<2x32xf32> to vector<2x1x32xf32>
    tpu.vector_store %arg11[%c0_163, %c1_164, %c0_165], %343 {strides = array<i32>} : memref<2x8x32xf32, #tpu.memory_space<vmem>>, vector<2x1x32xf32>,
    %344 = vector.extract_strided_slice %339 {offsets = [0, 32], sizes = [2, 32], strides = [1, 1]} : vector<2x64xf32> to vector<2x32xf32>
    %c0_166 = arith.constant 0 : index
    %c6_167 = arith.constant 6 : index
    %c0_168 = arith.constant 0 : index
    %345 = vector.load %arg12[%c0_166, %c6_167, %c0_168] : memref<2x8x32xf32, #tpu.memory_space<vmem>>, vector<2x1x32xf32>
    %346 = vector.shape_cast %345 : vector<2x1x32xf32> to vector<2x32xf32>
    %347 = vector.shape_cast %344 : vector<2x32xf32> to vector<2x1x32xf32>
    tpu.vector_store %arg12[%c0_166, %c6_167, %c0_168], %347 {strides = array<i32>} : memref<2x8x32xf32, #tpu.memory_space<vmem>>, vector<2x1x32xf32>,
    %c0_169 = arith.constant 0 : index
    %c2_170 = arith.constant 2 : index
    %c0_171 = arith.constant 0 : index
    %348 = vector.load %arg10[%c0_169, %c2_170, %c0_171] : memref<2x8x256xf32, #tpu.memory_space<vmem>>, vector<2x1x256xf32>
    %349 = vector.shape_cast %348 : vector<2x1x256xf32> to vector<2x256xf32>
    %c0_172 = arith.constant 0 : index
    %c5_173 = arith.constant 5 : index
    %c0_174 = arith.constant 0 : index
    %350 = vector.load %arg10[%c0_172, %c5_173, %c0_174] : memref<2x8x256xf32, #tpu.memory_space<vmem>>, vector<2x1x256xf32>
    %351 = vector.shape_cast %350 : vector<2x1x256xf32> to vector<2x256xf32>
    %352 = arith.select %18, %349, %351 : vector<2x256xi1>, vector<2x256xf32>
    %cst_175 = arith.constant dense<0.000000e+00> : vector<2x256xf32>
    %353 = tpu.matmul %339, %285, %cst_175 {dimension_numbers = #tpu.dot_dimension_numbers<[1], [0], [0], [1], [0, 0, 1, 1], [], []>} : vector<2x64xf32>, vector<64x256xf32>, vector<2x256xf32> -> vector<2x256xf32>
    %354 = arith.addf %352, %353 : vector<2x256xf32>
    %355 = arith.negf %354 : vector<2x256xf32>
    %356 = math.exp %355 : vector<2x256xf32>
    %cst_176 = arith.constant 1.000000e+00 : f32
    %357 = vector.broadcast %cst_176 : f32 to vector<2x256xf32>
    %358 = arith.addf %357, %356 : vector<2x256xf32>
    %359 = arith.divf %357, %358 : vector<2x256xf32>
    %360 = math.tanh %354 : vector<2x256xf32>
    %361 = vector.extract_strided_slice %359 {offsets = [0, 0], sizes = [2, 64], strides = [1, 1]} : vector<2x256xf32> to vector<2x64xf32>
    %362 = vector.extract_strided_slice %359 {offsets = [0, 64], sizes = [2, 64], strides = [1, 1]} : vector<2x256xf32> to vector<2x64xf32>
    %363 = vector.extract_strided_slice %360 {offsets = [0, 128], sizes = [2, 64], strides = [1, 1]} : vector<2x256xf32> to vector<2x64xf32>
    %364 = vector.extract_strided_slice %359 {offsets = [0, 192], sizes = [2, 64], strides = [1, 1]} : vector<2x256xf32> to vector<2x64xf32>
    %365 = arith.mulf %362, %337 : vector<2x64xf32>
    %366 = arith.mulf %361, %363 : vector<2x64xf32>
    %367 = arith.addf %365, %366 : vector<2x64xf32>
    %368 = math.tanh %367 : vector<2x64xf32>
    %369 = arith.mulf %364, %368 : vector<2x64xf32>
    %370 = vector.extract_strided_slice %369 {offsets = [0, 0], sizes = [2, 32], strides = [1, 1]} : vector<2x64xf32> to vector<2x32xf32>
    %c0_177 = arith.constant 0 : index
    %c2_178 = arith.constant 2 : index
    %c0_179 = arith.constant 0 : index
    %371 = vector.load %arg11[%c0_177, %c2_178, %c0_179] : memref<2x8x32xf32, #tpu.memory_space<vmem>>, vector<2x1x32xf32>
    %372 = vector.shape_cast %371 : vector<2x1x32xf32> to vector<2x32xf32>
    %373 = vector.shape_cast %370 : vector<2x32xf32> to vector<2x1x32xf32>
    tpu.vector_store %arg11[%c0_177, %c2_178, %c0_179], %373 {strides = array<i32>} : memref<2x8x32xf32, #tpu.memory_space<vmem>>, vector<2x1x32xf32>,
    %374 = vector.extract_strided_slice %369 {offsets = [0, 32], sizes = [2, 32], strides = [1, 1]} : vector<2x64xf32> to vector<2x32xf32>
    %c0_180 = arith.constant 0 : index
    %c5_181 = arith.constant 5 : index
    %c0_182 = arith.constant 0 : index
    %375 = vector.load %arg12[%c0_180, %c5_181, %c0_182] : memref<2x8x32xf32, #tpu.memory_space<vmem>>, vector<2x1x32xf32>
    %376 = vector.shape_cast %375 : vector<2x1x32xf32> to vector<2x32xf32>
    %377 = vector.shape_cast %374 : vector<2x32xf32> to vector<2x1x32xf32>
    tpu.vector_store %arg12[%c0_180, %c5_181, %c0_182], %377 {strides = array<i32>} : memref<2x8x32xf32, #tpu.memory_space<vmem>>, vector<2x1x32xf32>,
    %c0_183 = arith.constant 0 : index
    %c3_184 = arith.constant 3 : index
    %c0_185 = arith.constant 0 : index
    %378 = vector.load %arg10[%c0_183, %c3_184, %c0_185] : memref<2x8x256xf32, #tpu.memory_space<vmem>>, vector<2x1x256xf32>
    %379 = vector.shape_cast %378 : vector<2x1x256xf32> to vector<2x256xf32>
    %c0_186 = arith.constant 0 : index
    %c4_187 = arith.constant 4 : index
    %c0_188 = arith.constant 0 : index
    %380 = vector.load %arg10[%c0_186, %c4_187, %c0_188] : memref<2x8x256xf32, #tpu.memory_space<vmem>>, vector<2x1x256xf32>
    %381 = vector.shape_cast %380 : vector<2x1x256xf32> to vector<2x256xf32>
    %382 = arith.select %18, %379, %381 : vector<2x256xi1>, vector<2x256xf32>
    %cst_189 = arith.constant dense<0.000000e+00> : vector<2x256xf32>
    %383 = tpu.matmul %369, %285, %cst_189 {dimension_numbers = #tpu.dot_dimension_numbers<[1], [0], [0], [1], [0, 0, 1, 1], [], []>} : vector<2x64xf32>, vector<64x256xf32>, vector<2x256xf32> -> vector<2x256xf32>
    %384 = arith.addf %382, %383 : vector<2x256xf32>
    %385 = arith.negf %384 : vector<2x256xf32>
    %386 = math.exp %385 : vector<2x256xf32>
    %cst_190 = arith.constant 1.000000e+00 : f32
    %387 = vector.broadcast %cst_190 : f32 to vector<2x256xf32>
    %388 = arith.addf %387, %386 : vector<2x256xf32>
    %389 = arith.divf %387, %388 : vector<2x256xf32>
    %390 = math.tanh %384 : vector<2x256xf32>
    %391 = vector.extract_strided_slice %389 {offsets = [0, 0], sizes = [2, 64], strides = [1, 1]} : vector<2x256xf32> to vector<2x64xf32>
    %392 = vector.extract_strided_slice %389 {offsets = [0, 64], sizes = [2, 64], strides = [1, 1]} : vector<2x256xf32> to vector<2x64xf32>
    %393 = vector.extract_strided_slice %390 {offsets = [0, 128], sizes = [2, 64], strides = [1, 1]} : vector<2x256xf32> to vector<2x64xf32>
    %394 = vector.extract_strided_slice %389 {offsets = [0, 192], sizes = [2, 64], strides = [1, 1]} : vector<2x256xf32> to vector<2x64xf32>
    %395 = arith.mulf %392, %367 : vector<2x64xf32>
    %396 = arith.mulf %391, %393 : vector<2x64xf32>
    %397 = arith.addf %395, %396 : vector<2x64xf32>
    %398 = math.tanh %397 : vector<2x64xf32>
    %399 = arith.mulf %394, %398 : vector<2x64xf32>
    %400 = vector.extract_strided_slice %399 {offsets = [0, 0], sizes = [2, 32], strides = [1, 1]} : vector<2x64xf32> to vector<2x32xf32>
    %c0_191 = arith.constant 0 : index
    %c3_192 = arith.constant 3 : index
    %c0_193 = arith.constant 0 : index
    %401 = vector.load %arg11[%c0_191, %c3_192, %c0_193] : memref<2x8x32xf32, #tpu.memory_space<vmem>>, vector<2x1x32xf32>
    %402 = vector.shape_cast %401 : vector<2x1x32xf32> to vector<2x32xf32>
    %403 = vector.shape_cast %400 : vector<2x32xf32> to vector<2x1x32xf32>
    tpu.vector_store %arg11[%c0_191, %c3_192, %c0_193], %403 {strides = array<i32>} : memref<2x8x32xf32, #tpu.memory_space<vmem>>, vector<2x1x32xf32>,
    %404 = vector.extract_strided_slice %399 {offsets = [0, 32], sizes = [2, 32], strides = [1, 1]} : vector<2x64xf32> to vector<2x32xf32>
    %c0_194 = arith.constant 0 : index
    %c4_195 = arith.constant 4 : index
    %c0_196 = arith.constant 0 : index
    %405 = vector.load %arg12[%c0_194, %c4_195, %c0_196] : memref<2x8x32xf32, #tpu.memory_space<vmem>>, vector<2x1x32xf32>
    %406 = vector.shape_cast %405 : vector<2x1x32xf32> to vector<2x32xf32>
    %407 = vector.shape_cast %404 : vector<2x32xf32> to vector<2x1x32xf32>
    tpu.vector_store %arg12[%c0_194, %c4_195, %c0_196], %407 {strides = array<i32>} : memref<2x8x32xf32, #tpu.memory_space<vmem>>, vector<2x1x32xf32>,
    %c0_197 = arith.constant 0 : index
    %c4_198 = arith.constant 4 : index
    %c0_199 = arith.constant 0 : index
    %408 = vector.load %arg10[%c0_197, %c4_198, %c0_199] : memref<2x8x256xf32, #tpu.memory_space<vmem>>, vector<2x1x256xf32>
    %409 = vector.shape_cast %408 : vector<2x1x256xf32> to vector<2x256xf32>
    %c0_200 = arith.constant 0 : index
    %c3_201 = arith.constant 3 : index
    %c0_202 = arith.constant 0 : index
    %410 = vector.load %arg10[%c0_200, %c3_201, %c0_202] : memref<2x8x256xf32, #tpu.memory_space<vmem>>, vector<2x1x256xf32>
    %411 = vector.shape_cast %410 : vector<2x1x256xf32> to vector<2x256xf32>
    %412 = arith.select %18, %409, %411 : vector<2x256xi1>, vector<2x256xf32>
    %cst_203 = arith.constant dense<0.000000e+00> : vector<2x256xf32>
    %413 = tpu.matmul %399, %285, %cst_203 {dimension_numbers = #tpu.dot_dimension_numbers<[1], [0], [0], [1], [0, 0, 1, 1], [], []>} : vector<2x64xf32>, vector<64x256xf32>, vector<2x256xf32> -> vector<2x256xf32>
    %414 = arith.addf %412, %413 : vector<2x256xf32>
    %415 = arith.negf %414 : vector<2x256xf32>
    %416 = math.exp %415 : vector<2x256xf32>
    %cst_204 = arith.constant 1.000000e+00 : f32
    %417 = vector.broadcast %cst_204 : f32 to vector<2x256xf32>
    %418 = arith.addf %417, %416 : vector<2x256xf32>
    %419 = arith.divf %417, %418 : vector<2x256xf32>
    %420 = math.tanh %414 : vector<2x256xf32>
    %421 = vector.extract_strided_slice %419 {offsets = [0, 0], sizes = [2, 64], strides = [1, 1]} : vector<2x256xf32> to vector<2x64xf32>
    %422 = vector.extract_strided_slice %419 {offsets = [0, 64], sizes = [2, 64], strides = [1, 1]} : vector<2x256xf32> to vector<2x64xf32>
    %423 = vector.extract_strided_slice %420 {offsets = [0, 128], sizes = [2, 64], strides = [1, 1]} : vector<2x256xf32> to vector<2x64xf32>
    %424 = vector.extract_strided_slice %419 {offsets = [0, 192], sizes = [2, 64], strides = [1, 1]} : vector<2x256xf32> to vector<2x64xf32>
    %425 = arith.mulf %422, %397 : vector<2x64xf32>
    %426 = arith.mulf %421, %423 : vector<2x64xf32>
    %427 = arith.addf %425, %426 : vector<2x64xf32>
    %428 = math.tanh %427 : vector<2x64xf32>
    %429 = arith.mulf %424, %428 : vector<2x64xf32>
    %430 = vector.extract_strided_slice %429 {offsets = [0, 0], sizes = [2, 32], strides = [1, 1]} : vector<2x64xf32> to vector<2x32xf32>
    %c0_205 = arith.constant 0 : index
    %c4_206 = arith.constant 4 : index
    %c0_207 = arith.constant 0 : index
    %431 = vector.load %arg11[%c0_205, %c4_206, %c0_207] : memref<2x8x32xf32, #tpu.memory_space<vmem>>, vector<2x1x32xf32>
    %432 = vector.shape_cast %431 : vector<2x1x32xf32> to vector<2x32xf32>
    %433 = vector.shape_cast %430 : vector<2x32xf32> to vector<2x1x32xf32>
    tpu.vector_store %arg11[%c0_205, %c4_206, %c0_207], %433 {strides = array<i32>} : memref<2x8x32xf32, #tpu.memory_space<vmem>>, vector<2x1x32xf32>,
    %434 = vector.extract_strided_slice %429 {offsets = [0, 32], sizes = [2, 32], strides = [1, 1]} : vector<2x64xf32> to vector<2x32xf32>
    %c0_208 = arith.constant 0 : index
    %c3_209 = arith.constant 3 : index
    %c0_210 = arith.constant 0 : index
    %435 = vector.load %arg12[%c0_208, %c3_209, %c0_210] : memref<2x8x32xf32, #tpu.memory_space<vmem>>, vector<2x1x32xf32>
    %436 = vector.shape_cast %435 : vector<2x1x32xf32> to vector<2x32xf32>
    %437 = vector.shape_cast %434 : vector<2x32xf32> to vector<2x1x32xf32>
    tpu.vector_store %arg12[%c0_208, %c3_209, %c0_210], %437 {strides = array<i32>} : memref<2x8x32xf32, #tpu.memory_space<vmem>>, vector<2x1x32xf32>,
    %c0_211 = arith.constant 0 : index
    %c5_212 = arith.constant 5 : index
    %c0_213 = arith.constant 0 : index
    %438 = vector.load %arg10[%c0_211, %c5_212, %c0_213] : memref<2x8x256xf32, #tpu.memory_space<vmem>>, vector<2x1x256xf32>
    %439 = vector.shape_cast %438 : vector<2x1x256xf32> to vector<2x256xf32>
    %c0_214 = arith.constant 0 : index
    %c2_215 = arith.constant 2 : index
    %c0_216 = arith.constant 0 : index
    %440 = vector.load %arg10[%c0_214, %c2_215, %c0_216] : memref<2x8x256xf32, #tpu.memory_space<vmem>>, vector<2x1x256xf32>
    %441 = vector.shape_cast %440 : vector<2x1x256xf32> to vector<2x256xf32>
    %442 = arith.select %18, %439, %441 : vector<2x256xi1>, vector<2x256xf32>
    %cst_217 = arith.constant dense<0.000000e+00> : vector<2x256xf32>
    %443 = tpu.matmul %429, %285, %cst_217 {dimension_numbers = #tpu.dot_dimension_numbers<[1], [0], [0], [1], [0, 0, 1, 1], [], []>} : vector<2x64xf32>, vector<64x256xf32>, vector<2x256xf32> -> vector<2x256xf32>
    %444 = arith.addf %442, %443 : vector<2x256xf32>
    %445 = arith.negf %444 : vector<2x256xf32>
    %446 = math.exp %445 : vector<2x256xf32>
    %cst_218 = arith.constant 1.000000e+00 : f32
    %447 = vector.broadcast %cst_218 : f32 to vector<2x256xf32>
    %448 = arith.addf %447, %446 : vector<2x256xf32>
    %449 = arith.divf %447, %448 : vector<2x256xf32>
    %450 = math.tanh %444 : vector<2x256xf32>
    %451 = vector.extract_strided_slice %449 {offsets = [0, 0], sizes = [2, 64], strides = [1, 1]} : vector<2x256xf32> to vector<2x64xf32>
    %452 = vector.extract_strided_slice %449 {offsets = [0, 64], sizes = [2, 64], strides = [1, 1]} : vector<2x256xf32> to vector<2x64xf32>
    %453 = vector.extract_strided_slice %450 {offsets = [0, 128], sizes = [2, 64], strides = [1, 1]} : vector<2x256xf32> to vector<2x64xf32>
    %454 = vector.extract_strided_slice %449 {offsets = [0, 192], sizes = [2, 64], strides = [1, 1]} : vector<2x256xf32> to vector<2x64xf32>
    %455 = arith.mulf %452, %427 : vector<2x64xf32>
    %456 = arith.mulf %451, %453 : vector<2x64xf32>
    %457 = arith.addf %455, %456 : vector<2x64xf32>
    %458 = math.tanh %457 : vector<2x64xf32>
    %459 = arith.mulf %454, %458 : vector<2x64xf32>
    %460 = vector.extract_strided_slice %459 {offsets = [0, 0], sizes = [2, 32], strides = [1, 1]} : vector<2x64xf32> to vector<2x32xf32>
    %c0_219 = arith.constant 0 : index
    %c5_220 = arith.constant 5 : index
    %c0_221 = arith.constant 0 : index
    %461 = vector.load %arg11[%c0_219, %c5_220, %c0_221] : memref<2x8x32xf32, #tpu.memory_space<vmem>>, vector<2x1x32xf32>
    %462 = vector.shape_cast %461 : vector<2x1x32xf32> to vector<2x32xf32>
    %463 = vector.shape_cast %460 : vector<2x32xf32> to vector<2x1x32xf32>
    tpu.vector_store %arg11[%c0_219, %c5_220, %c0_221], %463 {strides = array<i32>} : memref<2x8x32xf32, #tpu.memory_space<vmem>>, vector<2x1x32xf32>,
    %464 = vector.extract_strided_slice %459 {offsets = [0, 32], sizes = [2, 32], strides = [1, 1]} : vector<2x64xf32> to vector<2x32xf32>
    %c0_222 = arith.constant 0 : index
    %c2_223 = arith.constant 2 : index
    %c0_224 = arith.constant 0 : index
    %465 = vector.load %arg12[%c0_222, %c2_223, %c0_224] : memref<2x8x32xf32, #tpu.memory_space<vmem>>, vector<2x1x32xf32>
    %466 = vector.shape_cast %465 : vector<2x1x32xf32> to vector<2x32xf32>
    %467 = vector.shape_cast %464 : vector<2x32xf32> to vector<2x1x32xf32>
    tpu.vector_store %arg12[%c0_222, %c2_223, %c0_224], %467 {strides = array<i32>} : memref<2x8x32xf32, #tpu.memory_space<vmem>>, vector<2x1x32xf32>,
    %c0_225 = arith.constant 0 : index
    %c6_226 = arith.constant 6 : index
    %c0_227 = arith.constant 0 : index
    %468 = vector.load %arg10[%c0_225, %c6_226, %c0_227] : memref<2x8x256xf32, #tpu.memory_space<vmem>>, vector<2x1x256xf32>
    %469 = vector.shape_cast %468 : vector<2x1x256xf32> to vector<2x256xf32>
    %c0_228 = arith.constant 0 : index
    %c1_229 = arith.constant 1 : index
    %c0_230 = arith.constant 0 : index
    %470 = vector.load %arg10[%c0_228, %c1_229, %c0_230] : memref<2x8x256xf32, #tpu.memory_space<vmem>>, vector<2x1x256xf32>
    %471 = vector.shape_cast %470 : vector<2x1x256xf32> to vector<2x256xf32>
    %472 = arith.select %18, %469, %471 : vector<2x256xi1>, vector<2x256xf32>
    %cst_231 = arith.constant dense<0.000000e+00> : vector<2x256xf32>
    %473 = tpu.matmul %459, %285, %cst_231 {dimension_numbers = #tpu.dot_dimension_numbers<[1], [0], [0], [1], [0, 0, 1, 1], [], []>} : vector<2x64xf32>, vector<64x256xf32>, vector<2x256xf32> -> vector<2x256xf32>
    %474 = arith.addf %472, %473 : vector<2x256xf32>
    %475 = arith.negf %474 : vector<2x256xf32>
    %476 = math.exp %475 : vector<2x256xf32>
    %cst_232 = arith.constant 1.000000e+00 : f32
    %477 = vector.broadcast %cst_232 : f32 to vector<2x256xf32>
    %478 = arith.addf %477, %476 : vector<2x256xf32>
    %479 = arith.divf %477, %478 : vector<2x256xf32>
    %480 = math.tanh %474 : vector<2x256xf32>
    %481 = vector.extract_strided_slice %479 {offsets = [0, 0], sizes = [2, 64], strides = [1, 1]} : vector<2x256xf32> to vector<2x64xf32>
    %482 = vector.extract_strided_slice %479 {offsets = [0, 64], sizes = [2, 64], strides = [1, 1]} : vector<2x256xf32> to vector<2x64xf32>
    %483 = vector.extract_strided_slice %480 {offsets = [0, 128], sizes = [2, 64], strides = [1, 1]} : vector<2x256xf32> to vector<2x64xf32>
    %484 = vector.extract_strided_slice %479 {offsets = [0, 192], sizes = [2, 64], strides = [1, 1]} : vector<2x256xf32> to vector<2x64xf32>
    %485 = arith.mulf %482, %457 : vector<2x64xf32>
    %486 = arith.mulf %481, %483 : vector<2x64xf32>
    %487 = arith.addf %485, %486 : vector<2x64xf32>
    %488 = math.tanh %487 : vector<2x64xf32>
    %489 = arith.mulf %484, %488 : vector<2x64xf32>
    %490 = vector.extract_strided_slice %489 {offsets = [0, 0], sizes = [2, 32], strides = [1, 1]} : vector<2x64xf32> to vector<2x32xf32>
    %c0_233 = arith.constant 0 : index
    %c6_234 = arith.constant 6 : index
    %c0_235 = arith.constant 0 : index
    %491 = vector.load %arg11[%c0_233, %c6_234, %c0_235] : memref<2x8x32xf32, #tpu.memory_space<vmem>>, vector<2x1x32xf32>
    %492 = vector.shape_cast %491 : vector<2x1x32xf32> to vector<2x32xf32>
    %493 = vector.shape_cast %490 : vector<2x32xf32> to vector<2x1x32xf32>
    tpu.vector_store %arg11[%c0_233, %c6_234, %c0_235], %493 {strides = array<i32>} : memref<2x8x32xf32, #tpu.memory_space<vmem>>, vector<2x1x32xf32>,
    %494 = vector.extract_strided_slice %489 {offsets = [0, 32], sizes = [2, 32], strides = [1, 1]} : vector<2x64xf32> to vector<2x32xf32>
    %c0_236 = arith.constant 0 : index
    %c1_237 = arith.constant 1 : index
    %c0_238 = arith.constant 0 : index
    %495 = vector.load %arg12[%c0_236, %c1_237, %c0_238] : memref<2x8x32xf32, #tpu.memory_space<vmem>>, vector<2x1x32xf32>
    %496 = vector.shape_cast %495 : vector<2x1x32xf32> to vector<2x32xf32>
    %497 = vector.shape_cast %494 : vector<2x32xf32> to vector<2x1x32xf32>
    tpu.vector_store %arg12[%c0_236, %c1_237, %c0_238], %497 {strides = array<i32>} : memref<2x8x32xf32, #tpu.memory_space<vmem>>, vector<2x1x32xf32>,
    %c0_239 = arith.constant 0 : index
    %c7_240 = arith.constant 7 : index
    %c0_241 = arith.constant 0 : index
    %498 = vector.load %arg10[%c0_239, %c7_240, %c0_241] : memref<2x8x256xf32, #tpu.memory_space<vmem>>, vector<2x1x256xf32>
    %499 = vector.shape_cast %498 : vector<2x1x256xf32> to vector<2x256xf32>
    %c0_242 = arith.constant 0 : index
    %c0_243 = arith.constant 0 : index
    %c0_244 = arith.constant 0 : index
    %500 = vector.load %arg10[%c0_242, %c0_243, %c0_244] : memref<2x8x256xf32, #tpu.memory_space<vmem>>, vector<2x1x256xf32>
    %501 = vector.shape_cast %500 : vector<2x1x256xf32> to vector<2x256xf32>
    %502 = arith.select %18, %499, %501 : vector<2x256xi1>, vector<2x256xf32>
    %cst_245 = arith.constant dense<0.000000e+00> : vector<2x256xf32>
    %503 = tpu.matmul %489, %285, %cst_245 {dimension_numbers = #tpu.dot_dimension_numbers<[1], [0], [0], [1], [0, 0, 1, 1], [], []>} : vector<2x64xf32>, vector<64x256xf32>, vector<2x256xf32> -> vector<2x256xf32>
    %504 = arith.addf %502, %503 : vector<2x256xf32>
    %505 = arith.negf %504 : vector<2x256xf32>
    %506 = math.exp %505 : vector<2x256xf32>
    %cst_246 = arith.constant 1.000000e+00 : f32
    %507 = vector.broadcast %cst_246 : f32 to vector<2x256xf32>
    %508 = arith.addf %507, %506 : vector<2x256xf32>
    %509 = arith.divf %507, %508 : vector<2x256xf32>
    %510 = math.tanh %504 : vector<2x256xf32>
    %511 = vector.extract_strided_slice %509 {offsets = [0, 0], sizes = [2, 64], strides = [1, 1]} : vector<2x256xf32> to vector<2x64xf32>
    %512 = vector.extract_strided_slice %509 {offsets = [0, 64], sizes = [2, 64], strides = [1, 1]} : vector<2x256xf32> to vector<2x64xf32>
    %513 = vector.extract_strided_slice %510 {offsets = [0, 128], sizes = [2, 64], strides = [1, 1]} : vector<2x256xf32> to vector<2x64xf32>
    %514 = vector.extract_strided_slice %509 {offsets = [0, 192], sizes = [2, 64], strides = [1, 1]} : vector<2x256xf32> to vector<2x64xf32>
    %515 = arith.mulf %512, %487 : vector<2x64xf32>
    %516 = arith.mulf %511, %513 : vector<2x64xf32>
    %517 = arith.addf %515, %516 : vector<2x64xf32>
    %518 = math.tanh %517 : vector<2x64xf32>
    %519 = arith.mulf %514, %518 : vector<2x64xf32>
    %520 = vector.extract_strided_slice %519 {offsets = [0, 0], sizes = [2, 32], strides = [1, 1]} : vector<2x64xf32> to vector<2x32xf32>
    %c0_247 = arith.constant 0 : index
    %c7_248 = arith.constant 7 : index
    %c0_249 = arith.constant 0 : index
    %521 = vector.load %arg11[%c0_247, %c7_248, %c0_249] : memref<2x8x32xf32, #tpu.memory_space<vmem>>, vector<2x1x32xf32>
    %522 = vector.shape_cast %521 : vector<2x1x32xf32> to vector<2x32xf32>
    %523 = vector.shape_cast %520 : vector<2x32xf32> to vector<2x1x32xf32>
    tpu.vector_store %arg11[%c0_247, %c7_248, %c0_249], %523 {strides = array<i32>} : memref<2x8x32xf32, #tpu.memory_space<vmem>>, vector<2x1x32xf32>,
    %524 = vector.extract_strided_slice %519 {offsets = [0, 32], sizes = [2, 32], strides = [1, 1]} : vector<2x64xf32> to vector<2x32xf32>
    %c0_250 = arith.constant 0 : index
    %c0_251 = arith.constant 0 : index
    %c0_252 = arith.constant 0 : index
    %525 = vector.load %arg12[%c0_250, %c0_251, %c0_252] : memref<2x8x32xf32, #tpu.memory_space<vmem>>, vector<2x1x32xf32>
    %526 = vector.shape_cast %525 : vector<2x1x32xf32> to vector<2x32xf32>
    %527 = vector.shape_cast %524 : vector<2x32xf32> to vector<2x1x32xf32>
    tpu.vector_store %arg12[%c0_250, %c0_251, %c0_252], %527 {strides = array<i32>} : memref<2x8x32xf32, #tpu.memory_space<vmem>>, vector<2x1x32xf32>,
    %c0_253 = arith.constant 0 : index
    %c0_254 = arith.constant 0 : index
    %c0_255 = arith.constant 0 : index
    %528 = vector.load %arg11[%c0_253, %c0_254, %c0_255] : memref<2x8x32xf32, #tpu.memory_space<vmem>>, vector<2x8x32xf32>
    %529 = vector.shape_cast %528 : vector<2x8x32xf32> to vector<16x32xf32>
    %c0_256 = arith.constant 0 : index
    %c0_257 = arith.constant 0 : index
    %c0_258 = arith.constant 0 : index
    %530 = vector.load %arg12[%c0_256, %c0_257, %c0_258] : memref<2x8x32xf32, #tpu.memory_space<vmem>>, vector<2x8x32xf32>
    %531 = vector.shape_cast %530 : vector<2x8x32xf32> to vector<16x32xf32>
    %c0_259 = arith.constant 0 : index
    %c0_260 = arith.constant 0 : index
    %532 = vector.load %arg7[%c0_259, %c0_260] : memref<64x8xf32, #tpu.memory_space<vmem>>, vector<32x8xf32>
    %cst_261 = arith.constant dense<0.000000e+00> : vector<16x8xf32>
    %533 = tpu.matmul %529, %532, %cst_261 {dimension_numbers = #tpu.dot_dimension_numbers<[1], [0], [0], [1], [0, 0, 1, 1], [], []>} : vector<16x32xf32>, vector<32x8xf32>, vector<16x8xf32> -> vector<16x8xf32>
    %c32_262 = arith.constant 32 : index
    %c0_263 = arith.constant 0 : index
    %534 = vector.load %arg7[%c32_262, %c0_263] : memref<64x8xf32, #tpu.memory_space<vmem>>, vector<32x8xf32>
    %cst_264 = arith.constant dense<0.000000e+00> : vector<16x8xf32>
    %535 = tpu.matmul %531, %534, %cst_264 {dimension_numbers = #tpu.dot_dimension_numbers<[1], [0], [0], [1], [0, 0, 1, 1], [], []>} : vector<16x32xf32>, vector<32x8xf32>, vector<16x8xf32> -> vector<16x8xf32>
    %536 = arith.addf %533, %535 : vector<16x8xf32>
    %c0_265 = arith.constant 0 : index
    %c0_266 = arith.constant 0 : index
    %537 = vector.load %arg8[%c0_265, %c0_266] : memref<1x8xf32, #tpu.memory_space<vmem>>, vector<1x8xf32>
    %538 = vector.broadcast %537 : vector<1x8xf32> to vector<16x8xf32>
    %539 = arith.addf %536, %538 : vector<16x8xf32>
    %540 = vector.shape_cast %539 : vector<16x8xf32> to vector<2x8x8xf32>
    %c0_267 = arith.constant 0 : index
    %c0_268 = arith.constant 0 : index
    %c0_269 = arith.constant 0 : index
    %541 = vector.load %arg9[%c0_267, %c0_268, %c0_269] : memref<2x8x8xf32, #tpu.memory_space<vmem>>, vector<2x8x8xf32>
    tpu.vector_store %arg9[%c0_267, %c0_268, %c0_269], %540 {strides = array<i32>} : memref<2x8x8xf32, #tpu.memory_space<vmem>>, vector<2x8x8xf32>,
    return
  }
}

</mosaic_0001>

<bundles_post_ra>
// kernel: bilstm_forward.1
= control target key start
LH: loop header
LB: loop body
LE: loop exit
PB: predicated region body
PF: predicated region fallthrough
CT: control target
= control target key end

     0   :  { %14 = vsyncpa [#allocation6], 0  ;;  %s5513_s0 = inlined_call_operand.vmem [shape: f32[2,8,16], index: 0, kind: input, shape index: {}]   ;;  %s5514_s1 = inlined_call_operand.vmem [shape: f32[16,256], index: 1, kind: input, shape index: {}]   ;;  %s5515_s2 = inlined_call_operand.hbm [shape: f32[64,256], index: 2, kind: input, shape index: {}]   ;;  %s5516_s3 = inlined_call_operand.vmem [shape: f32[1,256], index: 3, kind: input, shape index: {}]   ;;  %s5517_s4 = inlined_call_operand.hbm [shape: f32[64,256], index: 4, kind: input, shape index: {}]   ;;  %s5518_s5 = inlined_call_operand.hbm [shape: f32[64,256], index: 5, kind: input, shape index: {}]   ;;  %s5519_s6 = inlined_call_operand.vmem [shape: f32[1,256], index: 6, kind: input, shape index: {}]   ;;  %s5520_s7 = inlined_call_operand.vmem [shape: f32[64,8], index: 7, kind: input, shape index: {}]   ;;  %s5521_s8 = inlined_call_operand.vmem [shape: f32[1,8], index: 8, kind: input, shape index: {}]   ;;  %s5522_s9 = inlined_call_operand.hbm [shape: f32[2,8,8], index: 9, kind: output, shape index: {}]  }
   0x1   :  { %15 = vsyncpa [#allocation9], 0 }
   0x2   :  { %16 = vsyncpa [#allocation7], 0  ;;  %s4647_s30 = smov [#allocation8]   ;;  %s4648_s11 = smov [#allocation5]  }
   0x3   :  { %s40_s10 = sshll.u32 %s4647_s30, 4  ;;  %s26_s12 = sshll.u32 %s4648_s11, 4  ;;  %s41_s10 = int_to_ptr.vmem [resolvable:$true] %s40_s10  ;;  %s4709_s12 = int_to_ptr.vmem [resolvable:$true] %s26_s12 }
   0x4   :  { %s4553_s15 = scalar_lea.hbm %s5517_s4, 2048 }
   0x5   :  { %p4554_p0 = scmp.ne.s32.totalorder %s5517_s4, %s4553_s15  ;;  %p4557_p1 = scmp.lt.u32.totalorder %s4553_s15, %s5517_s4 }
   0x7   :  { %p4559_p2 = pnand %p4557_p1, %p4554_p0 }
   0x9   :  { %4562 = shalt.err (!%p4559_p2)
}
   0xa   :  { %s4563_s20 = scalar_lea.vmem %s41_s10, 2048  ;;  %p4568_p4 = scmp.lt.s32.totalorder %s41_s10, %s41_s10 }
   0xb   :  { %p4564_p3 = scmp.ne.s32.totalorder %s41_s10, %s4563_s20  ;;  %p4569_p5 = scmp.lt.s32.totalorder %s4563_s20, %s4563_s20 }
   0xd   :  { %p4570_p6 = por %p4569_p5, %p4568_p4 }
   0xf   :  { %p4571_p7 = pnand %p4570_p6, %p4564_p3 }
  0x11   :  { %4574 = shalt.err (!%p4571_p7)
}
  0x12   :  { %s4649_s21 = smov 256   ;;  %s4650_s22 = smov 16  }
  0x13   :  { %46 = dma.hbm_to_vmem [thread:$0]  %s5517_s4, 2048, %s41_s10, [#allocation9], %s4649_s21, %s4649_s21, %s4650_s22  }
  0x14   :  { %s4575_s27 = scalar_lea.hbm %s5515_s2, 2048 }
  0x15   :  { %p4576_p8 = scmp.ne.s32.totalorder %s5515_s2, %s4575_s27  ;;  %p4579_p9 = scmp.lt.u32.totalorder %s4575_s27, %s5515_s2 }
  0x17   :  { %p4581_p10 = pnand %p4579_p9, %p4576_p8 }
  0x19   :  { %4584 = shalt.err (!%p4581_p10)
}
  0x1a   :  { %s4585_s13 = scalar_lea.vmem %s4709_s12, 2048  ;;  %p4590_p12 = scmp.lt.s32.totalorder %s4709_s12, %s4709_s12 }
  0x1b   :  { %p4586_p11 = scmp.ne.s32.totalorder %s4709_s12, %s4585_s13  ;;  %p4591_p13 = scmp.lt.s32.totalorder %s4585_s13, %s4585_s13 }
  0x1d   :  { %p4592_p0 = por %p4591_p13, %p4590_p12 }
  0x1f   :  { %p4593_p1 = pnand %p4592_p0, %p4586_p11 }
  0x21   :  { %4596 = shalt.err (!%p4593_p1)
}
  0x22   :  { %32 = dma.hbm_to_vmem [thread:$0]  %s5515_s2, 2048, %s4709_s12, [#allocation6], %s4649_s21, %s4649_s21, %s4650_s22  }
  0x23   :  { %s4651_s14 = smov [#allocation10]   ;;  %s4597_s18 = scalar_lea.hbm %s5518_s5, 2048 }
  0x24   :  { %s52_s15 = sshll.u32 %s4651_s14, 4  ;;  %p4598_p2 = scmp.ne.s32.totalorder %s5518_s5, %s4597_s18  ;;  %s53_s15 = int_to_ptr.vmem [resolvable:$true] %s52_s15 }
  0x25   :  { %p4601_p3 = scmp.lt.u32.totalorder %s4597_s18, %s5518_s5 }
  0x27   :  { %p4603_p4 = pnand %p4601_p3, %p4598_p2 }
  0x29   :  { %4606 = shalt.err (!%p4603_p4)
}
  0x2a   :  { %s4607_s25 = scalar_lea.vmem %s53_s15, 2048  ;;  %p4612_p6 = scmp.lt.s32.totalorder %s53_s15, %s53_s15 }
  0x2b   :  { %p4608_p5 = scmp.ne.s32.totalorder %s53_s15, %s4607_s25  ;;  %p4613_p7 = scmp.lt.s32.totalorder %s4607_s25, %s4607_s25 }
  0x2d   :  { %p4614_p8 = por %p4613_p7, %p4612_p6 }
  0x2f   :  { %p4615_p9 = pnand %p4614_p8, %p4608_p5 }
  0x31   :  { %4618 = shalt.err (!%p4615_p9)
}
  0x32   :  { %58 = dma.hbm_to_vmem [thread:$0]  %s5518_s5, 2048, %s53_s15, [#allocation9], %s4649_s21, %s4649_s21, %s4650_s22  }
  0x33   :  { %4641 = dma.done.wait [#allocation6], 2048  }
  0x34   :  { %4642 = vsyncadd [#allocation6], 4294965248 }
  0x35   :  { %4643 = dma.done.wait [#allocation9], 4096  }
  0x36   :  { %4644 = vsyncadd [#allocation9], 4294963200  ;;  %v4652_v0 = vmov 0.0   ;;  %v106_v1 = vld [vmem:[%s5514_s1 + $0x8] sm:$0xff]  ;;  %v108_v2 = vld [vmem:[%s5514_s1 + $0x18] sm:$0xff]  ;;  %vm121_vm0 = vcmask 130048   ;;  %v74_v33 = vlaneseq }
  0x37   :  { %192 = vmatprep.mubr.f32.mxu0 %v4652_v0  ;;  %356 = vmatprep.mubr.f32.mxu1 %v4652_v0  ;;  %v105_v3 = vld [vmem:[%s5514_s1] sm:$0xff]  ;;  %v4051_v4 = vpack.c.bf16 %v108_v2, %v106_v1  ;;  %v107_v5 = vld [vmem:[%s5514_s1 + $0x10] sm:$0xff]  ;;  %v210_v8 = vld [vmem:[#allocation5 + $0x8] sm:$0xff]  ;;  %v4653_v47 = vmov 1966171168   ;;  %vm288_vm3 = vcmask 523264  }
  0x38   :  { %v4053_v6 = vpack.c.bf16 %v107_v5, %v105_v3  ;;  %v103_v7 = vld [vmem:[%s5513_s0] sm:$0xff]  ;;  %v212_v9 = vld [vmem:[#allocation5 + $0x18] sm:$0xff]  ;;  %v211_v12 = vld [vmem:[#allocation5 + $0x10] sm:$0xff]  ;;  %v4829_v34 = vshrl.u32 %v74_v33, 7  ;;  %v236_v48 = vunpack.c.l.s4 %v4653_v47  ;;  %v75_v50 = vand.u32 127, %v74_v33  ;;  %s4655_s14 = smov 32  }
  0x39   :  { %v209_v10 = vld [vmem:[#allocation5] sm:$0xff]  ;;  %4052 = vmatprep.subr.bf16.mxu0 %v4051_v4  ;;  %v4778_v11 = vpack.c.bf16 %v212_v9, %v210_v8  ;;  %v214_v13 = vld [vmem:[#allocation5 + $0x28] sm:$0xff]  ;;  %v216_v14 = vld [vmem:[#allocation5 + $0x38] sm:$0xff]  ;;  %vm424_vm4 = vcmask 253952   ;;  %vm1909_vm5 = vcmask 261120   ;;  %s4656_s21 = smov [#allocation11]  }
  0x3a   :  { %4054 = vmatpush1.bf16.msra.mxu0 %v4053_v6  ;;  %v4780_v15 = vpack.c.bf16 %v211_v12, %v209_v10  ;;  %v4782_v16 = vpack.c.bf16 %v216_v14, %v214_v13  ;;  %v213_v17 = vld [vmem:[#allocation5 + $0x20] sm:$0xff]  ;;  %v215_v18 = vld [vmem:[#allocation5 + $0x30] sm:$0xff]  ;;  %v218_v19 = vld [vmem:[#allocation5 + $0x48] sm:$0xff]  ;;  %v4832_v35 = vsub.s32 0, %v4829_v34  ;;  %v117_v37 = vsub.s32 1, %v4829_v34  ;;  %s3947_s22 = sshll.u32 %s4656_s21, 4  ;;  %s3948_s22 = int_to_ptr.vmem [resolvable:$true] %s3947_s22 }
  0x3b   :  { %4056 = vmatprep.subr.bf16.mxu1 %v4778_v11  ;;  %v220_v20 = vld [vmem:[#allocation5 + $0x58] sm:$0xff]  ;;  %4072 = vmatprep.subr.bf16.mxu0 %v4778_v11  ;;  %v4787_v21 = vpack.c.bf16 %v215_v18, %v213_v17  ;;  %v217_v23 = vld [vmem:[#allocation5 + $0x40] sm:$0xff]  ;;  %v219_v24 = vld [vmem:[#allocation5 + $0x50] sm:$0xff]  ;;  %v237_v51 = vunpack.c.0.s8 %v236_v48  ;;  %v81_v53 = vand.u32 63, %v75_v50  ;;  %v76_v4 = vadd.s32 128, %v75_v50  ;;  %s4619_s13 = scalar_lea.vmem %s3948_s22, 256  ;;  %p4624_p11 = scmp.lt.s32.totalorder %s3948_s22, %s3948_s22 }
  0x3c   :  { %4058 = vmatpush1.bf16.msra.mxu1 %v4780_v15  ;;  %v4791_v22 = vpack.c.bf16 %v220_v20, %v218_v19  ;;  %v104_v25 = vld [vmem:[%s5513_s0 + $0x8] sm:$0xff]  ;;  %v224_v27 = vld [vmem:[#allocation5 + $0x78] sm:$0xff]  ;;  %v4800_v28 = vpack.c.bf16 %v219_v24, %v217_v23  ;;  %v221_v30 = vld [vmem:[#allocation5 + $0x60] sm:$0xff]  ;;  %vm3939_vm6 = vcmask 64512   ;;  %p4620_p10 = scmp.ne.s32.totalorder %s3948_s22, %s4619_s13  ;;  %p4625_p12 = scmp.lt.s32.totalorder %s4619_s13, %s4619_s13 }
  0x3d   :  { %3960 = vmatmul.mubr.msk.f32.vlgmr.msra.gmra.mrb[0].mxu0 %vm121_vm0, %v103_v7  ;;  %4060 = vmatprep.subr.bf16.mxu1 %v4782_v16  ;;  %v222_v26 = vld [vmem:[#allocation5 + $0x68] sm:$0xff]  ;;  %v223_v31 = vld [vmem:[#allocation5 + $0x70] sm:$0xff]  ;;  %v109_v36 = vld [vmem:[%s5516_s3] sm:$0x3]  ;;  %v4842_v54 = vsub.s32 %v237_v51, %v4829_v34  ;;  %vm4846_vm1 = vcmp.lt.s32.totalorder %v81_v53, 32  ;;  %v88_v9 = vand.u32 63, %v76_v4 }
  0x3e   :  { %198 = vmatprep.mubr.f32.mxu0 %v4652_v0  ;;  %4074 = vmatpush1.bf16.msra.mxu0 %v4780_v15  ;;  %v4804_v29 = vpack.c.bf16 %v224_v27, %v222_v26  ;;  %v4810_v32 = vpack.c.bf16 %v223_v31, %v221_v30  ;;  %v114_v38 = vrot.slane %v109_v36, %v4832_v35  ;;  %s4654_s3 = smov 64   ;;  %p4626_p13 = por %p4625_p12, %p4624_p11 }
  0x3f   :  { %4076 = vmatprep.subr.bf16.mxu0 %v4782_v16  ;;  %v118_v39 = vrot.slane %v109_v36, %v117_v37  ;;  %vm4856_vm2 = vcmp.lt.s32.totalorder %v88_v9, 32 }
  0x40   :  { %4062 = vmatpush1.bf16.msra.mxu1 %v4787_v21  ;;  %p4627_p0 = pnand %p4626_p13, %p4620_p10 }
  0x41   :  { %3961 = vmatmul.mubr.msk.f32.gmra.mrb[2].mxu0 %vm121_vm0, %v104_v25  ;;  %4064 = vmatprep.subr.bf16.mxu1 %v4791_v22 }
  0x42   :  { %4078 = vmatpush1.bf16.msra.mxu0 %v4787_v21  ;;  %567 = vmatprep.mubr.f32.mxu0 %v4652_v0 }
  0x43   :  { %4080 = vmatprep.subr.bf16.mxu0 %v4791_v22 }
  0x44   :  { %4066 = vmatpush1.bf16.msra.mxu1 %v4800_v28 }
  0x45   :  { %4068 = vmatprep.subr.bf16.mxu1 %v4804_v29 }
  0x46   :  { %4082 = vmatpush1.bf16.msra.mxu0 %v4800_v28 }
  0x47   :  { %4084 = vmatprep.subr.bf16.mxu0 %v4804_v29 }
  0x48   :  { %4070 = vmatpush1.bf16.msra.mxu1 %v4810_v32 }
  0x49   :  { %4088 = vmatprep.subr.bf16.mxu1 %v4778_v11 }
  0x4a   :  { %4086 = vmatpush1.bf16.msra.mxu0 %v4810_v32 }
  0x4b   :  { %357 = vmatmul.mubr.f32.vlgmr.msra.gmra.mrb[0].mxu1 %v4652_v0  ;;  %4104 = vmatprep.subr.bf16.mxu0 %v4778_v11 }
  0x4c   :  { %4090 = vmatpush1.bf16.msra.mxu1 %v4780_v15  ;;  %777 = vmatprep.mubr.f32.mxu1 %v4652_v0 }
  0x4d   :  { %4092 = vmatprep.subr.bf16.mxu1 %v4782_v16 }
  0x50   :  { %4094 = vmatpush1.bf16.msra.mxu1 %v4787_v21 }
  0x51   :  { %4096 = vmatprep.subr.bf16.mxu1 %v4791_v22 }
  0x54   :  { %4098 = vmatpush1.bf16.msra.mxu1 %v4800_v28 }
  0x55   :  { %4100 = vmatprep.subr.bf16.mxu1 %v4804_v29 }
  0x58   :  { %4102 = vmatpush1.bf16.msra.mxu1 %v4810_v32 }
  0x59   :  { %4120 = vmatprep.subr.bf16.mxu1 %v4778_v11 }
 0x110   :  { %v194_v40 = vpop.f32.mrb[0].mxu0 }
 0x111   :  { %v195_v41 = vadd.f32 %v194_v40, %v114_v38  ;;  %v196_v42 = vpop.f32.mrb[1].mxu0 }
 0x112   :  { %v197_v43 = vadd.f32 %v196_v42, %v118_v39 }
 0x113   :  { %205 = vst [vmem:[#allocation2] sm:$0xff] %v195_v41 }
 0x114   :  { %206 = vst [vmem:[#allocation2 + $0x8] sm:$0xff] %v197_v43  ;;  %v200_v44 = vpop.f32.mrb[2].mxu0 }
 0x115   :  { %v201_v45 = vadd.f32 %v200_v44, %v114_v38  ;;  %v202_v46 = vpop.f32.mrb[3].mxu0 }
 0x116   :  { %v203_v49 = vadd.f32 %v202_v46, %v118_v39 }
 0x117   :  { %207 = vst [vmem:[#allocation2 + $0x10] sm:$0xff] %v201_v45 }
 0x118   :  { %208 = vst [vmem:[#allocation2 + $0x18] sm:$0xff] %v203_v49 }
 0x11b   :  { %v225_v52 = vld [vmem:[#allocation2] ss:$8 sm:$0x3]  ;;  %v229_v55 = vld [vmem:[#allocation2 + $0x7] ss:$8 sm:$0x3] }
 0x11c   :  { %v436_v44 = vld [vmem:[#allocation2 + $0x1] ss:$8 sm:$0x3]  ;;  %v440_v45 = vld [vmem:[#allocation2 + $0x6] ss:$8 sm:$0x3] }
 0x11e   :  { %v358_v56 = vpop.f32.mrb[0].mxu1 }
 0x11f   :  { %v227_v57 = vld [vmem:[#allocation2 + $0x10] ss:$8 sm:$0x3]  ;;  %v231_v58 = vld [vmem:[#allocation2 + $0x17] ss:$8 sm:$0x3] }
 0x120   :  { %v234_v59 = vcombine.low %v225_v52, %v227_v57  ;;  %v261_v60 = vcombine.low %v229_v55, %v231_v58  ;;  %v360_v61 = vpop.f32.mrb[1].mxu1  ;;  %v438_v42 = vld [vmem:[#allocation2 + $0x11] ss:$8 sm:$0x3] }
 0x121   :  { %v442_v43 = vld [vmem:[#allocation2 + $0x16] ss:$8 sm:$0x3]  ;;  %v445_v46 = vcombine.low %v436_v44, %v438_v42 }
 0x122   :  { %v241_v62 = vrot.slane %v234_v59, %v4842_v54  ;;  %v268_v63 = vrot.slane %v261_v60, %v4842_v54  ;;  %v472_v47 = vcombine.low %v440_v45, %v442_v43 }
 0x123   :  { %v452_v48 = vrot.slane %v445_v46, %v4842_v54 }
 0x124   :  { %v249_v2 = vrot.slane %v241_v62, %v4842_v54  ;;  %v276_v3 = vrot.slane %v268_v63, %v4842_v54  ;;  %v242_v7 = vcombine.high %v241_v62, %v241_v62  ;;  %v269_v8 = vcombine.high %v268_v63, %v268_v63 }
 0x125   :  { %v479_v49 = vrot.slane %v472_v47, %v4842_v54  ;;  %v460_v50 = vrot.slane %v452_v48, %v4842_v54  ;;  %v453_v58 = vcombine.high %v452_v48, %v452_v48 }
 0x126   :  { %v286_v5 = vsel %vm4846_vm1, %v249_v2, %v276_v3  ;;  %v256_v12 = vrot.slane %v242_v7, %v4842_v54  ;;  %v283_v13 = vrot.slane %v269_v8, %v4842_v54 }
 0x127   :  { %v363_v6 = vadd.f32 %v358_v56, %v286_v5  ;;  %v487_v51 = vrot.slane %v479_v49, %v4842_v54  ;;  %v480_v59 = vcombine.high %v479_v49, %v479_v49  ;;  %v467_v60 = vrot.slane %v453_v58, %v4842_v54 }
 0x128   :  { %v287_v17 = vsel %vm4856_vm2, %v256_v12, %v283_v13 }
 0x129   :  { %v3962_v10 = vmul.f32 -1.442695, %v363_v6  ;;  %v364_v18 = vadd.f32 %v360_v61, %v287_v17  ;;  %v497_v52 = vsel %vm4846_vm1, %v460_v50, %v487_v51  ;;  %v494_v61 = vrot.slane %v480_v59, %v4842_v54 }
 0x12b   :  { %4361 = vpow2.f32 %v3962_v10  ;;  %v3963_v26 = vmul.f32 -1.442695, %v364_v18  ;;  %v498_v62 = vsel %vm4856_vm2, %v467_v60, %v494_v61 }
 0x12c   :  { %4363 = vtanh.f32 %v364_v18 }
 0x135   :  { %v4362_v19 = vpop.eup %4361 }
 0x136   :  { %v371_v20 = vadd.f32 1.0, %v4362_v19  ;;  %v4364_v23 = vpop.eup %4363 }
 0x138   :  { %4365 = vrcp.f32 %v371_v20 }
 0x139   :  { %4367 = vpow2.f32 %v3963_v26  ;;  %v650_v26 = vld [vmem:[#allocation2 + $0x5] ss:$8 sm:$0x3] }
 0x142   :  { %v4366_v24 = vpop.eup %4365 }
 0x143   :  { %v379_v25 = vmul.f32 %v4366_v24, %v4364_v23  ;;  %v4368_v27 = vpop.eup %4367  ;;  %v378_v31 = vmul.f32 0.0, %v4366_v24  ;;  %v648_v23 = vld [vmem:[#allocation2 + $0x12] ss:$8 sm:$0x3] }
 0x144   :  { %v372_v30 = vadd.f32 1.0, %v4368_v27  ;;  %v652_v24 = vld [vmem:[#allocation2 + $0x15] ss:$8 sm:$0x3] }
 0x145   :  { %381 = vrot.lane.b32.xlu0 %v379_v25, %s4654_s3  ;;  %v646_v25 = vld [vmem:[#allocation2 + $0x2] ss:$8 sm:$0x3] }
 0x146   :  { %4369 = vrcp.f32 %v372_v30  ;;  %v655_v27 = vcombine.low %v646_v25, %v648_v23  ;;  %v682_v30 = vcombine.low %v650_v26, %v652_v24 }
 0x150   :  { %v4370_v38 = vpop.eup %4369 }
 0x1b7   :  { %v382_v33 = vpop.permute.xlu0 %381 }
 0x1b8   :  { %v384_v36 = vadd.f32 %v382_v33, %v378_v31  ;;  %v662_v31 = vrot.slane %v655_v27, %v4842_v54  ;;  %v689_v33 = vrot.slane %v682_v30, %v4842_v54 }
 0x1ba   :  { %4371 = vtanh.f32 %v384_v36  ;;  %v663_v45 = vcombine.high %v662_v31, %v662_v31  ;;  %v690_v46 = vcombine.high %v689_v33, %v689_v33 }
 0x1bc   :  { %v677_v47 = vrot.slane %v663_v45, %v4842_v54  ;;  %v704_v48 = vrot.slane %v690_v46, %v4842_v54 }
 0x1be   :  { %v708_v49 = vsel %vm4856_vm2, %v677_v47, %v704_v48 }
 0x1c4   :  { %v4372_v39 = vpop.eup %4371 }
 0x1c5   :  { %v4863_v40 = vmul.f32 %v4372_v39, %v4370_v38  ;;  %v697_v38 = vrot.slane %v689_v33, %v4842_v54 }
 0x1c7   :  { %499 = vrot.lane.b32.xlu0 %v4863_v40, %s4654_s3 }
 0x239   :  { %v500_v41 = vpop.permute.xlu0 %499 }
 0x23a   :  { %3964 = vmatmul.mubr.msk.f32.vlgmr.msra.gmra.mrb[4].mxu0 %vm288_vm3, %v500_v41 }
 0x23b   :  { %4106 = vmatpush1.bf16.msra.mxu0 %v4780_v15  ;;  %987 = vmatprep.mubr.f32.mxu0 %v4652_v0 }
 0x23c   :  { %4108 = vmatprep.subr.bf16.mxu0 %v4782_v16 }
 0x23f   :  { %4110 = vmatpush1.bf16.msra.mxu0 %v4787_v21 }
 0x240   :  { %4112 = vmatprep.subr.bf16.mxu0 %v4791_v22 }
 0x243   :  { %4114 = vmatpush1.bf16.msra.mxu0 %v4800_v28 }
 0x244   :  { %4116 = vmatprep.subr.bf16.mxu0 %v4804_v29 }
 0x247   :  { %4118 = vmatpush1.bf16.msra.mxu0 %v4810_v32 }
 0x248   :  { %4136 = vmatprep.subr.bf16.mxu0 %v4778_v11 }
 0x30d   :  { %v569_v53 = vpop.f32.mrb[4].mxu0 }
 0x30e   :  { %v574_v55 = vadd.f32 %v569_v53, %v497_v52  ;;  %v571_v56 = vpop.f32.mrb[5].mxu0 }
 0x30f   :  { %v575_v63 = vadd.f32 %v571_v56, %v498_v62 }
 0x310   :  { %v3965_v57 = vmul.f32 -1.442695, %v574_v55 }
 0x311   :  { %v3966_v7 = vmul.f32 -1.442695, %v575_v63 }
 0x312   :  { %4373 = vpow2.f32 %v3965_v57 }
 0x313   :  { %4375 = vtanh.f32 %v575_v63 }
 0x31c   :  { %v4374_v2 = vpop.eup %4373 }
 0x31d   :  { %v582_v3 = vadd.f32 1.0, %v4374_v2  ;;  %v4376_v4 = vpop.eup %4375 }
 0x31f   :  { %4377 = vrcp.f32 %v582_v3 }
 0x320   :  { %4379 = vpow2.f32 %v3966_v7  ;;  %v856_v7 = vld [vmem:[#allocation2 + $0x3] ss:$8 sm:$0x3] }
 0x329   :  { %v4378_v5 = vpop.eup %4377 }
 0x32a   :  { %v590_v6 = vmul.f32 %v4378_v5, %v4376_v4  ;;  %v4380_v8 = vpop.eup %4379  ;;  %v589_v10 = vmul.f32 %v4378_v5, %v384_v36  ;;  %v670_v36 = vrot.slane %v662_v31, %v4842_v54  ;;  %v858_v5 = vld [vmem:[#allocation2 + $0x13] ss:$8 sm:$0x3] }
 0x32b   :  { %v583_v9 = vadd.f32 1.0, %v4380_v8  ;;  %v860_v8 = vld [vmem:[#allocation2 + $0x4] ss:$8 sm:$0x3] }
 0x32c   :  { %592 = vrot.lane.b32.xlu1 %v590_v6, %s4654_s3  ;;  %v707_v39 = vsel %vm4846_vm1, %v670_v36, %v697_v38  ;;  %v862_v6 = vld [vmem:[#allocation2 + $0x14] ss:$8 sm:$0x3] }
 0x32d   :  { %4381 = vrcp.f32 %v583_v9  ;;  %v865_v9 = vcombine.low %v856_v7, %v858_v5 }
 0x337   :  { %v4382_v17 = vpop.eup %4381 }
 0x39e   :  { %v593_v12 = vpop.permute.xlu1 %592 }
 0x39f   :  { %v595_v13 = vadd.f32 %v593_v12, %v589_v10  ;;  %v892_v10 = vcombine.low %v860_v8, %v862_v6  ;;  %v872_v12 = vrot.slane %v865_v9, %v4842_v54 }
 0x3a1   :  { %4383 = vtanh.f32 %v595_v13  ;;  %v873_v26 = vcombine.high %v872_v12, %v872_v12 }
 0x3a3   :  { %v887_v30 = vrot.slane %v873_v26, %v4842_v54 }
 0x3ab   :  { %v4384_v18 = vpop.eup %4383 }
 0x3ac   :  { %v4888_v19 = vmul.f32 %v4384_v18, %v4382_v17  ;;  %v880_v17 = vrot.slane %v872_v12, %v4842_v54 }
 0x3ae   :  { %709 = vrot.lane.b32.xlu1 %v4888_v19, %s4654_s3 }
 0x420   :  { %v710_v20 = vpop.permute.xlu1 %709 }
 0x421   :  { %3967 = vmatmul.mubr.msk.f32.vlgmr.msra.gmra.mrb[2].mxu1 %vm288_vm3, %v710_v20 }
 0x422   :  { %4122 = vmatpush1.bf16.msra.mxu1 %v4780_v15  ;;  %1193 = vmatprep.mubr.f32.mxu1 %v4652_v0 }
 0x423   :  { %4124 = vmatprep.subr.bf16.mxu1 %v4782_v16 }
 0x426   :  { %4126 = vmatpush1.bf16.msra.mxu1 %v4787_v21 }
 0x427   :  { %4128 = vmatprep.subr.bf16.mxu1 %v4791_v22 }
 0x42a   :  { %4130 = vmatpush1.bf16.msra.mxu1 %v4800_v28 }
 0x42b   :  { %4132 = vmatprep.subr.bf16.mxu1 %v4804_v29 }
 0x42e   :  { %4134 = vmatpush1.bf16.msra.mxu1 %v4810_v32 }
 0x42f   :  { %4152 = vmatprep.subr.bf16.mxu1 %v4778_v11 }
 0x4f4   :  { %v779_v41 = vpop.f32.mrb[2].mxu1 }
 0x4f5   :  { %v784_v42 = vadd.f32 %v779_v41, %v707_v39  ;;  %v781_v43 = vpop.f32.mrb[3].mxu1 }
 0x4f6   :  { %v785_v50 = vadd.f32 %v781_v43, %v708_v49 }
 0x4f7   :  { %v3968_v44 = vmul.f32 -1.442695, %v784_v42 }
 0x4f8   :  { %v3969_v57 = vmul.f32 -1.442695, %v785_v50 }
 0x4f9   :  { %4385 = vpow2.f32 %v3968_v44 }
 0x4fa   :  { %4387 = vtanh.f32 %v785_v50 }
 0x503   :  { %v4386_v51 = vpop.eup %4385 }
 0x504   :  { %v792_v52 = vadd.f32 1.0, %v4386_v51  ;;  %v4388_v53 = vpop.eup %4387 }
 0x506   :  { %4389 = vrcp.f32 %v792_v52 }
 0x507   :  { %4391 = vpow2.f32 %v3969_v57  ;;  %v1065_v57 = vld [vmem:[#allocation2 + $0x4] ss:$8 sm:$0x3] }
 0x510   :  { %v4390_v55 = vpop.eup %4389 }
 0x511   :  { %v800_v56 = vmul.f32 %v4390_v55, %v4388_v53  ;;  %v4392_v58 = vpop.eup %4391  ;;  %v799_v60 = vmul.f32 %v4390_v55, %v595_v13  ;;  %v899_v13 = vrot.slane %v892_v10, %v4842_v54  ;;  %v1066_v55 = vld [vmem:[#allocation2 + $0x14] ss:$8 sm:$0x3] }
 0x512   :  { %v793_v59 = vadd.f32 1.0, %v4392_v58  ;;  %v1067_v58 = vld [vmem:[#allocation2 + $0x3] ss:$8 sm:$0x3] }
 0x513   :  { %802 = vrot.lane.b32.xlu0 %v800_v56, %s4654_s3  ;;  %v907_v18 = vrot.slane %v899_v13, %v4842_v54  ;;  %v900_v27 = vcombine.high %v899_v13, %v899_v13  ;;  %v1068_v56 = vld [vmem:[#allocation2 + $0x13] ss:$8 sm:$0x3] }
 0x514   :  { %4393 = vrcp.f32 %v793_v59  ;;  %v1071_v59 = vcombine.low %v1065_v57, %v1066_v55 }
 0x515   :  { %v917_v20 = vsel %vm4846_vm1, %v880_v17, %v907_v18  ;;  %v914_v31 = vrot.slane %v900_v27, %v4842_v54 }
 0x517   :  { %v918_v33 = vsel %vm4856_vm2, %v887_v30, %v914_v31 }
 0x51e   :  { %v4394_v63 = vpop.eup %4393 }
 0x585   :  { %v803_v61 = vpop.permute.xlu0 %802 }
 0x586   :  { %v805_v62 = vadd.f32 %v803_v61, %v799_v60  ;;  %v1098_v60 = vcombine.low %v1067_v58, %v1068_v56  ;;  %v1078_v61 = vrot.slane %v1071_v59, %v4842_v54 }
 0x588   :  { %4395 = vtanh.f32 %v805_v62  ;;  %v1079_v9 = vcombine.high %v1078_v61, %v1078_v61 }
 0x58a   :  { %v1093_v12 = vrot.slane %v1079_v9, %v4842_v54 }
 0x592   :  { %v4396_v2 = vpop.eup %4395 }
 0x593   :  { %v4913_v3 = vmul.f32 %v4396_v2, %v4394_v63  ;;  %v1086_v63 = vrot.slane %v1078_v61, %v4842_v54 }
 0x595   :  { %919 = vrot.lane.b32.xlu1 %v4913_v3, %s4654_s3 }
 0x607   :  { %v920_v4 = vpop.permute.xlu1 %919 }
 0x608   :  { %3970 = vmatmul.mubr.msk.f32.vlgmr.msra.gmra.mrb[6].mxu0 %vm288_vm3, %v920_v4 }
 0x609   :  { %4138 = vmatpush1.bf16.msra.mxu0 %v4780_v15  ;;  %1399 = vmatprep.mubr.f32.mxu0 %v4652_v0 }
 0x60a   :  { %4140 = vmatprep.subr.bf16.mxu0 %v4782_v16 }
 0x60d   :  { %4142 = vmatpush1.bf16.msra.mxu0 %v4787_v21 }
 0x60e   :  { %4144 = vmatprep.subr.bf16.mxu0 %v4791_v22 }
 0x611   :  { %4146 = vmatpush1.bf16.msra.mxu0 %v4800_v28 }
 0x612   :  { %4148 = vmatprep.subr.bf16.mxu0 %v4804_v29 }
 0x615   :  { %4150 = vmatpush1.bf16.msra.mxu0 %v4810_v32 }
 0x616   :  { %4168 = vmatprep.subr.bf16.mxu0 %v4778_v11 }
 0x6db   :  { %v989_v23 = vpop.f32.mrb[6].mxu0 }
 0x6dc   :  { %v994_v24 = vadd.f32 %v989_v23, %v917_v20  ;;  %v991_v11 = vpop.f32.mrb[7].mxu0 }
 0x6dd   :  { %v995_v36 = vadd.f32 %v991_v11, %v918_v33 }
 0x6de   :  { %v3971_v25 = vmul.f32 -1.442695, %v994_v24 }
 0x6df   :  { %v3972_v44 = vmul.f32 -1.442695, %v995_v36 }
 0x6e0   :  { %4397 = vpow2.f32 %v3971_v25 }
 0x6e1   :  { %4399 = vtanh.f32 %v995_v36 }
 0x6ea   :  { %v4398_v38 = vpop.eup %4397 }
 0x6eb   :  { %v1002_v39 = vadd.f32 1.0, %v4398_v38  ;;  %v4400_v41 = vpop.eup %4399 }
 0x6ed   :  { %4401 = vrcp.f32 %v1002_v39 }
 0x6ee   :  { %4403 = vpow2.f32 %v3972_v44  ;;  %v1274_v44 = vld [vmem:[#allocation2 + $0x12] ss:$8 sm:$0x3] }
 0x6f7   :  { %v4402_v42 = vpop.eup %4401 }
 0x6f8   :  { %v1010_v43 = vmul.f32 %v4402_v42, %v4400_v41  ;;  %v4404_v45 = vpop.eup %4403  ;;  %v1009_v47 = vmul.f32 %v4402_v42, %v805_v62  ;;  %v1105_v62 = vrot.slane %v1098_v60, %v4842_v54 }
 0x6f9   :  { %v1003_v46 = vadd.f32 1.0, %v4404_v45  ;;  %v1271_v45 = vld [vmem:[#allocation2 + $0x5] ss:$8 sm:$0x3] }
 0x6fa   :  { %1012 = vrot.lane.b32.xlu0 %v1010_v43, %s4654_s3  ;;  %v1113_v2 = vrot.slane %v1105_v62, %v4842_v54  ;;  %v1106_v10 = vcombine.high %v1105_v62, %v1105_v62  ;;  %v1272_v43 = vld [vmem:[#allocation2 + $0x15] ss:$8 sm:$0x3] }
 0x6fb   :  { %4405 = vrcp.f32 %v1003_v46  ;;  %v1273_v46 = vld [vmem:[#allocation2 + $0x2] ss:$8 sm:$0x3] }
 0x6fc   :  { %v1123_v4 = vsel %vm4846_vm1, %v1086_v63, %v1113_v2  ;;  %v1120_v13 = vrot.slane %v1106_v10, %v4842_v54 }
 0x6fe   :  { %v1124_v17 = vsel %vm4856_vm2, %v1093_v12, %v1120_v13 }
 0x705   :  { %v4406_v50 = vpop.eup %4405 }
 0x76c   :  { %v1013_v48 = vpop.permute.xlu0 %1012 }
 0x76d   :  { %v1015_v49 = vadd.f32 %v1013_v48, %v1009_v47  ;;  %v1277_v47 = vcombine.low %v1271_v45, %v1272_v43 }
 0x76f   :  { %4407 = vtanh.f32 %v1015_v49  ;;  %v1284_v48 = vrot.slane %v1277_v47, %v4842_v54 }
 0x779   :  { %v4408_v51 = vpop.eup %4407 }
 0x77a   :  { %v4938_v52 = vmul.f32 %v4408_v51, %v4406_v50  ;;  %v1285_v51 = vcombine.high %v1284_v48, %v1284_v48 }
 0x77c   :  { %1125 = vrot.lane.b32.xlu1 %v4938_v52, %s4654_s3  ;;  %v1299_v55 = vrot.slane %v1285_v51, %v4842_v54 }
 0x7ee   :  { %v1126_v53 = vpop.permute.xlu1 %1125 }
 0x7ef   :  { %3973 = vmatmul.mubr.msk.f32.vlgmr.msra.gmra.mrb[4].mxu1 %vm288_vm3, %v1126_v53 }
 0x7f0   :  { %4154 = vmatpush1.bf16.msra.mxu1 %v4780_v15  ;;  %1605 = vmatprep.mubr.f32.mxu1 %v4652_v0 }
 0x7f1   :  { %4156 = vmatprep.subr.bf16.mxu1 %v4782_v16 }
 0x7f4   :  { %4158 = vmatpush1.bf16.msra.mxu1 %v4787_v21 }
 0x7f5   :  { %4160 = vmatprep.subr.bf16.mxu1 %v4791_v22 }
 0x7f8   :  { %4162 = vmatpush1.bf16.msra.mxu1 %v4800_v28 }
 0x7f9   :  { %4164 = vmatprep.subr.bf16.mxu1 %v4804_v29 }
 0x7fc   :  { %4166 = vmatpush1.bf16.msra.mxu1 %v4810_v32 }
 0x8c2   :  { %v1195_v5 = vpop.f32.mrb[4].mxu1 }
 0x8c3   :  { %v1200_v6 = vadd.f32 %v1195_v5, %v1123_v4  ;;  %v1197_v7 = vpop.f32.mrb[5].mxu1 }
 0x8c4   :  { %v1201_v18 = vadd.f32 %v1197_v7, %v1124_v17  ;;  %v1478_v17 = vld [vmem:[#allocation2 + $0x16] ss:$8 sm:$0x3] }
 0x8c5   :  { %v3974_v8 = vmul.f32 -1.442695, %v1200_v6 }
 0x8c6   :  { %v3975_v26 = vmul.f32 -1.442695, %v1201_v18 }
 0x8c7   :  { %4409 = vpow2.f32 %v3974_v8 }
 0x8c8   :  { %4411 = vtanh.f32 %v1201_v18  ;;  %v1480_v18 = vld [vmem:[#allocation2 + $0x11] ss:$8 sm:$0x3] }
 0x8d1   :  { %v4410_v20 = vpop.eup %4409 }
 0x8d2   :  { %v1208_v23 = vadd.f32 1.0, %v4410_v20  ;;  %v4412_v24 = vpop.eup %4411  ;;  %v1477_v20 = vld [vmem:[#allocation2 + $0x6] ss:$8 sm:$0x3] }
 0x8d4   :  { %4413 = vrcp.f32 %v1208_v23  ;;  %v1479_v23 = vld [vmem:[#allocation2 + $0x1] ss:$8 sm:$0x3] }
 0x8d5   :  { %4415 = vpow2.f32 %v3975_v26 }
 0x8de   :  { %v4414_v11 = vpop.eup %4413 }
 0x8df   :  { %v1216_v25 = vmul.f32 %v4414_v11, %v4412_v24  ;;  %v4416_v27 = vpop.eup %4415  ;;  %v1215_v31 = vmul.f32 %v4414_v11, %v1015_v49  ;;  %v1483_v24 = vcombine.low %v1477_v20, %v1478_v17  ;;  %v1510_v11 = vcombine.low %v1479_v23, %v1480_v18 }
 0x8e0   :  { %v1209_v30 = vadd.f32 1.0, %v4416_v27 }
 0x8e1   :  { %1218 = vrot.lane.b32.xlu0 %v1216_v25, %s4654_s3  ;;  %v1490_v25 = vrot.slane %v1483_v24, %v4842_v54  ;;  %v1517_v26 = vrot.slane %v1510_v11, %v4842_v54 }
 0x8e2   :  { %4417 = vrcp.f32 %v1209_v30 }
 0x8e3   :  { %v1498_v27 = vrot.slane %v1490_v25, %v4842_v54  ;;  %v1525_v30 = vrot.slane %v1517_v26, %v4842_v54  ;;  %v1518_v43 = vcombine.high %v1517_v26, %v1517_v26 }
 0x8e5   :  { %v1532_v45 = vrot.slane %v1518_v43, %v4842_v54 }
 0x8ec   :  { %v4418_v38 = vpop.eup %4417 }
 0x953   :  { %v1219_v33 = vpop.permute.xlu0 %1218 }
 0x954   :  { %v1221_v36 = vadd.f32 %v1219_v33, %v1215_v31  ;;  %v1535_v31 = vsel %vm4846_vm1, %v1498_v27, %v1525_v30 }
 0x956   :  { %4419 = vtanh.f32 %v1221_v36 }
 0x960   :  { %v4420_v39 = vpop.eup %4419 }
 0x961   :  { %v4962_v41 = vmul.f32 %v4420_v39, %v4418_v38 }
 0x963   :  { %1331 = vrot.lane.b32.xlu1 %v4962_v41, %s4654_s3 }
 0x9d5   :  { %v1332_v42 = vpop.permute.xlu1 %1331 }
 0x9d6   :  { %3976 = vmatmul.mubr.msk.f32.vlgmr.msra.gmra.mrb[8].mxu0 %vm288_vm3, %v1332_v42  ;;  %v1491_v42 = vcombine.high %v1490_v25, %v1490_v25 }
 0x9d7   :  { %4170 = vmatpush1.bf16.msra.mxu0 %v4780_v15  ;;  %1811 = vmatprep.mubr.f32.mxu0 %v4652_v0  ;;  %v1304_v15 = vcombine.low %v1273_v46, %v1274_v44 }
 0x9d8   :  { %4172 = vmatprep.subr.bf16.mxu0 %v4782_v16  ;;  %v1505_v44 = vrot.slane %v1491_v42, %v4842_v54 }
 0x9d9   :  { %v1311_v16 = vrot.slane %v1304_v15, %v4842_v54 }
 0x9da   :  { %v1536_v46 = vsel %vm4856_vm2, %v1505_v44, %v1532_v45 }
 0x9db   :  { %4174 = vmatpush1.bf16.msra.mxu0 %v4787_v21  ;;  %v1292_v21 = vrot.slane %v1284_v48, %v4842_v54  ;;  %v1312_v53 = vcombine.high %v1311_v16, %v1311_v16 }
 0x9dc   :  { %4176 = vmatprep.subr.bf16.mxu0 %v4791_v22  ;;  %v1319_v22 = vrot.slane %v1311_v16, %v4842_v54 }
 0x9dd   :  { %v1326_v56 = vrot.slane %v1312_v53, %v4842_v54  ;;  %v394_v53 = vrot.slane %v4863_v40, %v4842_v54 }
 0x9df   :  { %4178 = vmatpush1.bf16.msra.mxu0 %v4800_v28  ;;  %v1329_v28 = vsel %vm4846_vm1, %v1292_v21, %v1319_v22  ;;  %v1330_v57 = vsel %vm4856_vm2, %v1299_v55, %v1326_v56 }
 0x9e0   :  { %4180 = vmatprep.subr.bf16.mxu0 %v4804_v29 }
 0x9e3   :  { %4182 = vmatpush1.bf16.msra.mxu0 %v4810_v32 }
 0xaa9   :  { %v1401_v29 = vpop.f32.mrb[8].mxu0 }
 0xaaa   :  { %v1406_v49 = vadd.f32 %v1401_v29, %v1329_v28  ;;  %v1403_v32 = vpop.f32.mrb[9].mxu0 }
 0xaab   :  { %v1407_v58 = vadd.f32 %v1403_v32, %v1330_v57  ;;  %v815_v57 = vrot.slane %v4913_v3, %v4842_v54 }
 0xaac   :  { %v3977_v50 = vmul.f32 -1.442695, %v1406_v49 }
 0xaad   :  { %v3978_v2 = vmul.f32 -1.442695, %v1407_v58 }
 0xaae   :  { %4421 = vpow2.f32 %v3977_v50 }
 0xaaf   :  { %4423 = vtanh.f32 %v1407_v58 }
 0xab8   :  { %v4422_v59 = vpop.eup %4421 }
 0xab9   :  { %v1414_v60 = vadd.f32 1.0, %v4422_v59  ;;  %v4424_v61 = vpop.eup %4423  ;;  %v402_v59 = vrot.slane %v394_v53, %v4842_v54 }
 0xabb   :  { %4425 = vrcp.f32 %v1414_v60  ;;  %v1231_v60 = vrot.slane %v4962_v41, %v4842_v54  ;;  %v395_v41 = vcombine.high %v394_v53, %v394_v53 }
 0xabc   :  { %4427 = vpow2.f32 %v3978_v2 }
 0xabd   :  { %v1239_v3 = vrot.slane %v1231_v60, %v4842_v54 }
 0xabf   :  { %v1250_v2 = vrot.slane %v1239_v3, %v4832_v35 }
 0xac5   :  { %v4426_v62 = vpop.eup %4425 }
 0xac6   :  { %v1422_v63 = vmul.f32 %v4426_v62, %v4424_v61  ;;  %v4428_v4 = vpop.eup %4427  ;;  %v1421_v6 = vmul.f32 %v4426_v62, %v1221_v36  ;;  %v413_v61 = vrot.slane %v402_v59, %v4832_v35  ;;  %v823_v62 = vrot.slane %v815_v57, %v4842_v54 }
 0xac7   :  { %v1415_v5 = vadd.f32 1.0, %v4428_v4 }
 0xac8   :  { %1424 = vrot.lane.b32.xlu0 %v1422_v63, %s4654_s3  ;;  %v834_v63 = vrot.slane %v823_v62, %v4832_v35 }
 0xac9   :  { %4429 = vrcp.f32 %v1415_v5 }
 0xad3   :  { %v4430_v9 = vpop.eup %4429 }
 0xb3a   :  { %v1425_v7 = vpop.permute.xlu0 %1424 }
 0xb3b   :  { %v1427_v8 = vadd.f32 %v1425_v7, %v1421_v6  ;;  %v409_v6 = vrot.slane %v395_v41, %v4842_v54  ;;  %v816_v7 = vcombine.high %v815_v57, %v815_v57  ;;  %v605_v41 = vrot.slane %v4888_v19, %v4842_v54 }
 0xb3d   :  { %4431 = vtanh.f32 %v1427_v8 }
 0xb47   :  { %v4432_v10 = vpop.eup %4431 }
 0xb48   :  { %v4986_v12 = vmul.f32 %v4432_v10, %v4430_v9  ;;  %v830_v9 = vrot.slane %v816_v7, %v4842_v54  ;;  %v1232_v10 = vcombine.high %v1231_v60, %v1231_v60  ;;  %v1025_v7 = vrot.slane %v4938_v52, %v4842_v54 }
 0xb4a   :  { %1537 = vrot.lane.b32.xlu1 %v4986_v12, %s4654_s3  ;;  %v1246_v17 = vrot.slane %v1232_v10, %v4842_v54  ;;  %v1437_v10 = vrot.slane %v4986_v12, %v4842_v54 }
 0xb4c   :  { %v1254_v20 = vrot.slane %v1246_v17, %v4832_v35  ;;  %v1033_v17 = vrot.slane %v1025_v7, %v4842_v54 }
 0xb4e   :  { %v1044_v19 = vrot.slane %v1033_v17, %v4832_v35  ;;  %v2103_v17 = vld [vmem:[#allocation10 + $0x38] sm:$0xff] }
 0xbbc   :  { %v1538_v13 = vpop.permute.xlu1 %1537 }
 0xbbd   :  { %3979 = vmatmul.mubr.msk.f32.vlgmr.msra.gmra.mrb[6].mxu1 %vm288_vm3, %v1538_v13  ;;  %v838_v13 = vrot.slane %v830_v9, %v4832_v35  ;;  %v613_v9 = vrot.slane %v605_v41, %v4842_v54 }
 0xbbe   :  { %1980 = vmatprep.mubr.f32.mxu1 %v4652_v0 }
 0xc90   :  { %v1607_v33 = vpop.f32.mrb[6].mxu1 }
 0xc91   :  { %v1612_v36 = vadd.f32 %v1607_v33, %v1535_v31  ;;  %v1609_v38 = vpop.f32.mrb[7].mxu1 }
 0xc92   :  { %v1613_v47 = vadd.f32 %v1609_v38, %v1536_v46 }
 0xc93   :  { %v3980_v39 = vmul.f32 -1.442695, %v1612_v36 }
 0xc94   :  { %v3981_v28 = vmul.f32 -1.442695, %v1613_v47 }
 0xc95   :  { %4433 = vpow2.f32 %v3980_v39 }
 0xc96   :  { %4435 = vtanh.f32 %v1613_v47 }
 0xc9f   :  { %v4434_v15 = vpop.eup %4433 }
 0xca0   :  { %v1620_v48 = vadd.f32 1.0, %v4434_v15  ;;  %v4436_v16 = vpop.eup %4435 }
 0xca2   :  { %4437 = vrcp.f32 %v1620_v48  ;;  %v1684_v48 = vld [vmem:[#allocation2 + $0x17] ss:$8 sm:$0x3] }
 0xca3   :  { %4439 = vpow2.f32 %v3981_v28 }
 0xcac   :  { %v4438_v21 = vpop.eup %4437 }
 0xcad   :  { %v1628_v22 = vmul.f32 %v4438_v21, %v4436_v16  ;;  %v4440_v29 = vpop.eup %4439  ;;  %v1627_v32 = vmul.f32 %v4438_v21, %v1427_v8  ;;  %v417_v8 = vrot.slane %v409_v6, %v4832_v35  ;;  %v1686_v16 = vld [vmem:[#allocation2 + $0x10] ss:$8 sm:$0x3]  ;;  %v1683_v21 = vld [vmem:[#allocation2 + $0x7] ss:$8 sm:$0x3] }
 0xcae   :  { %v1621_v49 = vadd.f32 1.0, %v4440_v29  ;;  %v1689_v28 = vcombine.low %v1683_v21, %v1684_v48  ;;  %v1903_v48 = vld [vmem:[#allocation8 + $0x50] sm:$0xff] }
 0xcaf   :  { %1630 = vrot.lane.b32.xlu0 %v1628_v22, %s4654_s3  ;;  %v1685_v22 = vld [vmem:[#allocation2] ss:$8 sm:$0x3] }
 0xcb0   :  { %4441 = vrcp.f32 %v1621_v49  ;;  %v1716_v29 = vcombine.low %v1685_v22, %v1686_v16  ;;  %v1696_v49 = vrot.slane %v1689_v28, %v4842_v54  ;;  %v1906_v28 = vld [vmem:[#allocation8 + $0x68] sm:$0xff] }
 0xcb2   :  { %v1697_v60 = vcombine.high %v1696_v49, %v1696_v49 }
 0xcb4   :  { %v1711_v62 = vrot.slane %v1697_v60, %v4842_v54 }
 0xcba   :  { %v4442_v55 = vpop.eup %4441 }
 0xd21   :  { %v1631_v50 = vpop.permute.xlu0 %1630 }
 0xd22   :  { %v5003_v51 = vadd.f32 %v1631_v50, %v1627_v32  ;;  %v1723_v32 = vrot.slane %v1716_v29, %v4842_v54  ;;  %v1704_v50 = vrot.slane %v1696_v49, %v4842_v54  ;;  %v1908_v29 = vld [vmem:[#allocation8 + $0x78] sm:$0xff]  ;;  %v1905_v49 = vld [vmem:[#allocation8 + $0x60] sm:$0xff] }
 0xd24   :  { %4443 = vtanh.f32 %v5003_v51  ;;  %v1731_v53 = vrot.slane %v1723_v32, %v4842_v54 }
 0xd2e   :  { %v4444_v56 = vpop.eup %4443 }
 0xd2f   :  { %v1635_v58 = vmul.f32 %v4444_v56, %v4442_v55  ;;  %v1741_v55 = vsel %vm4846_vm1, %v1704_v50, %v1731_v53  ;;  %v4187_v50 = vpack.c.bf16 %v1908_v29, %v1906_v28  ;;  %v1907_v53 = vld [vmem:[#allocation8 + $0x70] sm:$0xff] }
 0xd30   :  { %v1899_v28 = vld [vmem:[#allocation8 + $0x30] sm:$0xff] }
 0xd31   :  { %1743 = vrot.lane.b32.xlu1 %v1635_v58, %s4654_s3  ;;  %v1643_v40 = vrot.slane %v1635_v58, %v4842_v54 }
 0xd33   :  { %v1651_v4 = vrot.slane %v1643_v40, %v4842_v54  ;;  %v1644_v18 = vcombine.high %v1643_v40, %v1643_v40 }
 0xd35   :  { %427 = vrot.lane.b32.xlu1 %v413_v61, %s4655_s14  ;;  %v1662_v5 = vrot.slane %v1651_v4, %v4832_v35  ;;  %v1658_v23 = vrot.slane %v1644_v18, %v4842_v54  ;;  %v1445_v18 = vrot.slane %v1437_v10, %v4842_v54 }
 0xd37   :  { %v1666_v24 = vrot.slane %v1658_v23, %v4832_v35  ;;  %v1456_v52 = vrot.slane %v1445_v18, %v4832_v35 }
 0xd39   :  { %847 = vrot.lane.b32.xlu1 %v834_v63, %s4655_s14 }
 0xd3d   :  { %1263 = vrot.lane.b32.xlu1 %v1250_v2, %s4655_s14 }
 0xd41   :  { %1675 = vrot.lane.b32.xlu1 %v1662_v5, %s4655_s14 }
 0xd45   :  { %429 = vrot.lane.b32.xlu1 %v417_v8, %s4655_s14 }
 0xd49   :  { %849 = vrot.lane.b32.xlu1 %v838_v13, %s4655_s14 }
 0xd4d   :  { %1265 = vrot.lane.b32.xlu1 %v1254_v20, %s4655_s14 }
 0xd51   :  { %1677 = vrot.lane.b32.xlu1 %v1666_v24, %s4655_s14 }
 0xd55   :  { %418 = vrot.lane.b32.xlu1 %v413_v61, %s4654_s3  ;;  %v1724_v61 = vcombine.high %v1723_v32, %v1723_v32 }
 0xd57   :  { %v1738_v40 = vrot.slane %v1724_v61, %v4842_v54 }
 0xd59   :  { %839 = vrot.lane.b32.xlu1 %v834_v63, %s4654_s3  ;;  %v1742_v63 = vsel %vm4856_vm2, %v1711_v62, %v1738_v40 }
 0xd5d   :  { %1255 = vrot.lane.b32.xlu1 %v1250_v2, %s4654_s3 }
 0xd61   :  { %1667 = vrot.lane.b32.xlu1 %v1662_v5, %s4654_s3 }
 0xd65   :  { %420 = vrot.lane.b32.xlu1 %v417_v8, %s4654_s3 }
 0xd69   :  { %841 = vrot.lane.b32.xlu1 %v838_v13, %s4654_s3  ;;  %v624_v13 = vrot.slane %v613_v9, %v4832_v35 }
 0xd6d   :  { %1257 = vrot.lane.b32.xlu1 %v1254_v20, %s4654_s3  ;;  %v606_v20 = vcombine.high %v605_v41, %v605_v41 }
 0xd6f   :  { %v620_v23 = vrot.slane %v606_v20, %v4842_v54  ;;  %v2100_v20 = vld [vmem:[#allocation10 + $0x20] sm:$0xff] }
 0xd71   :  { %1669 = vrot.lane.b32.xlu1 %v1666_v24, %s4654_s3  ;;  %v1026_v24 = vcombine.high %v1025_v7, %v1025_v7  ;;  %v628_v12 = vrot.slane %v620_v23, %v4832_v35  ;;  %v2099_v7 = vld [vmem:[#allocation10 + $0x18] sm:$0xff]  ;;  %v2105_v23 = vld [vmem:[#allocation10 + $0x48] sm:$0xff] }
 0xda3   :  { %v1744_v11 = vpop.permute.xlu1 %1743 }
 0xda4   :  { %3982 = vmatmul.mubr.msk.f32.vlgmr.msra.gmra.mrb[10].mxu0 %vm288_vm3, %v1744_v11  ;;  %v1040_v11 = vrot.slane %v1026_v24, %v4842_v54 }
 0xda5   :  { %2236 = vmatprep.mubr.f32.mxu0 %v4652_v0 }
 0xda7   :  { %v428_v25 = vpop.permute.xlu1 %427 }
 0xda8   :  { %433 = vst.msk [vmem:[#allocation4 + $0x7] sm:$0x1] %vm424_vm4, %v428_v25  ;;  %v1438_v25 = vcombine.high %v1437_v10, %v1437_v10  ;;  %v2098_v10 = vld [vmem:[#allocation10 + $0x10] sm:$0xff] }
 0xdab   :  { %v848_v26 = vpop.permute.xlu1 %847 }
 0xdac   :  { %853 = vst.msk [vmem:[#allocation4 + $0x5] sm:$0x1] %vm424_vm4, %v848_v26  ;;  %v1048_v26 = vrot.slane %v1040_v11, %v4832_v35 }
 0xdaf   :  { %v1264_v27 = vpop.permute.xlu1 %1263 }
 0xdb0   :  { %1269 = vst.msk [vmem:[#allocation4 + $0x3] sm:$0x1] %vm424_vm4, %v1264_v27  ;;  %v1452_v27 = vrot.slane %v1438_v25, %v4842_v54 }
 0xdb3   :  { %v1676_v30 = vpop.permute.xlu1 %1675 }
 0xdb4   :  { %1681 = vst.msk [vmem:[#allocation4 + $0x1] sm:$0x1] %vm424_vm4, %v1676_v30  ;;  %v5098_v30 = vrot.slane %v1452_v27, %v4832_v35  ;;  %v2106_v27 = vld [vmem:[#allocation10 + $0x50] sm:$0xff] }
 0xdb7   :  { %v430_v31 = vpop.permute.xlu1 %429 }
 0xdb8   :  { %434 = vst.msk [vmem:[#allocation4 + $0xf] sm:$0x1] %vm424_vm4, %v430_v31 }
 0xdbb   :  { %v850_v33 = vpop.permute.xlu1 %849 }
 0xdbc   :  { %854 = vst.msk [vmem:[#allocation4 + $0xd] sm:$0x1] %vm424_vm4, %v850_v33 }
 0xdbf   :  { %v1266_v36 = vpop.permute.xlu1 %1265 }
 0xdc0   :  { %1270 = vst.msk [vmem:[#allocation4 + $0xb] sm:$0x1] %vm424_vm4, %v1266_v36 }
 0xdc3   :  { %v1678_v38 = vpop.permute.xlu1 %1677 }
 0xdc4   :  { %1682 = vst.msk [vmem:[#allocation4 + $0x9] sm:$0x1] %vm424_vm4, %v1678_v38 }
 0xdc7   :  { %v419_v39 = vpop.permute.xlu1 %418 }
 0xdc8   :  { %425 = vst.msk [vmem:[#allocation3] sm:$0x1] %vm424_vm4, %v419_v39 }
 0xdcb   :  { %v840_v42 = vpop.permute.xlu1 %839 }
 0xdcc   :  { %845 = vst.msk [vmem:[#allocation3 + $0x2] sm:$0x1] %vm424_vm4, %v840_v42 }
 0xdcf   :  { %v1256_v43 = vpop.permute.xlu1 %1255 }
 0xdd0   :  { %1261 = vst.msk [vmem:[#allocation3 + $0x4] sm:$0x1] %vm424_vm4, %v1256_v43 }
 0xdd3   :  { %v1668_v44 = vpop.permute.xlu1 %1667 }
 0xdd4   :  { %1673 = vst.msk [vmem:[#allocation3 + $0x6] sm:$0x1] %vm424_vm4, %v1668_v44 }
 0xdd7   :  { %v421_v45 = vpop.permute.xlu1 %420 }
 0xdd8   :  { %426 = vst.msk [vmem:[#allocation3 + $0x8] sm:$0x1] %vm424_vm4, %v421_v45  ;;  %v1902_v45 = vld [vmem:[#allocation8 + $0x48] sm:$0xff] }
 0xddb   :  { %v842_v46 = vpop.permute.xlu1 %841 }
 0xddc   :  { %846 = vst.msk [vmem:[#allocation3 + $0xa] sm:$0x1] %vm424_vm4, %v842_v46  ;;  %v1904_v46 = vld [vmem:[#allocation8 + $0x58] sm:$0xff] }
 0xddf   :  { %v1258_v47 = vpop.permute.xlu1 %1257 }
 0xde0   :  { %1262 = vst.msk [vmem:[#allocation3 + $0xc] sm:$0x1] %vm424_vm4, %v1258_v47  ;;  %v1901_v47 = vld [vmem:[#allocation8 + $0x40] sm:$0xff] }
 0xde1   :  { %v4185_v16 = vpack.c.bf16 %v1903_v48, %v1901_v47  ;;  %v1895_v47 = vld [vmem:[#allocation8 + $0x10] sm:$0xff]  ;;  %v1898_v48 = vld [vmem:[#allocation8 + $0x28] sm:$0xff] }
 0xde3   :  { %v1670_v15 = vpop.permute.xlu1 %1669 }
 0xde4   :  { %1674 = vst.msk [vmem:[#allocation3 + $0xe] sm:$0x1] %vm424_vm4, %v1670_v15  ;;  %v4183_v15 = vpack.c.bf16 %v1904_v46, %v1902_v45  ;;  %v1893_v46 = vld [vmem:[#allocation8] sm:$0xff] }
 0xde6   :  { %4184 = vmatprep.subr.bf16.mxu1 %v4183_v15 }
 0xde7   :  { %4186 = vmatpush1.bf16.msra.mxu1 %v4185_v16  ;;  %v1900_v16 = vld [vmem:[#allocation8 + $0x38] sm:$0xff] }
 0xde8   :  { %4188 = vmatprep.subr.bf16.mxu1 %v4187_v50 }
 0xe77   :  { %v1813_v56 = vpop.f32.mrb[10].mxu0 }
 0xe78   :  { %v1818_v57 = vadd.f32 %v1813_v56, %v1741_v55  ;;  %v1815_v58 = vpop.f32.mrb[11].mxu0  ;;  %v4189_v55 = vpack.c.bf16 %v1907_v53, %v1905_v49 }
 0xe79   :  { %v1819_v3 = vadd.f32 %v1815_v58, %v1742_v63  ;;  %v1894_v58 = vld [vmem:[#allocation8 + $0x8] sm:$0xff] }
 0xe7a   :  { %v3983_v59 = vmul.f32 -1.442695, %v1818_v57  ;;  %4190 = vmatpush1.bf16.msra.mxu1 %v4189_v55 }
 0xe7b   :  { %v3984_v31 = vmul.f32 -1.442695, %v1819_v3 }
 0xe7c   :  { %4445 = vpow2.f32 %v3983_v59  ;;  %v1896_v59 = vld [vmem:[#allocation8 + $0x18] sm:$0xff] }
 0xe7d   :  { %4447 = vtanh.f32 %v1819_v3  ;;  %v4191_v61 = vpack.c.bf16 %v1896_v59, %v1894_v58 }
 0xe7f   :  { %4192 = vmatprep.subr.bf16.mxu1 %v4191_v61 }
 0xe86   :  { %v4446_v2 = vpop.eup %4445 }
 0xe87   :  { %v1826_v4 = vadd.f32 1.0, %v4446_v2  ;;  %v4448_v5 = vpop.eup %4447 }
 0xe89   :  { %4449 = vrcp.f32 %v1826_v4 }
 0xe8a   :  { %4451 = vpow2.f32 %v3984_v31  ;;  %v2111_v31 = vld [vmem:[#allocation10 + $0x78] sm:$0xff] }
 0xe93   :  { %v4450_v6 = vpop.eup %4449 }
 0xe94   :  { %v1834_v8 = vmul.f32 %v4450_v6, %v4448_v5  ;;  %v4452_v33 = vpop.eup %4451  ;;  %v1833_v38 = vmul.f32 %v4450_v6, %v5003_v51  ;;  %v2097_v6 = vld [vmem:[#allocation10 + $0x8] sm:$0xff] }
 0xe95   :  { %v1827_v36 = vadd.f32 1.0, %v4452_v33  ;;  %v5126_v9 = vpack.c.bf16 %v2099_v7, %v2097_v6 }
 0xe96   :  { %1836 = vrot.lane.b32.xlu0 %v1834_v8, %s4654_s3  ;;  %v2096_v8 = vld [vmem:[#allocation10] sm:$0xff] }
 0xe97   :  { %4453 = vrcp.f32 %v1827_v36  ;;  %4200 = vmatprep.subr.bf16.mxu0 %v5126_v9 }
 0xe9a   :  { %637 = vrot.lane.b32.xlu0 %v624_v13, %s4655_s14 }
 0xe9e   :  { %1057 = vrot.lane.b32.xlu0 %v1044_v19, %s4655_s14 }
 0xea1   :  { %v4454_v21 = vpop.eup %4453 }
 0xea2   :  { %1469 = vrot.lane.b32.xlu0 %v1456_v52, %s4655_s14 }
 0xea6   :  { %639 = vrot.lane.b32.xlu0 %v628_v12, %s4655_s14 }
 0xeaa   :  { %1059 = vrot.lane.b32.xlu0 %v1048_v26, %s4655_s14 }
 0xeae   :  { %1471 = vrot.lane.b32.xlu0 %v5098_v30, %s4655_s14 }
 0xeb2   :  { %629 = vrot.lane.b32.xlu0 %v624_v13, %s4654_s3  ;;  %v2101_v13 = vld [vmem:[#allocation10 + $0x28] sm:$0xff] }
 0xeb3   :  { %v5130_v18 = vpack.c.bf16 %v2103_v17, %v2101_v13 }
 0xeb6   :  { %1049 = vrot.lane.b32.xlu0 %v1044_v19, %s4654_s3  ;;  %v5128_v19 = vpack.c.bf16 %v2098_v10, %v2096_v8 }
 0xeb8   :  { %4202 = vmatpush1.bf16.msra.mxu0 %v5128_v19 }
 0xeb9   :  { %4204 = vmatprep.subr.bf16.mxu0 %v5130_v18 }
 0xeba   :  { %1461 = vrot.lane.b32.xlu0 %v1456_v52, %s4654_s3  ;;  %v2102_v52 = vld [vmem:[#allocation10 + $0x30] sm:$0xff] }
 0xebb   :  { %v5135_v11 = vpack.c.bf16 %v2102_v52, %v2100_v20 }
 0xebd   :  { %4206 = vmatpush1.bf16.msra.mxu0 %v5135_v11 }
 0xebe   :  { %631 = vrot.lane.b32.xlu0 %v628_v12, %s4654_s3  ;;  %v2107_v12 = vld [vmem:[#allocation10 + $0x58] sm:$0xff] }
 0xebf   :  { %v5139_v25 = vpack.c.bf16 %v2107_v12, %v2105_v23 }
 0xec1   :  { %4208 = vmatprep.subr.bf16.mxu0 %v5139_v25 }
 0xec2   :  { %1051 = vrot.lane.b32.xlu0 %v1048_v26, %s4654_s3  ;;  %v2104_v26 = vld [vmem:[#allocation10 + $0x40] sm:$0xff] }
 0xec3   :  { %v5143_v36 = vpack.c.bf16 %v2106_v27, %v2104_v26 }
 0xec5   :  { %4210 = vmatpush1.bf16.msra.mxu0 %v5143_v36 }
 0xf08   :  { %v1837_v39 = vpop.permute.xlu0 %1836 }
 0xf09   :  { %v1839_v42 = vadd.f32 %v1837_v39, %v1833_v38  ;;  %v2108_v39 = vld [vmem:[#allocation10 + $0x60] sm:$0xff] }
 0xf0b   :  { %4455 = vtanh.f32 %v1839_v42  ;;  %v2110_v42 = vld [vmem:[#allocation10 + $0x70] sm:$0xff] }
 0xf0c   :  { %v638_v43 = vpop.permute.xlu0 %637 }
 0xf0d   :  { %643 = vst.msk [vmem:[#allocation4 + $0x6] sm:$0x1] %vm424_vm4, %v638_v43 }
 0xf10   :  { %v1058_v44 = vpop.permute.xlu0 %1057 }
 0xf11   :  { %1063 = vst.msk [vmem:[#allocation4 + $0x4] sm:$0x1] %vm424_vm4, %v1058_v44  ;;  %v5150_v44 = vpack.c.bf16 %v2110_v42, %v2108_v39 }
 0xf14   :  { %v1470_v22 = vpop.permute.xlu0 %1469 }
 0xf15   :  { %v4456_v51 = vpop.eup %4455  ;;  %1475 = vst.msk [vmem:[#allocation4 + $0x2] sm:$0x1] %vm424_vm4, %v1470_v22  ;;  %v4195_v22 = vpack.c.bf16 %v1900_v16, %v1898_v48 }
 0xf16   :  { %v1841_v32 = vmul.f32 %v4456_v51, %v4454_v21  ;;  %v4193_v21 = vpack.c.bf16 %v1895_v47, %v1893_v46  ;;  %v1897_v51 = vld [vmem:[#allocation8 + $0x20] sm:$0xff] }
 0xf18   :  { %v640_v56 = vpop.permute.xlu0 %639  ;;  %v1849_v57 = vrot.slane %v1841_v32, %v4842_v54  ;;  %v4197_v32 = vpack.c.bf16 %v1899_v28, %v1897_v51 }
 0xf19   :  { %644 = vst.msk [vmem:[#allocation4 + $0xe] sm:$0x1] %vm424_vm4, %v640_v56 }
 0xf1a   :  { %v1857_v60 = vrot.slane %v1849_v57, %v4842_v54  ;;  %v1850_v63 = vcombine.high %v1849_v57, %v1849_v57 }
 0xf1c   :  { %v1060_v62 = vpop.permute.xlu0 %1059  ;;  %v1868_v40 = vrot.slane %v1857_v60, %v4832_v35  ;;  %v1864_v2 = vrot.slane %v1850_v63, %v4842_v54  ;;  %v2076_v60 = vld [vmem:[%s5519_s6] sm:$0x3] }
 0xf1d   :  { %1064 = vst.msk [vmem:[#allocation4 + $0xc] sm:$0x1] %vm424_vm4, %v1060_v62  ;;  %v2081_v61 = vrot.slane %v2076_v60, %v4832_v35  ;;  %v2085_v62 = vrot.slane %v2076_v60, %v117_v37 }
 0xf1e   :  { %1881 = vrot.lane.b32.xlu0 %v1868_v40, %s4655_s14  ;;  %v1872_v41 = vrot.slane %v1864_v2, %v4832_v35 }
 0xf20   :  { %v1472_v3 = vpop.permute.xlu0 %1471 }
 0xf21   :  { %1476 = vst.msk [vmem:[#allocation4 + $0xa] sm:$0x1] %vm424_vm4, %v1472_v3 }
 0xf22   :  { %1873 = vrot.lane.b32.xlu0 %v1868_v40, %s4654_s3 }
 0xf24   :  { %v630_v4 = vpop.permute.xlu0 %629 }
 0xf25   :  { %635 = vst.msk [vmem:[#allocation3 + $0x1] sm:$0x1] %vm424_vm4, %v630_v4 }
 0xf26   :  { %1883 = vrot.lane.b32.xlu0 %v1872_v41, %s4655_s14 }
 0xf28   :  { %v1050_v5 = vpop.permute.xlu0 %1049 }
 0xf29   :  { %1055 = vst.msk [vmem:[#allocation3 + $0x3] sm:$0x1] %vm424_vm4, %v1050_v5 }
 0xf2a   :  { %1463 = vrot.lane.b32.xlu0 %v5098_v30, %s4654_s3  ;;  %v2109_v30 = vld [vmem:[#allocation10 + $0x68] sm:$0xff] }
 0xf2b   :  { %v5146_v38 = vpack.c.bf16 %v2111_v31, %v2109_v30 }
 0xf2c   :  { %v1462_v24 = vpop.permute.xlu0 %1461 }
 0xf2d   :  { %1467 = vst.msk [vmem:[#allocation3 + $0x5] sm:$0x1] %vm424_vm4, %v1462_v24  ;;  %4212 = vmatprep.subr.bf16.mxu0 %v5146_v38 }
 0xf2e   :  { %1875 = vrot.lane.b32.xlu0 %v1872_v41, %s4654_s3  ;;  %4214 = vmatpush1.bf16.msra.mxu0 %v5150_v44 }
 0xf2f   :  { %4232 = vmatprep.subr.bf16.mxu0 %v5126_v9 }
 0xf30   :  { %v632_v33 = vpop.permute.xlu0 %631 }
 0xf31   :  { %636 = vst.msk [vmem:[#allocation3 + $0x9] sm:$0x1] %vm424_vm4, %v632_v33  ;;  %2237 = vmatmul.mubr.f32.vlgmr.msra.gmra.mrb[12].mxu0 %v4652_v0 }
 0xf32   :  { %4234 = vmatpush1.bf16.msra.mxu0 %v5128_v19  ;;  %2648 = vmatprep.mubr.f32.mxu0 %v4652_v0 }
 0xf33   :  { %4236 = vmatprep.subr.bf16.mxu0 %v5130_v18 }
 0xf34   :  { %v1052_v43 = vpop.permute.xlu0 %1051 }
 0xf35   :  { %1056 = vst.msk [vmem:[#allocation3 + $0xb] sm:$0x1] %vm424_vm4, %v1052_v43 }
 0xf36   :  { %4238 = vmatpush1.bf16.msra.mxu0 %v5135_v11 }
 0xf37   :  { %4240 = vmatprep.subr.bf16.mxu0 %v5139_v25 }
 0xf3a   :  { %4242 = vmatpush1.bf16.msra.mxu0 %v5143_v36 }
 0xf3b   :  { %4244 = vmatprep.subr.bf16.mxu0 %v5146_v38 }
 0xf3e   :  { %4246 = vmatpush1.bf16.msra.mxu0 %v5150_v44 }
 0xf3f   :  { %4264 = vmatprep.subr.bf16.mxu0 %v5126_v9 }
 0xf90   :  { %v1882_v45 = vpop.permute.xlu0 %1881 }
 0xf91   :  { %1887 = vst.msk [vmem:[#allocation4] sm:$0x1] %vm424_vm4, %v1882_v45 }
 0xf94   :  { %v1874_v15 = vpop.permute.xlu0 %1873 }
 0xf95   :  { %1879 = vst.msk [vmem:[#allocation3 + $0x7] sm:$0x1] %vm424_vm4, %v1874_v15 }
 0xf98   :  { %v1884_v29 = vpop.permute.xlu0 %1883  ;;  %v1891_v49 = vld [vmem:[#allocation4] sm:$0xff] }
 0xf99   :  { %1888 = vst.msk [vmem:[#allocation4 + $0x8] sm:$0x1] %vm424_vm4, %v1884_v29  ;;  %3985 = vmatmul.mubr.msk.f32.vlgmr.msra.gmra.mrb[8].mxu1 %vm1909_vm5, %v1891_v49 }
 0xf9a   :  { %4194 = vmatpush1.bf16.msra.mxu1 %v4193_v21  ;;  %1986 = vmatprep.mubr.f32.mxu1 %v4652_v0 }
 0xf9b   :  { %4196 = vmatprep.subr.bf16.mxu1 %v4195_v22 }
 0xf9c   :  { %v1464_v50 = vpop.permute.xlu0 %1463  ;;  %v1889_v56 = vld [vmem:[#allocation3] sm:$0xff] }
 0xf9d   :  { %1468 = vst.msk [vmem:[#allocation3 + $0xd] sm:$0x1] %vm424_vm4, %v1464_v50 }
 0xf9e   :  { %4198 = vmatpush1.bf16.msra.mxu1 %v4197_v32 }
 0xf9f   :  { %4216 = vmatprep.subr.bf16.mxu1 %v5126_v9 }
 0xfa0   :  { %v1876_v53 = vpop.permute.xlu0 %1875  ;;  %v1892_v55 = vld [vmem:[#allocation4 + $0x8] sm:$0xff] }
 0xfa1   :  { %1880 = vst.msk [vmem:[#allocation3 + $0xf] sm:$0x1] %vm424_vm4, %v1876_v53  ;;  %3986 = vmatmul.mubr.msk.f32.gmra.mrb[10].mxu1 %vm1909_vm5, %v1892_v55 }
 0xfa2   :  { %2063 = vmatprep.mubr.f32.mxu1 %v4652_v0 }
 0xfa5   :  { %3987 = vmatmul.mubr.msk.f32.vlgmr.msra.gmra.mrb[8].mxu1 %vm1909_vm5, %v1889_v56 }
 0xfa6   :  { %2069 = vmatprep.mubr.f32.mxu1 %v4652_v0  ;;  %4218 = vmatpush1.bf16.msra.mxu1 %v5128_v19 }
 0xfa7   :  { %4220 = vmatprep.subr.bf16.mxu1 %v5130_v18 }
 0xfa8   :  { %v1890_v57 = vld [vmem:[#allocation3 + $0x8] sm:$0xff] }
 0xfa9   :  { %3988 = vmatmul.mubr.msk.f32.gmra.mrb[10].mxu1 %vm1909_vm5, %v1890_v57 }
 0xfaa   :  { %4222 = vmatpush1.bf16.msra.mxu1 %v5135_v11  ;;  %2442 = vmatprep.mubr.f32.mxu1 %v4652_v0 }
 0xfab   :  { %4224 = vmatprep.subr.bf16.mxu1 %v5139_v25 }
 0xfae   :  { %4226 = vmatpush1.bf16.msra.mxu1 %v5143_v36 }
 0xfaf   :  { %4228 = vmatprep.subr.bf16.mxu1 %v5146_v38 }
 0xfb2   :  { %4230 = vmatpush1.bf16.msra.mxu1 %v5150_v44 }
 0xfb3   :  { %4248 = vmatprep.subr.bf16.mxu1 %v5126_v9 }
0x1004   :  { %v2238_v58 = vpop.f32.mrb[12].mxu0 }
0x1005   :  { %v2240_v59 = vpop.f32.mrb[13].mxu0 }
0x1078   :  { %v2065_v40 = vpop.f32.mrb[8].mxu1 }
0x1079   :  { %v2088_v63 = vadd.f32 %v2081_v61, %v2065_v40  ;;  %v2067_v3 = vpop.f32.mrb[9].mxu1 }
0x107a   :  { %v2089_v2 = vadd.f32 %v2085_v62, %v2067_v3 }
0x107b   :  { %2092 = vst [vmem:[#allocation2] sm:$0xff] %v2088_v63 }
0x107c   :  { %2093 = vst [vmem:[#allocation2 + $0x8] sm:$0xff] %v2089_v2  ;;  %v2071_v4 = vpop.f32.mrb[10].mxu1 }
0x107d   :  { %v2090_v41 = vadd.f32 %v2081_v61, %v2071_v4  ;;  %v2073_v5 = vpop.f32.mrb[11].mxu1 }
0x107e   :  { %v2091_v6 = vadd.f32 %v2085_v62, %v2073_v5 }
0x107f   :  { %2094 = vst [vmem:[#allocation2 + $0x10] sm:$0xff] %v2090_v41 }
0x1080   :  { %2095 = vst [vmem:[#allocation2 + $0x18] sm:$0xff] %v2091_v6 }
0x1083   :  { %v2112_v7 = vld [vmem:[#allocation2] ss:$8 sm:$0x3]  ;;  %v2114_v8 = vld [vmem:[#allocation2 + $0x7] ss:$8 sm:$0x3] }
0x1084   :  { %v2314_v56 = vld [vmem:[#allocation2 + $0x1] ss:$8 sm:$0x3]  ;;  %v2316_v57 = vld [vmem:[#allocation2 + $0x6] ss:$8 sm:$0x3] }
0x1087   :  { %v2113_v10 = vld [vmem:[#allocation2 + $0x10] ss:$8 sm:$0x3]  ;;  %v2115_v13 = vld [vmem:[#allocation2 + $0x17] ss:$8 sm:$0x3] }
0x1088   :  { %v2118_v17 = vcombine.low %v2112_v7, %v2113_v10  ;;  %v2145_v20 = vcombine.low %v2114_v8, %v2115_v13  ;;  %v2315_v53 = vld [vmem:[#allocation2 + $0x11] ss:$8 sm:$0x3]  ;;  %v2317_v55 = vld [vmem:[#allocation2 + $0x16] ss:$8 sm:$0x3] }
0x108a   :  { %v2125_v34 = vrot.slane %v2118_v17, %v4842_v54  ;;  %v2152_v37 = vrot.slane %v2145_v20, %v4842_v54 }
0x108c   :  { %v2133_v52 = vrot.slane %v2125_v34, %v4842_v54  ;;  %v2160_v23 = vrot.slane %v2152_v37, %v4842_v54  ;;  %v2126_v26 = vcombine.high %v2125_v34, %v2125_v34  ;;  %v2153_v27 = vcombine.high %v2152_v37, %v2152_v37 }
0x108e   :  { %v2170_v24 = vsel %vm4846_vm1, %v2133_v52, %v2160_v23  ;;  %v2140_v31 = vrot.slane %v2126_v26, %v4842_v54  ;;  %v2167_v33 = vrot.slane %v2153_v27, %v4842_v54 }
0x108f   :  { %v2243_v12 = vadd.f32 %v2238_v58, %v2170_v24  ;;  %v2320_v58 = vcombine.low %v2314_v56, %v2315_v53 }
0x1090   :  { %v2171_v39 = vsel %vm4856_vm2, %v2140_v31, %v2167_v33 }
0x1091   :  { %v3989_v30 = vmul.f32 -1.442695, %v2243_v12  ;;  %v2244_v42 = vadd.f32 %v2240_v59, %v2171_v39  ;;  %v2347_v59 = vcombine.low %v2316_v57, %v2317_v55  ;;  %v2327_v60 = vrot.slane %v2320_v58, %v4842_v54 }
0x1093   :  { %4457 = vpow2.f32 %v3989_v30  ;;  %v3990_v48 = vmul.f32 -1.442695, %v2244_v42  ;;  %v2354_v61 = vrot.slane %v2347_v59, %v4842_v54  ;;  %v2335_v62 = vrot.slane %v2327_v60, %v4842_v54 }
0x1094   :  { %4459 = vtanh.f32 %v2244_v42  ;;  %v2328_v5 = vcombine.high %v2327_v60, %v2327_v60 }
0x1095   :  { %v2362_v40 = vrot.slane %v2354_v61, %v4842_v54  ;;  %v2355_v6 = vcombine.high %v2354_v61, %v2354_v61 }
0x1096   :  { %v2342_v7 = vrot.slane %v2328_v5, %v4842_v54 }
0x1097   :  { %v2372_v63 = vsel %vm4846_vm1, %v2335_v62, %v2362_v40  ;;  %v2369_v8 = vrot.slane %v2355_v6, %v4842_v54 }
0x1099   :  { %v2373_v10 = vsel %vm4856_vm2, %v2342_v7, %v2369_v8 }
0x109d   :  { %v4458_v43 = vpop.eup %4457 }
0x109e   :  { %v2251_v45 = vadd.f32 1.0, %v4458_v43  ;;  %v4460_v46 = vpop.eup %4459  ;;  %v2521_v43 = vld [vmem:[#allocation2 + $0x12] ss:$8 sm:$0x3] }
0x10a0   :  { %4461 = vrcp.f32 %v2251_v45  ;;  %v2523_v45 = vld [vmem:[#allocation2 + $0x15] ss:$8 sm:$0x3] }
0x10a1   :  { %4463 = vpow2.f32 %v3990_v48 }
0x10aa   :  { %v4462_v47 = vpop.eup %4461 }
0x10ab   :  { %v2259_v15 = vmul.f32 %v4462_v47, %v4460_v46  ;;  %v4464_v16 = vpop.eup %4463  ;;  %v2258_v22 = vmul.f32 0.0, %v4462_v47  ;;  %v2520_v46 = vld [vmem:[#allocation2 + $0x2] ss:$8 sm:$0x3] }
0x10ac   :  { %v2252_v21 = vadd.f32 1.0, %v4464_v16  ;;  %v2522_v47 = vld [vmem:[#allocation2 + $0x5] ss:$8 sm:$0x3] }
0x10ad   :  { %2261 = vrot.lane.b32.xlu1 %v2259_v15, %s4654_s3  ;;  %v2526_v15 = vcombine.low %v2520_v46, %v2521_v43  ;;  %v2553_v48 = vcombine.low %v2522_v47, %v2523_v45 }
0x10ae   :  { %4465 = vrcp.f32 %v2252_v21 }
0x10af   :  { %v2533_v16 = vrot.slane %v2526_v15, %v4842_v54  ;;  %v2560_v21 = vrot.slane %v2553_v48, %v4842_v54 }
0x10b1   :  { %v2534_v55 = vcombine.high %v2533_v16, %v2533_v16  ;;  %v2561_v56 = vcombine.high %v2560_v21, %v2560_v21 }
0x10b3   :  { %v2548_v57 = vrot.slane %v2534_v55, %v4842_v54  ;;  %v2575_v58 = vrot.slane %v2561_v56, %v4842_v54 }
0x10b5   :  { %v2579_v59 = vsel %vm4856_vm2, %v2548_v57, %v2575_v58 }
0x10b8   :  { %v4466_v29 = vpop.eup %4465 }
0x111f   :  { %v2262_v51 = vpop.permute.xlu1 %2261 }
0x1120   :  { %v2264_v28 = vadd.f32 %v2262_v51, %v2258_v22  ;;  %v2541_v22 = vrot.slane %v2533_v16, %v4842_v54  ;;  %v2568_v51 = vrot.slane %v2560_v21, %v4842_v54 }
0x1122   :  { %4467 = vtanh.f32 %v2264_v28 }
0x112c   :  { %v4468_v49 = vpop.eup %4467 }
0x112d   :  { %v5204_v32 = vmul.f32 %v4468_v49, %v4466_v29 }
0x112f   :  { %2374 = vrot.lane.b32.xlu0 %v5204_v32, %s4654_s3 }
0x11a1   :  { %v2375_v50 = vpop.permute.xlu0 %2374 }
0x11a2   :  { %3991 = vmatmul.mubr.msk.f32.vlgmr.msra.gmra.mrb[12].mxu1 %vm288_vm3, %v2375_v50 }
0x11a3   :  { %4250 = vmatpush1.bf16.msra.mxu1 %v5128_v19  ;;  %2854 = vmatprep.mubr.f32.mxu1 %v4652_v0 }
0x11a4   :  { %4252 = vmatprep.subr.bf16.mxu1 %v5130_v18 }
0x11a7   :  { %4254 = vmatpush1.bf16.msra.mxu1 %v5135_v11 }
0x11a8   :  { %4256 = vmatprep.subr.bf16.mxu1 %v5139_v25 }
0x11ab   :  { %4258 = vmatpush1.bf16.msra.mxu1 %v5143_v36 }
0x11ac   :  { %4260 = vmatprep.subr.bf16.mxu1 %v5146_v38 }
0x11af   :  { %4262 = vmatpush1.bf16.msra.mxu1 %v5150_v44 }
0x11b0   :  { %4280 = vmatprep.subr.bf16.mxu1 %v5126_v9 }
0x1275   :  { %v2444_v3 = vpop.f32.mrb[12].mxu1 }
0x1276   :  { %v2449_v2 = vadd.f32 %v2444_v3, %v2372_v63  ;;  %v2446_v4 = vpop.f32.mrb[13].mxu1 }
0x1277   :  { %v2450_v13 = vadd.f32 %v2446_v4, %v2373_v10 }
0x1278   :  { %v3992_v41 = vmul.f32 -1.442695, %v2449_v2 }
0x1279   :  { %v3993_v23 = vmul.f32 -1.442695, %v2450_v13 }
0x127a   :  { %4469 = vpow2.f32 %v3992_v41 }
0x127b   :  { %4471 = vtanh.f32 %v2450_v13 }
0x1284   :  { %v4470_v17 = vpop.eup %4469 }
0x1285   :  { %v2457_v20 = vadd.f32 1.0, %v4470_v17  ;;  %v4472_v34 = vpop.eup %4471 }
0x1287   :  { %4473 = vrcp.f32 %v2457_v20  ;;  %v2727_v20 = vld [vmem:[#allocation2 + $0x13] ss:$8 sm:$0x3] }
0x1288   :  { %4475 = vpow2.f32 %v3993_v23 }
0x1291   :  { %v4474_v37 = vpop.eup %4473 }
0x1292   :  { %v2465_v52 = vmul.f32 %v4474_v37, %v4472_v34  ;;  %v4476_v24 = vpop.eup %4475  ;;  %v2464_v26 = vmul.f32 %v4474_v37, %v2264_v28  ;;  %v2578_v28 = vsel %vm4846_vm1, %v2541_v22, %v2568_v51  ;;  %v2729_v34 = vld [vmem:[#allocation2 + $0x14] ss:$8 sm:$0x3]  ;;  %v2726_v37 = vld [vmem:[#allocation2 + $0x3] ss:$8 sm:$0x3] }
0x1293   :  { %v2458_v12 = vadd.f32 1.0, %v4476_v24  ;;  %v2732_v23 = vcombine.low %v2726_v37, %v2727_v20 }
0x1294   :  { %2467 = vrot.lane.b32.xlu1 %v2465_v52, %s4654_s3  ;;  %v2728_v52 = vld [vmem:[#allocation2 + $0x4] ss:$8 sm:$0x3] }
0x1295   :  { %4477 = vrcp.f32 %v2458_v12  ;;  %v2759_v24 = vcombine.low %v2728_v52, %v2729_v34  ;;  %v2739_v12 = vrot.slane %v2732_v23, %v4842_v54 }
0x1297   :  { %v2740_v45 = vcombine.high %v2739_v12, %v2739_v12 }
0x1299   :  { %v2754_v47 = vrot.slane %v2740_v45, %v4842_v54 }
0x129f   :  { %v4478_v31 = vpop.eup %4477 }
0x1306   :  { %v2468_v27 = vpop.permute.xlu1 %2467 }
0x1307   :  { %v2470_v30 = vadd.f32 %v2468_v27, %v2464_v26  ;;  %v2766_v26 = vrot.slane %v2759_v24, %v4842_v54  ;;  %v2747_v27 = vrot.slane %v2739_v12, %v4842_v54 }
0x1309   :  { %4479 = vtanh.f32 %v2470_v30  ;;  %v2767_v46 = vcombine.high %v2766_v26, %v2766_v26 }
0x130b   :  { %v2781_v15 = vrot.slane %v2767_v46, %v4842_v54 }
0x130d   :  { %v2785_v48 = vsel %vm4856_vm2, %v2754_v47, %v2781_v15 }
0x1313   :  { %v4480_v33 = vpop.eup %4479 }
0x1314   :  { %v5229_v39 = vmul.f32 %v4480_v33, %v4478_v31 }
0x1316   :  { %2580 = vrot.lane.b32.xlu0 %v5229_v39, %s4654_s3  ;;  %v2480_v1 = vrot.slane %v5229_v39, %v4842_v54 }
0x1388   :  { %v2581_v42 = vpop.permute.xlu0 %2580 }
0x1389   :  { %3994 = vmatmul.mubr.msk.f32.vlgmr.msra.gmra.mrb[14].mxu0 %vm288_vm3, %v2581_v42 }
0x138a   :  { %4266 = vmatpush1.bf16.msra.mxu0 %v5128_v19  ;;  %3060 = vmatprep.mubr.f32.mxu0 %v4652_v0 }
0x138b   :  { %4268 = vmatprep.subr.bf16.mxu0 %v5130_v18 }
0x138e   :  { %4270 = vmatpush1.bf16.msra.mxu0 %v5135_v11 }
0x138f   :  { %4272 = vmatprep.subr.bf16.mxu0 %v5139_v25 }
0x1392   :  { %4274 = vmatpush1.bf16.msra.mxu0 %v5143_v36 }
0x1393   :  { %4276 = vmatprep.subr.bf16.mxu0 %v5146_v38 }
0x1396   :  { %4278 = vmatpush1.bf16.msra.mxu0 %v5150_v44 }
0x1397   :  { %4296 = vmatprep.subr.bf16.mxu0 %v5126_v9 }
0x145c   :  { %v2650_v29 = vpop.f32.mrb[14].mxu0 }
0x145d   :  { %v2655_v49 = vadd.f32 %v2650_v29, %v2578_v28  ;;  %v2652_v50 = vpop.f32.mrb[15].mxu0 }
0x145e   :  { %v2656_v60 = vadd.f32 %v2652_v50, %v2579_v59 }
0x145f   :  { %v3995_v53 = vmul.f32 -1.442695, %v2655_v49 }
0x1460   :  { %v3996_v2 = vmul.f32 -1.442695, %v2656_v60 }
0x1461   :  { %4481 = vpow2.f32 %v3995_v53 }
0x1462   :  { %4483 = vtanh.f32 %v2656_v60 }
0x146b   :  { %v4482_v61 = vpop.eup %4481 }
0x146c   :  { %v2663_v62 = vadd.f32 1.0, %v4482_v61  ;;  %v4484_v40 = vpop.eup %4483 }
0x146e   :  { %4485 = vrcp.f32 %v2663_v62  ;;  %v2933_v62 = vld [vmem:[#allocation2 + $0x14] ss:$8 sm:$0x3] }
0x146f   :  { %4487 = vpow2.f32 %v3996_v2 }
0x1478   :  { %v4486_v63 = vpop.eup %4485 }
0x1479   :  { %v2671_v3 = vmul.f32 %v4486_v63, %v4484_v40  ;;  %v4488_v4 = vpop.eup %4487  ;;  %v2670_v5 = vmul.f32 %v4486_v63, %v2470_v30  ;;  %v2774_v30 = vrot.slane %v2766_v26, %v4842_v54  ;;  %v2935_v40 = vld [vmem:[#allocation2 + $0x13] ss:$8 sm:$0x3]  ;;  %v2932_v63 = vld [vmem:[#allocation2 + $0x4] ss:$8 sm:$0x3] }
0x147a   :  { %v2664_v41 = vadd.f32 1.0, %v4488_v4  ;;  %v2938_v2 = vcombine.low %v2932_v63, %v2933_v62 }
0x147b   :  { %2673 = vrot.lane.b32.xlu1 %v2671_v3, %s4654_s3  ;;  %v2784_v31 = vsel %vm4846_vm1, %v2747_v27, %v2774_v30  ;;  %v2934_v3 = vld [vmem:[#allocation2 + $0x3] ss:$8 sm:$0x3] }
0x147c   :  { %4489 = vrcp.f32 %v2664_v41  ;;  %v2965_v4 = vcombine.low %v2934_v3, %v2935_v40  ;;  %v2945_v41 = vrot.slane %v2938_v2, %v4842_v54 }
0x147e   :  { %v2946_v37 = vcombine.high %v2945_v41, %v2945_v41 }
0x1480   :  { %v2960_v23 = vrot.slane %v2946_v37, %v4842_v54 }
0x1486   :  { %v4490_v8 = vpop.eup %4489 }
0x14ed   :  { %v2674_v6 = vpop.permute.xlu1 %2673 }
0x14ee   :  { %v2676_v7 = vadd.f32 %v2674_v6, %v2670_v5  ;;  %v2972_v5 = vrot.slane %v2965_v4, %v4842_v54  ;;  %v2953_v6 = vrot.slane %v2945_v41, %v4842_v54 }
0x14f0   :  { %4491 = vtanh.f32 %v2676_v7  ;;  %v2973_v52 = vcombine.high %v2972_v5, %v2972_v5 }
0x14f2   :  { %v2987_v24 = vrot.slane %v2973_v52, %v4842_v54  ;;  %v3345_v52 = vld [vmem:[#allocation2 + $0x16] ss:$8 sm:$0x3] }
0x14f4   :  { %v2991_v12 = vsel %vm4856_vm2, %v2960_v23, %v2987_v24  ;;  %v3347_v23 = vld [vmem:[#allocation2 + $0x11] ss:$8 sm:$0x3]  ;;  %v3344_v24 = vld [vmem:[#allocation2 + $0x6] ss:$8 sm:$0x3] }
0x14fa   :  { %v4492_v10 = vpop.eup %4491 }
0x14fb   :  { %v5254_v13 = vmul.f32 %v4492_v10, %v4490_v8 }
0x14fd   :  { %2786 = vrot.lane.b32.xlu0 %v5254_v13, %s4654_s3 }
0x156f   :  { %v2787_v17 = vpop.permute.xlu0 %2786 }
0x1570   :  { %3997 = vmatmul.mubr.msk.f32.vlgmr.msra.gmra.mrb[14].mxu1 %vm288_vm3, %v2787_v17 }
0x1571   :  { %4282 = vmatpush1.bf16.msra.mxu1 %v5128_v19  ;;  %3266 = vmatprep.mubr.f32.mxu1 %v4652_v0 }
0x1572   :  { %4284 = vmatprep.subr.bf16.mxu1 %v5130_v18 }
0x1575   :  { %4286 = vmatpush1.bf16.msra.mxu1 %v5135_v11 }
0x1576   :  { %4288 = vmatprep.subr.bf16.mxu1 %v5139_v25 }
0x1579   :  { %4290 = vmatpush1.bf16.msra.mxu1 %v5143_v36 }
0x157a   :  { %4292 = vmatprep.subr.bf16.mxu1 %v5146_v38 }
0x157d   :  { %4294 = vmatpush1.bf16.msra.mxu1 %v5150_v44 }
0x157e   :  { %4312 = vmatprep.subr.bf16.mxu1 %v5126_v9 }
0x1643   :  { %v2856_v33 = vpop.f32.mrb[14].mxu1 }
0x1644   :  { %v2861_v42 = vadd.f32 %v2856_v33, %v2784_v31  ;;  %v2858_v9 = vpop.f32.mrb[15].mxu1 }
0x1645   :  { %v2862_v16 = vadd.f32 %v2858_v9, %v2785_v48 }
0x1646   :  { %v3998_v43 = vmul.f32 -1.442695, %v2861_v42 }
0x1647   :  { %v3999_v49 = vmul.f32 -1.442695, %v2862_v16 }
0x1648   :  { %4493 = vpow2.f32 %v3998_v43 }
0x1649   :  { %4495 = vtanh.f32 %v2862_v16 }
0x1652   :  { %v4494_v21 = vpop.eup %4493 }
0x1653   :  { %v2869_v22 = vadd.f32 1.0, %v4494_v21  ;;  %v4496_v51 = vpop.eup %4495 }
0x1655   :  { %4497 = vrcp.f32 %v2869_v22 }
0x1656   :  { %4499 = vpow2.f32 %v3999_v49  ;;  %v3140_v49 = vld [vmem:[#allocation2 + $0x2] ss:$8 sm:$0x3] }
0x165f   :  { %v4498_v28 = vpop.eup %4497 }
0x1660   :  { %v2877_v29 = vmul.f32 %v4498_v28, %v4496_v51  ;;  %v4500_v50 = vpop.eup %4499  ;;  %v2876_v55 = vmul.f32 %v4498_v28, %v2676_v7  ;;  %v2980_v7 = vrot.slane %v2972_v5, %v4842_v54  ;;  %v3139_v51 = vld [vmem:[#allocation2 + $0x15] ss:$8 sm:$0x3]  ;;  %v3141_v28 = vld [vmem:[#allocation2 + $0x12] ss:$8 sm:$0x3] }
0x1661   :  { %v2870_v53 = vadd.f32 1.0, %v4500_v50 }
0x1662   :  { %2879 = vrot.lane.b32.xlu1 %v2877_v29, %s4654_s3  ;;  %v2990_v8 = vsel %vm4846_vm1, %v2953_v6, %v2980_v7  ;;  %v3138_v29 = vld [vmem:[#allocation2 + $0x5] ss:$8 sm:$0x3] }
0x1663   :  { %4501 = vrcp.f32 %v2870_v53  ;;  %v3144_v50 = vcombine.low %v3138_v29, %v3139_v51 }
0x166d   :  { %v4502_v58 = vpop.eup %4501 }
0x16d4   :  { %v2880_v56 = vpop.permute.xlu1 %2879 }
0x16d5   :  { %v2882_v57 = vadd.f32 %v2880_v56, %v2876_v55 }
0x16d7   :  { %4503 = vtanh.f32 %v2882_v57 }
0x16e1   :  { %v4504_v59 = vpop.eup %4503 }
0x16e2   :  { %v5279_v60 = vmul.f32 %v4504_v59, %v4502_v58 }
0x16e4   :  { %2992 = vrot.lane.b32.xlu0 %v5279_v60, %s4654_s3 }
0x1756   :  { %v2993_v61 = vpop.permute.xlu0 %2992 }
0x1757   :  { %4000 = vmatmul.mubr.msk.f32.vlgmr.msra.gmra.mrb[16].mxu0 %vm288_vm3, %v2993_v61 }
0x1758   :  { %4298 = vmatpush1.bf16.msra.mxu0 %v5128_v19  ;;  %3472 = vmatprep.mubr.f32.mxu0 %v4652_v0 }
0x1759   :  { %4300 = vmatprep.subr.bf16.mxu0 %v5130_v18 }
0x175c   :  { %4302 = vmatpush1.bf16.msra.mxu0 %v5135_v11 }
0x175d   :  { %4304 = vmatprep.subr.bf16.mxu0 %v5139_v25 }
0x1760   :  { %4306 = vmatpush1.bf16.msra.mxu0 %v5143_v36 }
0x1761   :  { %4308 = vmatprep.subr.bf16.mxu0 %v5146_v38 }
0x1764   :  { %4310 = vmatpush1.bf16.msra.mxu0 %v5150_v44 }
0x182a   :  { %v3062_v10 = vpop.f32.mrb[16].mxu0 }
0x182b   :  { %v3067_v17 = vadd.f32 %v3062_v10, %v2990_v8  ;;  %v3064_v20 = vpop.f32.mrb[17].mxu0 }
0x182c   :  { %v3068_v26 = vadd.f32 %v3064_v20, %v2991_v12  ;;  %v3346_v12 = vld [vmem:[#allocation2 + $0x1] ss:$8 sm:$0x3] }
0x182d   :  { %v4001_v34 = vmul.f32 -1.442695, %v3067_v17 }
0x182e   :  { %v4002_v9 = vmul.f32 -1.442695, %v3068_v26 }
0x182f   :  { %4505 = vpow2.f32 %v4001_v34 }
0x1830   :  { %4507 = vtanh.f32 %v3068_v26  ;;  %v3350_v26 = vcombine.low %v3344_v24, %v3345_v52 }
0x1839   :  { %v4506_v27 = vpop.eup %4505 }
0x183a   :  { %v3075_v30 = vadd.f32 1.0, %v4506_v27  ;;  %v4508_v31 = vpop.eup %4507  ;;  %v3377_v27 = vcombine.low %v3346_v12, %v3347_v23 }
0x183c   :  { %4509 = vrcp.f32 %v3075_v30  ;;  %v3357_v30 = vrot.slane %v3350_v26, %v4842_v54 }
0x183d   :  { %4511 = vpow2.f32 %v4002_v9 }
0x1846   :  { %v4510_v33 = vpop.eup %4509 }
0x1847   :  { %v3083_v42 = vmul.f32 %v4510_v33, %v4508_v31  ;;  %v4512_v43 = vpop.eup %4511  ;;  %v3082_v46 = vmul.f32 %v4510_v33, %v2882_v57  ;;  %v3384_v31 = vrot.slane %v3377_v27, %v4842_v54  ;;  %v3365_v33 = vrot.slane %v3357_v30, %v4842_v54 }
0x1848   :  { %v3076_v45 = vadd.f32 1.0, %v4512_v43 }
0x1849   :  { %3085 = vrot.lane.b32.xlu1 %v3083_v42, %s4654_s3  ;;  %v3392_v42 = vrot.slane %v3384_v31, %v4842_v54 }
0x184a   :  { %4513 = vrcp.f32 %v3076_v45 }
0x184b   :  { %v3402_v9 = vsel %vm4846_vm1, %v3365_v33, %v3392_v42 }
0x1854   :  { %v4514_v48 = vpop.eup %4513 }
0x18bb   :  { %v3086_v47 = vpop.permute.xlu1 %3085 }
0x18bc   :  { %v3088_v15 = vadd.f32 %v3086_v47, %v3082_v46 }
0x18be   :  { %4515 = vtanh.f32 %v3088_v15 }
0x18c8   :  { %v4516_v16 = vpop.eup %4515 }
0x18c9   :  { %v5303_v21 = vmul.f32 %v4516_v16, %v4514_v48  ;;  %v3385_v48 = vcombine.high %v3384_v31, %v3384_v31 }
0x18cb   :  { %3198 = vrot.lane.b32.xlu0 %v5303_v21, %s4654_s3 }
0x193d   :  { %v3199_v22 = vpop.permute.xlu0 %3198 }
0x193e   :  { %4003 = vmatmul.mubr.msk.f32.vlgmr.msra.gmra.mrb[16].mxu1 %vm288_vm3, %v3199_v22  ;;  %v3399_v22 = vrot.slane %v3385_v48, %v4842_v54 }
0x193f   :  { %4314 = vmatpush1.bf16.msra.mxu1 %v5128_v19  ;;  %3678 = vmatprep.mubr.f32.mxu1 %v4652_v0  ;;  %v3171_v19 = vcombine.low %v3140_v49, %v3141_v28  ;;  %v3151_v0 = vrot.slane %v3144_v50, %v4842_v54 }
0x1940   :  { %4316 = vmatprep.subr.bf16.mxu1 %v5130_v18 }
0x1941   :  { %v3178_v18 = vrot.slane %v3171_v19, %v4842_v54  ;;  %v3152_v56 = vcombine.high %v3151_v0, %v3151_v0 }
0x1943   :  { %4318 = vmatpush1.bf16.msra.mxu1 %v5135_v11  ;;  %v3159_v11 = vrot.slane %v3151_v0, %v4842_v54  ;;  %v3179_v57 = vcombine.high %v3178_v18, %v3178_v18  ;;  %v3166_v58 = vrot.slane %v3152_v56, %v4842_v54 }
0x1944   :  { %4320 = vmatprep.subr.bf16.mxu1 %v5139_v25  ;;  %v3186_v25 = vrot.slane %v3178_v18, %v4842_v54 }
0x1945   :  { %v3193_v59 = vrot.slane %v3179_v57, %v4842_v54  ;;  %v2686_v57 = vrot.slane %v5254_v13, %v4842_v54 }
0x1947   :  { %4322 = vmatpush1.bf16.msra.mxu1 %v5143_v36  ;;  %v3196_v36 = vsel %vm4846_vm1, %v3159_v11, %v3186_v25  ;;  %v3197_v61 = vsel %vm4856_vm2, %v3166_v58, %v3193_v59 }
0x1948   :  { %4324 = vmatprep.subr.bf16.mxu1 %v5146_v38 }
0x194b   :  { %4326 = vmatpush1.bf16.msra.mxu1 %v5150_v44 }
0x1a11   :  { %v3268_v38 = vpop.f32.mrb[16].mxu1 }
0x1a12   :  { %v3273_v53 = vadd.f32 %v3268_v38, %v3196_v36  ;;  %v3270_v44 = vpop.f32.mrb[17].mxu1 }
0x1a13   :  { %v3274_v62 = vadd.f32 %v3270_v44, %v3197_v61  ;;  %v2274_v44 = vrot.slane %v5204_v32, %v4842_v54  ;;  %v3098_v61 = vrot.slane %v5303_v21, %v4842_v54 }
0x1a14   :  { %v4004_v55 = vmul.f32 -1.442695, %v3273_v53 }
0x1a15   :  { %v4005_v41 = vmul.f32 -1.442695, %v3274_v62  ;;  %v2282_v59 = vrot.slane %v2274_v44, %v4842_v54  ;;  %v3106_v13 = vrot.slane %v3098_v61, %v4842_v54 }
0x1a16   :  { %4517 = vpow2.f32 %v4004_v55 }
0x1a17   :  { %4519 = vtanh.f32 %v3274_v62  ;;  %v2293_v62 = vrot.slane %v2282_v59, %v4832_v35 }
0x1a20   :  { %v4518_v40 = vpop.eup %4517 }
0x1a21   :  { %v3281_v63 = vadd.f32 1.0, %v4518_v40  ;;  %v4520_v3 = vpop.eup %4519  ;;  %v2694_v40 = vrot.slane %v2686_v57, %v4842_v54 }
0x1a23   :  { %4521 = vrcp.f32 %v3281_v63  ;;  %v2705_v63 = vrot.slane %v2694_v40, %v4832_v35 }
0x1a24   :  { %4523 = vpow2.f32 %v4005_v41 }
0x1a2d   :  { %v4522_v2 = vpop.eup %4521 }
0x1a2e   :  { %v3289_v4 = vmul.f32 %v4522_v2, %v4520_v3  ;;  %v4524_v5 = vpop.eup %4523  ;;  %v3288_v7 = vmul.f32 %v4522_v2, %v3088_v15  ;;  %v3358_v15 = vcombine.high %v3357_v30, %v3357_v30  ;;  %v3117_v3 = vrot.slane %v3106_v13, %v4832_v35 }
0x1a2f   :  { %v3282_v6 = vadd.f32 1.0, %v4524_v5  ;;  %v2687_v5 = vcombine.high %v2686_v57, %v2686_v57 }
0x1a30   :  { %3291 = vrot.lane.b32.xlu1 %v3289_v4, %s4654_s3  ;;  %v3372_v16 = vrot.slane %v3358_v15, %v4842_v54  ;;  %v2275_v4 = vcombine.high %v2274_v44, %v2274_v44 }
0x1a31   :  { %4525 = vrcp.f32 %v3282_v6 }
0x1a32   :  { %v3403_v51 = vsel %vm4856_vm2, %v3372_v16, %v3399_v22  ;;  %v2289_v41 = vrot.slane %v2275_v4, %v4842_v54 }
0x1a34   :  { %v2297_v6 = vrot.slane %v2289_v41, %v4832_v35 }
0x1a3b   :  { %v4526_v17 = vpop.eup %4525 }
0x1aa2   :  { %v3292_v8 = vpop.permute.xlu1 %3291 }
0x1aa3   :  { %v3294_v10 = vadd.f32 %v3292_v8, %v3288_v7  ;;  %v2701_v7 = vrot.slane %v2687_v5, %v4842_v54  ;;  %v3099_v8 = vcombine.high %v3098_v61, %v3098_v61 }
0x1aa5   :  { %4527 = vtanh.f32 %v3294_v10 }
0x1aaf   :  { %v4528_v20 = vpop.eup %4527 }
0x1ab0   :  { %v5327_v34 = vmul.f32 %v4528_v20, %v4526_v17  ;;  %v3113_v17 = vrot.slane %v3099_v8, %v4842_v54 }
0x1ab2   :  { %3404 = vrot.lane.b32.xlu0 %v5327_v34, %s4654_s3  ;;  %v3304_v14 = vrot.slane %v5327_v34, %v4842_v54 }
0x1b24   :  { %v3405_v37 = vpop.permute.xlu0 %3404 }
0x1b25   :  { %4006 = vmatmul.mubr.msk.f32.vlgmr.msra.gmra.mrb[18].mxu0 %vm288_vm3, %v3405_v37  ;;  %v3121_v37 = vrot.slane %v3113_v17, %v4832_v35 }
0x1bf8   :  { %v3474_v43 = vpop.f32.mrb[18].mxu0 }
0x1bf9   :  { %v3479_v45 = vadd.f32 %v3474_v43, %v3402_v9  ;;  %v3476_v46 = vpop.f32.mrb[19].mxu0 }
0x1bfa   :  { %v3480_v28 = vadd.f32 %v3476_v46, %v3403_v51  ;;  %v3551_v51 = vld [vmem:[#allocation2 + $0x17] ss:$8 sm:$0x3] }
0x1bfb   :  { %v4007_v47 = vmul.f32 -1.442695, %v3479_v45 }
0x1bfc   :  { %v4008_v18 = vmul.f32 -1.442695, %v3480_v28 }
0x1bfd   :  { %4529 = vpow2.f32 %v4007_v47 }
0x1bfe   :  { %4531 = vtanh.f32 %v3480_v28  ;;  %v3553_v28 = vld [vmem:[#allocation2 + $0x10] ss:$8 sm:$0x3] }
0x1c07   :  { %v4530_v29 = vpop.eup %4529 }
0x1c08   :  { %v3487_v49 = vadd.f32 1.0, %v4530_v29  ;;  %v4532_v50 = vpop.eup %4531  ;;  %v3550_v29 = vld [vmem:[#allocation2 + $0x7] ss:$8 sm:$0x3] }
0x1c0a   :  { %4533 = vrcp.f32 %v3487_v49  ;;  %v3552_v49 = vld [vmem:[#allocation2] ss:$8 sm:$0x3] }
0x1c0b   :  { %4535 = vpow2.f32 %v4008_v18 }
0x1c14   :  { %v4534_v19 = vpop.eup %4533 }
0x1c15   :  { %v3495_v0 = vmul.f32 %v4534_v19, %v4532_v50  ;;  %v4536_v11 = vpop.eup %4535  ;;  %v3494_v36 = vmul.f32 %v4534_v19, %v3294_v10  ;;  %v2709_v10 = vrot.slane %v2701_v7, %v4832_v35  ;;  %v3556_v50 = vcombine.low %v3550_v29, %v3551_v51  ;;  %v3767_v51 = vld [vmem:[%s5520_s7 + $0x38] sm:$0xff] }
0x1c16   :  { %v3488_v25 = vadd.f32 1.0, %v4536_v11  ;;  %v3583_v19 = vcombine.low %v3552_v49, %v3553_v28  ;;  %v2481_v7 = vcombine.high %v2480_v1, %v2480_v1 }
0x1c17   :  { %3497 = vrot.lane.b32.xlu1 %v3495_v0, %s4654_s3  ;;  %v3563_v0 = vrot.slane %v3556_v50, %v4842_v54 }
0x1c18   :  { %4537 = vrcp.f32 %v3488_v25  ;;  %v3590_v18 = vrot.slane %v3583_v19, %v4842_v54  ;;  %v2495_v8 = vrot.slane %v2481_v7, %v4842_v54 }
0x1c19   :  { %v3571_v11 = vrot.slane %v3563_v0, %v4842_v54  ;;  %v3564_v57 = vcombine.high %v3563_v0, %v3563_v0  ;;  %v3760_v0 = vld [vmem:[%s5520_s7] sm:$0xff] }
0x1c1a   :  { %v3598_v25 = vrot.slane %v3590_v18, %v4842_v54  ;;  %v2503_v34 = vrot.slane %v2495_v8, %v4832_v35 }
0x1c1b   :  { %v3578_v59 = vrot.slane %v3564_v57, %v4842_v54 }
0x1c22   :  { %v4538_v55 = vpop.eup %4537 }
0x1c89   :  { %v3498_v38 = vpop.permute.xlu1 %3497 }
0x1c8a   :  { %v5343_v53 = vadd.f32 %v3498_v38, %v3494_v36  ;;  %v3608_v36 = vsel %vm4846_vm1, %v3571_v11, %v3598_v25 }
0x1c8c   :  { %4539 = vtanh.f32 %v5343_v53 }
0x1c96   :  { %v4540_v56 = vpop.eup %4539 }
0x1c97   :  { %v3502_v58 = vmul.f32 %v4540_v56, %v4538_v55 }
0x1c99   :  { %3610 = vrot.lane.b32.xlu0 %v3502_v58, %s4654_s3  ;;  %v3510_v32 = vrot.slane %v3502_v58, %v4842_v54  ;;  %v3591_v58 = vcombine.high %v3590_v18, %v3590_v18  ;;  %v3761_v18 = vld [vmem:[%s5520_s7 + $0x8] sm:$0xff] }
0x1c9a   :  { %v4335_v11 = vpack.c.bf16 %v3761_v18, %v3760_v0 }
0x1c9b   :  { %v3518_v2 = vrot.slane %v3510_v32, %v4842_v54  ;;  %v3511_v20 = vcombine.high %v3510_v32, %v3510_v32  ;;  %v3605_v61 = vrot.slane %v3591_v58, %v4842_v54 }
0x1c9d   :  { %2306 = vrot.lane.b32.xlu0 %v2293_v62, %s4655_s14  ;;  %v3529_v21 = vrot.slane %v3518_v2, %v4832_v35  ;;  %v3525_v52 = vrot.slane %v3511_v20, %v4842_v54  ;;  %v2892_v2 = vrot.slane %v5279_v60, %v4842_v54  ;;  %v3305_v20 = vcombine.high %v3304_v14, %v3304_v14 }
0x1c9f   :  { %v3533_v23 = vrot.slane %v3525_v52, %v4832_v35  ;;  %v2900_v5 = vrot.slane %v2892_v2, %v4842_v54  ;;  %v3319_v52 = vrot.slane %v3305_v20, %v4842_v54 }
0x1ca1   :  { %2718 = vrot.lane.b32.xlu0 %v2705_v63, %s4655_s14  ;;  %v2911_v39 = vrot.slane %v2900_v5, %v4832_v35 }
0x1ca5   :  { %3130 = vrot.lane.b32.xlu0 %v3117_v3, %s4655_s14 }
0x1ca9   :  { %3542 = vrot.lane.b32.xlu0 %v3529_v21, %s4655_s14 }
0x1cad   :  { %2308 = vrot.lane.b32.xlu0 %v2297_v6, %s4655_s14 }
0x1cb1   :  { %2720 = vrot.lane.b32.xlu0 %v2709_v10, %s4655_s14 }
0x1cb5   :  { %3132 = vrot.lane.b32.xlu0 %v3121_v37, %s4655_s14 }
0x1cb9   :  { %3544 = vrot.lane.b32.xlu0 %v3533_v23, %s4655_s14 }
0x1cbd   :  { %2298 = vrot.lane.b32.xlu0 %v2293_v62, %s4654_s3  ;;  %v3609_v62 = vsel %vm4856_vm2, %v3578_v59, %v3605_v61 }
0x1cc1   :  { %2710 = vrot.lane.b32.xlu0 %v2705_v63, %s4654_s3 }
0x1cc5   :  { %3122 = vrot.lane.b32.xlu0 %v3117_v3, %s4654_s3 }
0x1cc9   :  { %3534 = vrot.lane.b32.xlu0 %v3529_v21, %s4654_s3  ;;  %v2488_v21 = vrot.slane %v2480_v1, %v4842_v54 }
0x1ccb   :  { %v2499_v41 = vrot.slane %v2488_v21, %v4832_v35 }
0x1ccd   :  { %2300 = vrot.lane.b32.xlu0 %v2297_v6, %s4654_s3  ;;  %v3312_v6 = vrot.slane %v3304_v14, %v4842_v54 }
0x1ccf   :  { %v3323_v60 = vrot.slane %v3312_v6, %v4832_v35 }
0x1cd1   :  { %2712 = vrot.lane.b32.xlu0 %v2709_v10, %s4654_s3  ;;  %v2893_v10 = vcombine.high %v2892_v2, %v2892_v2 }
0x1cd3   :  { %v2907_v17 = vrot.slane %v2893_v10, %v4842_v54 }
0x1cd5   :  { %3124 = vrot.lane.b32.xlu0 %v3121_v37, %s4654_s3  ;;  %v2915_v37 = vrot.slane %v2907_v17, %v4832_v35 }
0x1cd9   :  { %3536 = vrot.lane.b32.xlu0 %v3533_v23, %s4654_s3  ;;  %v3327_v23 = vrot.slane %v3319_v52, %v4832_v35 }
0x1d0b   :  { %v3611_v24 = vpop.permute.xlu0 %3610 }
0x1d0c   :  { %4009 = vmatmul.mubr.msk.f32.vlgmr.msra.gmra.mrb[18].mxu1 %vm288_vm3, %v3611_v24 }
0x1d0f   :  { %v2307_v12 = vpop.permute.xlu0 %2306 }
0x1d10   :  { %2312 = vst.msk [vmem:[#allocation4 + $0x7] sm:$0x1] %vm424_vm4, %v2307_v12 }
0x1d13   :  { %v2719_v26 = vpop.permute.xlu0 %2718 }
0x1d14   :  { %2724 = vst.msk [vmem:[#allocation4 + $0x5] sm:$0x1] %vm424_vm4, %v2719_v26 }
0x1d17   :  { %v3131_v27 = vpop.permute.xlu0 %3130 }
0x1d18   :  { %3136 = vst.msk [vmem:[#allocation4 + $0x3] sm:$0x1] %vm424_vm4, %v3131_v27 }
0x1d1b   :  { %v3543_v30 = vpop.permute.xlu0 %3542 }
0x1d1c   :  { %3548 = vst.msk [vmem:[#allocation4 + $0x1] sm:$0x1] %vm424_vm4, %v3543_v30 }
0x1d1f   :  { %v2309_v31 = vpop.permute.xlu0 %2308 }
0x1d20   :  { %2313 = vst.msk [vmem:[#allocation4 + $0xf] sm:$0x1] %vm424_vm4, %v2309_v31 }
0x1d23   :  { %v2721_v33 = vpop.permute.xlu0 %2720 }
0x1d24   :  { %2725 = vst.msk [vmem:[#allocation4 + $0xd] sm:$0x1] %vm424_vm4, %v2721_v33 }
0x1d27   :  { %v3133_v42 = vpop.permute.xlu0 %3132 }
0x1d28   :  { %3137 = vst.msk [vmem:[#allocation4 + $0xb] sm:$0x1] %vm424_vm4, %v3133_v42 }
0x1d2b   :  { %v3545_v9 = vpop.permute.xlu0 %3544 }
0x1d2c   :  { %3549 = vst.msk [vmem:[#allocation4 + $0x9] sm:$0x1] %vm424_vm4, %v3545_v9 }
0x1d2f   :  { %v2299_v43 = vpop.permute.xlu0 %2298 }
0x1d30   :  { %2304 = vst.msk [vmem:[#allocation3] sm:$0x1] %vm424_vm4, %v2299_v43 }
0x1d33   :  { %v2711_v45 = vpop.permute.xlu0 %2710 }
0x1d34   :  { %2716 = vst.msk [vmem:[#allocation3 + $0x2] sm:$0x1] %vm424_vm4, %v2711_v45 }
0x1d37   :  { %v3123_v46 = vpop.permute.xlu0 %3122 }
0x1d38   :  { %3128 = vst.msk [vmem:[#allocation3 + $0x4] sm:$0x1] %vm424_vm4, %v3123_v46  ;;  %v3764_v46 = vld [vmem:[%s5520_s7 + $0x20] sm:$0xff] }
0x1d3b   :  { %v3535_v47 = vpop.permute.xlu0 %3534 }
0x1d3c   :  { %3540 = vst.msk [vmem:[#allocation3 + $0x6] sm:$0x1] %vm424_vm4, %v3535_v47 }
0x1d3f   :  { %v2301_v15 = vpop.permute.xlu0 %2300 }
0x1d40   :  { %2305 = vst.msk [vmem:[#allocation3 + $0x8] sm:$0x1] %vm424_vm4, %v2301_v15 }
0x1d43   :  { %v2713_v48 = vpop.permute.xlu0 %2712 }
0x1d44   :  { %2717 = vst.msk [vmem:[#allocation3 + $0xa] sm:$0x1] %vm424_vm4, %v2713_v48 }
0x1d47   :  { %v3125_v16 = vpop.permute.xlu0 %3124 }
0x1d48   :  { %3129 = vst.msk [vmem:[#allocation3 + $0xc] sm:$0x1] %vm424_vm4, %v3125_v16 }
0x1d4b   :  { %v3537_v22 = vpop.permute.xlu0 %3536 }
0x1d4c   :  { %3541 = vst.msk [vmem:[#allocation3 + $0xe] sm:$0x1] %vm424_vm4, %v3537_v22  ;;  %v3766_v22 = vld [vmem:[%s5520_s7 + $0x30] sm:$0xff] }
0x1d4d   :  { %v4331_v29 = vpack.c.bf16 %v3767_v51, %v3766_v22 }
0x1ddf   :  { %v3680_v38 = vpop.f32.mrb[18].mxu1 }
0x1de0   :  { %v3685_v44 = vadd.f32 %v3680_v38, %v3608_v36  ;;  %v3682_v55 = vpop.f32.mrb[19].mxu1 }
0x1de1   :  { %v3686_v40 = vadd.f32 %v3682_v55, %v3609_v62 }
0x1de2   :  { %v4010_v56 = vmul.f32 -1.442695, %v3685_v44 }
0x1de3   :  { %v4011_v24 = vmul.f32 -1.442695, %v3686_v40 }
0x1de4   :  { %4541 = vpow2.f32 %v4010_v56 }
0x1de5   :  { %4543 = vtanh.f32 %v3686_v40  ;;  %v3762_v40 = vld [vmem:[%s5520_s7 + $0x10] sm:$0xff] }
0x1dee   :  { %v4542_v32 = vpop.eup %4541 }
0x1def   :  { %v3693_v63 = vadd.f32 1.0, %v4542_v32  ;;  %v4544_v13 = vpop.eup %4543  ;;  %v3763_v32 = vld [vmem:[%s5520_s7 + $0x18] sm:$0xff] }
0x1df1   :  { %4545 = vrcp.f32 %v3693_v63  ;;  %v4339_v63 = vpack.c.bf16 %v3763_v32, %v3762_v40 }
0x1df2   :  { %4547 = vpow2.f32 %v4011_v24 }
0x1dfb   :  { %v4546_v3 = vpop.eup %4545 }
0x1dfc   :  { %v3701_v4 = vmul.f32 %v4546_v3, %v4544_v13  ;;  %v4548_v12 = vpop.eup %4547  ;;  %v3700_v27 = vmul.f32 %v4546_v3, %v5343_v53  ;;  %v3765_v53 = vld [vmem:[%s5520_s7 + $0x28] sm:$0xff] }
0x1dfd   :  { %v3694_v26 = vadd.f32 1.0, %v4548_v12  ;;  %v4327_v15 = vpack.c.bf16 %v3765_v53, %v3764_v46 }
0x1dfe   :  { %3703 = vrot.lane.b32.xlu1 %v3701_v4, %s4654_s3  ;;  %v4016_v4 = vld [vmem:[%s5521_s8] ss:$0 sm:$0xff] }
0x1dff   :  { %4549 = vrcp.f32 %v3694_v26  ;;  %4328 = vmatprep.subr.bf16.mxu0 %v4327_v15 }
0x1e00   :  { %4330 = vmatpush3.bf16.msra.mxu0 %v4327_v15 }
0x1e01   :  { %4332 = vmatprep.subr.bf16.mxu0 %v4331_v29 }
0x1e02   :  { %2512 = vrot.lane.b32.xlu1 %v2499_v41, %s4655_s14 }
0x1e04   :  { %4334 = vmatpush3.bf16.msra.mxu0 %v4331_v29 }
0x1e05   :  { %4336 = vmatprep.subr.bf16.mxu0 %v4335_v11 }
0x1e06   :  { %2924 = vrot.lane.b32.xlu1 %v2911_v39, %s4655_s14 }
0x1e09   :  { %v4550_v9 = vpop.eup %4549 }
0x1e0a   :  { %3336 = vrot.lane.b32.xlu1 %v3323_v60, %s4655_s14 }
0x1e0e   :  { %2514 = vrot.lane.b32.xlu1 %v2503_v34, %s4655_s14 }
0x1e12   :  { %2926 = vrot.lane.b32.xlu1 %v2915_v37, %s4655_s14 }
0x1e16   :  { %3338 = vrot.lane.b32.xlu1 %v3327_v23, %s4655_s14 }
0x1e1a   :  { %2504 = vrot.lane.b32.xlu1 %v2499_v41, %s4654_s3 }
0x1e1e   :  { %2916 = vrot.lane.b32.xlu1 %v2911_v39, %s4654_s3 }
0x1e22   :  { %3328 = vrot.lane.b32.xlu1 %v3323_v60, %s4654_s3 }
0x1e26   :  { %2506 = vrot.lane.b32.xlu1 %v2503_v34, %s4654_s3 }
0x1e2a   :  { %2918 = vrot.lane.b32.xlu1 %v2915_v37, %s4654_s3 }
0x1e70   :  { %v3704_v30 = vpop.permute.xlu1 %3703 }
0x1e71   :  { %v3706_v31 = vadd.f32 %v3704_v30, %v3700_v27 }
0x1e73   :  { %4551 = vtanh.f32 %v3706_v31 }
0x1e74   :  { %v2513_v33 = vpop.permute.xlu1 %2512 }
0x1e75   :  { %2518 = vst.msk [vmem:[#allocation4 + $0x6] sm:$0x1] %vm424_vm4, %v2513_v33 }
0x1e78   :  { %v2925_v42 = vpop.permute.xlu1 %2924 }
0x1e79   :  { %2930 = vst.msk [vmem:[#allocation4 + $0x4] sm:$0x1] %vm424_vm4, %v2925_v42 }
0x1e7c   :  { %v3337_v43 = vpop.permute.xlu1 %3336 }
0x1e7d   :  { %v4552_v45 = vpop.eup %4551  ;;  %3342 = vst.msk [vmem:[#allocation4 + $0x2] sm:$0x1] %vm424_vm4, %v3337_v43 }
0x1e7e   :  { %v3708_v47 = vmul.f32 %v4552_v45, %v4550_v9 }
0x1e80   :  { %v2515_v48 = vpop.permute.xlu1 %2514  ;;  %v3716_v16 = vrot.slane %v3708_v47, %v4842_v54 }
0x1e81   :  { %2519 = vst.msk [vmem:[#allocation4 + $0xe] sm:$0x1] %vm424_vm4, %v2515_v48 }
0x1e82   :  { %v3724_v28 = vrot.slane %v3716_v16, %v4842_v54  ;;  %v3717_v19 = vcombine.high %v3716_v16, %v3716_v16 }
0x1e84   :  { %v2927_v49 = vpop.permute.xlu1 %2926  ;;  %v3735_v50 = vrot.slane %v3724_v28, %v4832_v35  ;;  %v3731_v36 = vrot.slane %v3717_v19, %v4842_v54 }
0x1e85   :  { %2931 = vst.msk [vmem:[#allocation4 + $0xc] sm:$0x1] %vm424_vm4, %v2927_v49 }
0x1e86   :  { %3748 = vrot.lane.b32.xlu1 %v3735_v50, %s4655_s14  ;;  %v3739_v44 = vrot.slane %v3731_v36, %v4832_v35 }
0x1e88   :  { %v3339_v25 = vpop.permute.xlu1 %3338 }
0x1e89   :  { %3343 = vst.msk [vmem:[#allocation4 + $0xa] sm:$0x1] %vm424_vm4, %v3339_v25 }
0x1e8a   :  { %3740 = vrot.lane.b32.xlu1 %v3735_v50, %s4654_s3 }
0x1e8c   :  { %v2505_v38 = vpop.permute.xlu1 %2504 }
0x1e8d   :  { %2510 = vst.msk [vmem:[#allocation3 + $0x1] sm:$0x1] %vm424_vm4, %v2505_v38 }
0x1e8e   :  { %3750 = vrot.lane.b32.xlu1 %v3739_v44, %s4655_s14 }
0x1e90   :  { %v2917_v55 = vpop.permute.xlu1 %2916 }
0x1e91   :  { %2922 = vst.msk [vmem:[#allocation3 + $0x3] sm:$0x1] %vm424_vm4, %v2917_v55 }
0x1e92   :  { %3330 = vrot.lane.b32.xlu1 %v3327_v23, %s4654_s3 }
0x1e94   :  { %v3329_v56 = vpop.permute.xlu1 %3328 }
0x1e95   :  { %3334 = vst.msk [vmem:[#allocation3 + $0x5] sm:$0x1] %vm424_vm4, %v3329_v56 }
0x1e96   :  { %3742 = vrot.lane.b32.xlu1 %v3739_v44, %s4654_s3 }
0x1e98   :  { %v2507_v54 = vpop.permute.xlu1 %2506 }
0x1e99   :  { %2511 = vst.msk [vmem:[#allocation3 + $0x9] sm:$0x1] %vm424_vm4, %v2507_v54 }
0x1e9c   :  { %v2919_v57 = vpop.permute.xlu1 %2918 }
0x1e9d   :  { %2923 = vst.msk [vmem:[#allocation3 + $0xb] sm:$0x1] %vm424_vm4, %v2919_v57 }
0x1ef8   :  { %v3749_v35 = vpop.permute.xlu1 %3748 }
0x1ef9   :  { %3754 = vst.msk [vmem:[#allocation4] sm:$0x1] %vm424_vm4, %v3749_v35 }
0x1efc   :  { %v3741_v58 = vpop.permute.xlu1 %3740 }
0x1efd   :  { %3746 = vst.msk [vmem:[#allocation3 + $0x7] sm:$0x1] %vm424_vm4, %v3741_v58 }
0x1f00   :  { %v3751_v59 = vpop.permute.xlu1 %3750  ;;  %v3758_v61 = vld [vmem:[#allocation4] sm:$0xff] }
0x1f01   :  { %3755 = vst.msk [vmem:[#allocation4 + $0x8] sm:$0x1] %vm424_vm4, %v3751_v59  ;;  %4037 = vmatprep.mubr.msk.f32.mxu0 %vm1909_vm5, %v3758_v61 }
0x1f04   :  { %v3331_v62 = vpop.permute.xlu1 %3330  ;;  %v3756_v3 = vld [vmem:[#allocation3] sm:$0xff] }
0x1f05   :  { %3335 = vst.msk [vmem:[#allocation3 + $0xd] sm:$0x1] %vm424_vm4, %v3331_v62 }
0x1f08   :  { %v3743_v1 = vpop.permute.xlu1 %3742  ;;  %v3759_v13 = vld [vmem:[#allocation4 + $0x8] sm:$0xff] }
0x1f09   :  { %3747 = vst.msk [vmem:[#allocation3 + $0xf] sm:$0x1] %vm424_vm4, %v3743_v1  ;;  %4038 = vmatmul.mubr.msk.f32.vlgmr.msra.gmra.mrb[20].mxu0 %vm1909_vm5, %v3759_v13 }
0x1f0a   :  { %4338 = vmatpush3.bf16.msra.mxu0 %v4335_v11  ;;  %4048 = vmatprep.mubr.msk.f32.mxu0 %vm1909_vm5, %v3756_v3 }
0x1f0b   :  { %4340 = vmatprep.subr.bf16.mxu0 %v4339_v63 }
0x1f0e   :  { %4342 = vmatpush3.bf16.msra.mxu0 %v4339_v63 }
0x1f10   :  { %v3757_v2 = vld [vmem:[#allocation3 + $0x8] sm:$0xff] }
0x1f11   :  { %4049 = vmatmul.mubr.msk.f32.vlgmr.msra.gmra.mrb[20].mxu0 %vm1909_vm5, %v3757_v2 }
0x1fe4   :  { %v4050_v21 = vpop.f32.mrb[20].mxu0 }
0x1fe5   :  { %v3938_v14 = vadd.f32 %v4050_v21, %v4016_v4  ;;  %v3921_v41 = vpop.f32.mrb[21].mxu0 }
0x1fe6   :  { %v3937_v5 = vadd.f32 %v4016_v4, %v3921_v41 }
0x1fe7   :  { %3941 = vst.msk [vmem:[#allocation11 + $0x8] sm:$0xff] %vm3939_vm6, %v3938_v14 }
0x1fe8   :  { %3940 = vst.msk [vmem:[#allocation11] sm:$0xff] %vm3939_vm6, %v3937_v5 }
0x1fe9   :  { %4630 = shalt.err (!%p4627_p0)
}
0x1fea   :  { %s4631_s8 = scalar_lea.hbm %s5522_s9, 256 }
0x1feb   :  { %p4632_p1 = scmp.ne.s32.totalorder %s5522_s9, %s4631_s8  ;;  %p4635_p2 = scmp.lt.u32.totalorder %s4631_s8, %s5522_s9 }
0x1fed   :  { %p4637_p3 = pnand %p4635_p2, %p4632_p1 }
0x1fef   :  { %4640 = shalt.err (!%p4637_p3)
}
0x1ff0   :  { %s4657_s15 = smov 128   ;;  %s4658_s16 = smov 8  }
0x1ff1   :  { %3953 = dma.vmem_to_hbm [thread:$0]  %s3948_s22, 256, %s5522_s9, [#allocation7], %s4657_s15, %s4657_s15, %s4658_s16  }
0x1ff2   :  { %4645 = dma.done.wait [#allocation7], 256  }
0x1ff3   :  { %4646 = vsyncadd [#allocation7], 4294967040 }
0x1ff4   :  { %3957 = vsyncpa [#allocation6], 1 }
0x1ff5   :  { %3958 = vsyncpa [#allocation9], 1 }
0x1ff6   :  { %3959 = vsyncpa [#allocation7], 1 }

</bundles_post_ra>
